<compile_context>
chip_gen: v5e
topology: v5e:2x2
jax: 0.10.0
libtpu: 0.0.40
codegen_flags: <defaults>
</compile_context>

<pallas_src>
import functools
import math

import jax
import jax.numpy as jnp
from jax.experimental import pallas as pl
from jax.experimental.pallas import tpu as pltpu


# ----------------------------- Pallas kernels ------------------------------

def _linear_kernel(x_ref, w_ref, b_ref, o_ref, acc_ref, *, activation):
    @pl.when(pl.program_id(2) == 0)
    def _():
        acc_ref[...] = jnp.zeros_like(acc_ref)

    acc_ref[...] += jnp.dot(x_ref[...], w_ref[...],
                            preferred_element_type=jnp.float32)

    @pl.when(pl.program_id(2) == pl.num_programs(2) - 1)
    def _():
        r = acc_ref[...] + b_ref[...]
        if activation == "relu":
            r = jnp.maximum(r, 0.0)
        elif activation == "gelu":
            # exact (erf) GELU, matching F.gelu default
            r = 0.5 * r * (1.0 + jax.lax.erf(r * 0.7071067811865476))
        o_ref[...] = r.astype(o_ref.dtype)


def _layernorm_kernel(x_ref, g_ref, b_ref, o_ref, *, eps):
    x = x_ref[...].astype(jnp.float32)
    mu = jnp.mean(x, axis=-1, keepdims=True)
    var = jnp.mean((x - mu) ** 2, axis=-1, keepdims=True)
    r = ((x - mu) * jax.lax.rsqrt(var + eps)) * g_ref[...] + b_ref[...]
    o_ref[...] = r.astype(o_ref.dtype)


def _mha_kernel(q_ref, k_ref, v_ref, o_ref, *, scale):
    q = q_ref[...].astype(jnp.float32)
    k = k_ref[...].astype(jnp.float32)
    v = v_ref[...].astype(jnp.float32)
    s = jnp.einsum("hqd,hkd->hqk", q, k,
                   preferred_element_type=jnp.float32) * scale
    s = s - jnp.max(s, axis=-1, keepdims=True)
    p = jnp.exp(s)
    denom = jnp.sum(p, axis=-1, keepdims=True)
    p = p * pl.reciprocal(denom, approx=True)
    o_ref[...] = jnp.einsum("hqk,hkd->hqd", p, v,
                            preferred_element_type=jnp.float32).astype(o_ref.dtype)


def _mse_sum_kernel(a_ref, b_ref, o_ref):
    d = a_ref[...].astype(jnp.float32) - b_ref[...].astype(jnp.float32)
    s = jnp.sum(d * d, axis=1, keepdims=True)          # (M, 1)
    o_ref[...] = jnp.sum(s, axis=0, keepdims=True)     # (1, 1)


# ----------------------------- Pallas wrappers ------------------------------

def _pick_m_tile(M):
    for c in (512, 256, 128):
        if M > c and M % c == 0:
            return c
    return M                       # full-extent block (always legal)


def _pick_n_tile(N):
    if N % 128 != 0:
        return N                   # full-extent block
    for c in (512, 256, 128):
        if N % c == 0:
            return c
    return N


def _pick_k_tile(K, tn, budget_bytes=4 * 1024 * 1024):
    if K % 128 != 0:
        return K                   # full-extent block
    tk = K
    # cap a single bf16 weight tile at ~4 MiB (2 buffers -> ~8 MiB, v7x-safe)
    while tk * max(tn, 128) * 2 > budget_bytes and tk % 256 == 0:
        tk //= 2
    return tk


def pallas_linear(x, w, b, activation=None, out_dtype=jnp.float32):
    """(M,K) @ (K,N) + b with optional fused relu/gelu. bf16 MXU, f32 accum."""
    M, K = x.shape
    K2, N = w.shape
    assert K == K2, (K, K2)
    x = x.astype(jnp.bfloat16)
    w = w.astype(jnp.bfloat16)            # no-op: weights are bf16 from init
    b = jnp.asarray(b, jnp.float32).reshape(1, N)

    tm = _pick_m_tile(M)
    tn = _pick_n_tile(N)
    tk = _pick_k_tile(K, tn)
    grid = (M // tm, N // tn, K // tk)

    return pl.pallas_call(
        functools.partial(_linear_kernel, activation=activation),
        out_shape=jax.ShapeDtypeStruct((M, N), out_dtype),
        grid_spec=pltpu.PrefetchScalarGridSpec(
            num_scalar_prefetch=0,
            grid=grid,
            in_specs=[pl.BlockSpec((tm, tk), lambda i, j, k: (i, k)),
                      pl.BlockSpec((tk, tn), lambda i, j, k: (k, j)),
                      pl.BlockSpec((1, tn), lambda i, j, k: (0, j))],
            out_specs=pl.BlockSpec((tm, tn), lambda i, j, k: (i, j)),
            scratch_shapes=[pltpu.VMEM((tm, tn), jnp.float32)]),
        compiler_params=pltpu.CompilerParams(
            dimension_semantics=("parallel", "parallel", "arbitrary")),
    )(x, w, b)


def pallas_layernorm(x, gamma, beta, eps=1e-5):
    M, D = x.shape
    return pl.pallas_call(
        functools.partial(_layernorm_kernel, eps=eps),
        out_shape=jax.ShapeDtypeStruct((M, D), jnp.float32),
        grid=(1,),
        in_specs=[pl.BlockSpec((M, D), lambda i: (0, 0)),
                  pl.BlockSpec((1, D), lambda i: (0, 0)),
                  pl.BlockSpec((1, D), lambda i: (0, 0))],
        out_specs=pl.BlockSpec((M, D), lambda i: (0, 0)),
    )(x.astype(jnp.float32),
      gamma.reshape(1, D).astype(jnp.float32),
      beta.reshape(1, D).astype(jnp.float32))


def pallas_mha(q, k, v, scale):
    """q,k,v: (H, S, Dh) -> softmax(q k^T * scale) v, per head.

    Monolithic (grid=(1,)) block: fine for the tiny S used here.
    # TODO(synk): convert to the flash (online-softmax) pattern before using at
    # real sequence lengths (this layout hits v7x VMEM first).
    """
    H, S, Dh = q.shape
    return pl.pallas_call(
        functools.partial(_mha_kernel, scale=scale),
        out_shape=jax.ShapeDtypeStruct((H, S, Dh), jnp.float32),
        grid=(1,),
        in_specs=[pl.BlockSpec((H, S, Dh), lambda i: (0, 0, 0))] * 3,
        out_specs=pl.BlockSpec((H, S, Dh), lambda i: (0, 0, 0)),
    )(q.astype(jnp.float32), k.astype(jnp.float32), v.astype(jnp.float32))


def pallas_mse(a, b):
    M, D = a.shape
    s = pl.pallas_call(
        _mse_sum_kernel,
        out_shape=jax.ShapeDtypeStruct((1, 1), jnp.float32),
        grid=(1,),
        in_specs=[pl.BlockSpec((M, D), lambda i: (0, 0)),
                  pl.BlockSpec((M, D), lambda i: (0, 0))],
        out_specs=pl.BlockSpec((1, 1), lambda i: (0, 0)),
    )(a.astype(jnp.float32), b.astype(jnp.float32))
    return s[0, 0] / (M * D)


# ----------------------------- parameters ------------------------------

def _linear_params(key, fan_in, fan_out):
    kw, kb = jax.random.split(key)
    w = jax.random.normal(kw, (fan_in, fan_out), jnp.float32) / math.sqrt(fan_in)
    b = jax.random.normal(kb, (fan_out,), jnp.float32) * 0.01
    return {"w": w.astype(jnp.bfloat16), "b": b}        # bf16 weights cast once


def _attn_params(key, embed):
    kq, kk, kv = jax.random.split(key, 3)
    q = _linear_params(kq, embed, embed)
    k = _linear_params(kk, embed, embed)
    v = _linear_params(kv, embed, embed)
    # merge K and V projections (same input y) into one weight stream
    return {"q_w": q["w"], "q_b": q["b"],
            "kv_w": jnp.concatenate([k["w"], v["w"]], axis=1),
            "kv_b": jnp.concatenate([k["b"], v["b"]], axis=0)}


def _fold_deconv_bn(key, cin, cout, eps=1e-5):
    """ConvTranspose2d(k=2, s=2) weights with BatchNorm(eval) folded in."""
    kw, kb = jax.random.split(key)
    w = jax.random.normal(kw, (cin, cout, 2, 2), jnp.float32) / math.sqrt(cin * 4)
    b = jax.random.normal(kb, (cout,), jnp.float32) * 0.01
    g = jnp.ones((cout,)); beta = jnp.zeros((cout,))
    rm = jnp.zeros((cout,)); rv = jnp.ones((cout,))      # fresh BN running stats
    scale = g / jnp.sqrt(rv + eps)
    shift = beta - rm * scale
    w2 = w.reshape(cin, cout * 4)                        # columns: (cout, kh, kw)
    scale4 = jnp.repeat(scale, 4)
    b_fold = jnp.repeat(b, 4) * scale4 + jnp.repeat(shift, 4)
    return {"w": (w2 * scale4[None, :]).astype(jnp.bfloat16),
            "b": b_fold, "cout": cout}


def _fold_conv1x1_bn(key, cin, cout, eps=1e-5):
    kw, kb = jax.random.split(key)
    w = jax.random.normal(kw, (cin, cout), jnp.float32) / math.sqrt(cin)
    b = jax.random.normal(kb, (cout,), jnp.float32) * 0.01
    g = jnp.ones((cout,)); beta = jnp.zeros((cout,))
    rm = jnp.zeros((cout,)); rv = jnp.ones((cout,))
    scale = g / jnp.sqrt(rv + eps)
    shift = beta - rm * scale
    return {"w": (w * scale[None, :]).astype(jnp.bfloat16),
            "b": b * scale + shift}


def init_params(key, embed_size=1024, ff_hidden=2048, output_dim=2,
                num_classes=2, patch=32, in_ch=3):
    keys = iter(jax.random.split(key, 64))
    p = {}
    # TODO(synk): timm convnextv2_base backbone + safetensors checkpoint load has
    # no clean Pallas equivalent; replaced with a deterministic 32x patch-embed
    # stem producing the same (B, 1024, H/32, W/32) feature-map shape.
    p["stem"] = _linear_params(next(keys), in_ch * patch * patch, embed_size)
    # head: NormMlpClassifierHead(1024, 2): avg-pool -> layernorm2d -> fc
    p["head_norm"] = {"g": jnp.ones((embed_size,)), "b": jnp.zeros((embed_size,))}
    p["head_fc"] = _linear_params(next(keys), embed_size, num_classes)
    # TODO(synk): CustomNetwork (r_model) is undefined in the reference source;
    # stand-in: a single Linear(embed_size, embed_size).
    p["r_model"] = _linear_params(next(keys), embed_size, embed_size)
    p["attn_x"] = _attn_params(next(keys), embed_size)
    p["attn_y"] = _attn_params(next(keys), embed_size)
    for name in ("norm1_x", "norm2_x", "norm1_y", "norm2_y"):
        p[name] = {"g": jnp.ones((embed_size,)), "b": jnp.zeros((embed_size,))}
    # shared feed-forward (applied to both x and y, as in the reference)
    p["ff1"] = _linear_params(next(keys), embed_size, ff_hidden)
    p["ff2"] = _linear_params(next(keys), ff_hidden, embed_size)
    # nn.TransformerEncoderLayer(d_model=2*embed, nhead=4, ff=ff_hidden, relu)
    d_model = 2 * embed_size
    p["enc_in_proj"] = _linear_params(next(keys), d_model, 3 * d_model)
    p["enc_out_proj"] = _linear_params(next(keys), d_model, d_model)
    p["enc_ln1"] = {"g": jnp.ones((d_model,)), "b": jnp.zeros((d_model,))}
    p["enc_ln2"] = {"g": jnp.ones((d_model,)), "b": jnp.zeros((d_model,))}
    p["enc_ff1"] = _linear_params(next(keys), d_model, ff_hidden)
    p["enc_ff2"] = _linear_params(next(keys), ff_hidden, d_model)
    p["fc"] = _linear_params(next(keys), d_model, output_dim)
    # Decoder: 5x [ConvTranspose2d(k=2,s=2) + BN + GELU] then 1x1 conv + BN + GELU,
    # with BN folded into the matmul weights (inference).
    dec_chs = [(1024, 512), (512, 256), (256, 128), (128, 64), (64, 32)]
    p["dec_up"] = [_fold_deconv_bn(next(keys), cin, cout) for cin, cout in dec_chs]
    p["dec_out"] = _fold_conv1x1_bn(next(keys), 32, num_classes)
    # AttentionWeighting: Linear(4096 = embed + 2*embed + embed, 3)
    p["att"] = _linear_params(next(keys), 4 * embed_size, 3)
    return p


# ----------------------------- model pieces ------------------------------

def backbone_features(p, x_nchw, patch=32):
    B, C, H, W = x_nchw.shape
    h, w = H // patch, W // patch
    x = x_nchw.reshape(B, C, h, patch, w, patch)
    x = jnp.transpose(x, (0, 2, 4, 1, 3, 5)).reshape(B * h * w, C * patch * patch)
    f = pallas_linear(x, p["stem"]["w"], p["stem"]["b"])
    return f.reshape(B, h, w, -1)          # NHWC feature map


def head_forward(p, feat_nhwc):
    pooled = jnp.mean(feat_nhwc, axis=(1, 2))                       # (B, C)
    normed = pallas_layernorm(pooled, p["head_norm"]["g"],
                              p["head_norm"]["b"], eps=1e-6)
    return pallas_linear(normed, p["head_fc"]["w"], p["head_fc"]["b"])


def simple_self_attention(p_attn, x, y, embed_size):
    q = pallas_linear(x, p_attn["q_w"], p_attn["q_b"])
    kv = pallas_linear(y, p_attn["kv_w"], p_attn["kv_b"])
    k, v = kv[:, :embed_size], kv[:, embed_size:]
    out = pallas_mha(q[None], k[None], v[None], 1.0 / math.sqrt(embed_size))
    return out[0]


def feed_forward(p, x):
    h = pallas_linear(x, p["ff1"]["w"], p["ff1"]["b"], activation="relu")
    return pallas_linear(h, p["ff2"]["w"], p["ff2"]["b"])


def transformer_encoder(p, src, nhead=4):
    # nn.TransformerEncoderLayer, post-norm, relu, unbatched (S, E) input,
    # dropout = identity (inference).
    S, d_model = src.shape
    head_dim = d_model // nhead
    qkv = pallas_linear(src, p["enc_in_proj"]["w"], p["enc_in_proj"]["b"])
    q, k, v = jnp.split(qkv, 3, axis=-1)

    def heads(t):
        return jnp.transpose(t.reshape(S, nhead, head_dim), (1, 0, 2))

    attn = pallas_mha(heads(q), heads(k), heads(v), 1.0 / math.sqrt(head_dim))
    attn = jnp.transpose(attn, (1, 0, 2)).reshape(S, d_model)
    attn = pallas_linear(attn, p["enc_out_proj"]["w"], p["enc_out_proj"]["b"])
    src = pallas_layernorm(src + attn, p["enc_ln1"]["g"], p["enc_ln1"]["b"])
    ff = pallas_linear(src, p["enc_ff1"]["w"], p["enc_ff1"]["b"], activation="relu")
    ff = pallas_linear(ff, p["enc_ff2"]["w"], p["enc_ff2"]["b"])
    return pallas_layernorm(src + ff, p["enc_ln2"]["g"], p["enc_ln2"]["b"])


def decoder_forward(p, feat_nhwc, output_size):
    """Batched (x & y stacked on the batch dim) decoder; BN+GELU fused into the
    matmul epilogue; intermediates kept bf16 to halve activation HBM traffic."""
    x = feat_nhwc
    for st in p["dec_up"]:
        B, H, W, Cin = x.shape
        cout = st["cout"]
        # ConvTranspose2d(k=2, s=2) == per-input-pixel matmul Cin -> Cout*4,
        # with BN scale/shift folded into w/b and GELU fused in the kernel.
        o = pallas_linear(x.reshape(B * H * W, Cin), st["w"], st["b"],
                          activation="gelu", out_dtype=jnp.bfloat16)
        o = o.reshape(B, H, W, cout, 2, 2)
        x = jnp.transpose(o, (0, 1, 4, 2, 5, 3)).reshape(B, 2 * H, 2 * W, cout)
    B, H, W, C = x.shape
    # F.interpolate bilinear, align_corners=False (half-pixel).
    x = jax.image.resize(x, (B, output_size, output_size, C), method="bilinear")
    B, H, W, C = x.shape
    x = pallas_linear(x.reshape(B * H * W, C), p["dec_out"]["w"], p["dec_out"]["b"],
                      activation="gelu", out_dtype=jnp.float32)
    Cout = x.shape[-1]
    x = x.reshape(B, H, W, Cout)
    return jnp.transpose(x, (0, 3, 1, 2))       # back to NCHW


def attention_weighting(p_att, features, classifier_outputs):
    logits = pallas_linear(features, p_att["w"], p_att["b"])    # (B, 3)
    weights = jax.nn.softmax(logits, axis=1)
    stacked = jnp.stack(classifier_outputs, axis=1)             # (B, 3, K)
    return jnp.einsum("bc,bck->bk", weights, stacked)           # tiny bmm glue


# ----------------------------- full forward ------------------------------

def transformer_encoder_layer_forward(params, x_nchw, y_nchw, embed_size=1024):
    input_size = x_nchw.shape[2]
    B = x_nchw.shape[0]

    # Batch x and y through every shared-weight module (stem / head / decoder)
    # so each weight matrix is streamed from HBM once.
    xy = jnp.concatenate([x_nchw, y_nchw], axis=0)          # (2B, C, H, W)
    feats = backbone_features(params, xy)                   # (2B, h, w, 1024)
    heads = head_forward(params, feats)                     # (2B, 2)
    x1, y1 = heads[:B], heads[B:]

    pooled = jnp.mean(feats, axis=(1, 2))                   # global_pool + flatten
    x, y = pooled[:B], pooled[B:]
    xf, yf = x, y
    xxf = pallas_linear(jax.lax.stop_gradient(xf),
                        params["r_model"]["w"], params["r_model"]["b"])
    mse = pallas_mse(xxf, yf)

    attention_x = simple_self_attention(params["attn_x"], x, y, embed_size)
    x = pallas_layernorm(attention_x + x, params["norm1_x"]["g"], params["norm1_x"]["b"])
    x = pallas_layernorm(feed_forward(params, x) + x,
                         params["norm2_x"]["g"], params["norm2_x"]["b"])

    # NOTE: feed_forward(y) depends on the updated x via attention_y, so the two
    # FF passes cannot be batched without changing semantics.
    attention_y = simple_self_attention(params["attn_y"], y, x, embed_size)
    y = pallas_layernorm(attention_y + y, params["norm1_y"]["g"], params["norm1_y"]["b"])
    y = pallas_layernorm(feed_forward(params, y) + y,
                         params["norm2_y"]["g"], params["norm2_y"]["b"])

    concat_xy = jnp.concatenate([x, y], axis=1)       # (B, 2048)
    encoded = transformer_encoder(params, concat_xy)  # (B, 2048)
    # self.dropout(encoded) -> identity in inference
    output = pallas_linear(encoded, params["fc"]["w"], params["fc"]["b"])

    dec = decoder_forward(params, feats, input_size)  # (2B, 2, S, S), x & y batched
    xd, yd = dec[:B], dec[B:]

    ff = jax.lax.stop_gradient(jnp.concatenate([xf, encoded, yf], axis=1))
    weight_out = attention_weighting(params["att"], ff, [x1, output, y1])
    return weight_out, xd, yd, mse


if __name__ == "__main__":
    key = jax.random.PRNGKey(0)
    kp, kx, ky = jax.random.split(key, 3)
    params = init_params(kp)
    B, C, S = 2, 3, 64
    x = jax.random.normal(kx, (B, C, S, S), jnp.float32)
    y = jax.random.normal(ky, (B, C, S, S), jnp.float32)
    out = transformer_encoder_layer_forward(params, x, y)
    out = jax.block_until_ready(out)
    weight_out, xd, yd, mse = out
    assert weight_out.shape == (B, 2)
    assert xd.shape == (B, 2, S, S) and yd.shape == (B, 2, S, S)
    assert mse.shape == ()
    print("KERNEL_OK")
</pallas_src>

<mosaic_0001>
module attributes {stable_mosaic.version = 11 : i64} {
  func.func @_linear_kernel(%arg0: i32, %arg1: i32, %arg2: i32, %arg3: memref<16x3072xbf16, #tpu.memory_space<vmem>>, %arg4: memref<3072x512xbf16, #tpu.memory_space<vmem>>, %arg5: memref<1x512xf32, #tpu.memory_space<vmem>>, %arg6: memref<16x512xf32, #tpu.memory_space<vmem>>, %arg7: memref<16x512xf32, #tpu.memory_space<vmem>>) attributes {dimension_semantics = [#tpu.dimension_semantics<parallel>, #tpu.dimension_semantics<parallel>, #tpu.dimension_semantics<arbitrary>], iteration_bounds = array<i64: 1, 2, 1>, scalar_prefetch = 0 : i64, scratch_operands = 1 : i64, tpu.core_type = #tpu.core_type<tc>, window_params = [{transform_indices = @transform_0, window_bounds = array<i64: 16, 3072>}, {transform_indices = @transform_1, window_bounds = array<i64: 3072, 512>}, {transform_indices = @transform_2, window_bounds = array<i64: 1, 512>}, {transform_indices = @transform_3, window_bounds = array<i64: 16, 512>}]} {
    %c0_i32 = arith.constant 0 : i32
    %0 = arith.cmpi eq, %arg2, %c0_i32 : i32
    %1 = arith.extui %0 : i1 to i32
    %c0_i32_0 = arith.constant 0 : i32
    %2 = arith.cmpi ne, %1, %c0_i32_0 : i32
    scf.if %2 {
      %cst_10 = arith.constant 0.000000e+00 : f32
      %12 = vector.broadcast %cst_10 : f32 to vector<16x512xf32>
      %c0_11 = arith.constant 0 : index
      %c0_12 = arith.constant 0 : index
      %13 = vector.load %arg7[%c0_11, %c0_12] : memref<16x512xf32, #tpu.memory_space<vmem>>, vector<16x512xf32>
      tpu.vector_store %arg7[%c0_11, %c0_12], %12 {strides = array<i32>} : memref<16x512xf32, #tpu.memory_space<vmem>>, vector<16x512xf32>,
    } else {
    }
    %c0 = arith.constant 0 : index
    %c0_1 = arith.constant 0 : index
    %3 = vector.load %arg7[%c0, %c0_1] : memref<16x512xf32, #tpu.memory_space<vmem>>, vector<16x512xf32>
    %c0_2 = arith.constant 0 : index
    %c0_3 = arith.constant 0 : index
    %4 = vector.load %arg3[%c0_2, %c0_3] : memref<16x3072xbf16, #tpu.memory_space<vmem>>, vector<16x3072xbf16>
    %c0_4 = arith.constant 0 : index
    %c0_5 = arith.constant 0 : index
    %5 = vector.load %arg4[%c0_4, %c0_5] : memref<3072x512xbf16, #tpu.memory_space<vmem>>, vector<3072x512xbf16>
    %cst = arith.constant dense<0.000000e+00> : vector<16x512xf32>
    %6 = tpu.matmul %4, %5, %cst {dimension_numbers = #tpu.dot_dimension_numbers<[1], [0], [0], [1], [0, 0, 1, 1], [], []>} : vector<16x3072xbf16>, vector<3072x512xbf16>, vector<16x512xf32> -> vector<16x512xf32>
    %7 = arith.addf %3, %6 : vector<16x512xf32>
    %c0_6 = arith.constant 0 : index
    %c0_7 = arith.constant 0 : index
    %8 = vector.load %arg7[%c0_6, %c0_7] : memref<16x512xf32, #tpu.memory_space<vmem>>, vector<16x512xf32>
    tpu.vector_store %arg7[%c0_6, %c0_7], %7 {strides = array<i32>} : memref<16x512xf32, #tpu.memory_space<vmem>>, vector<16x512xf32>,
    %c0_i32_8 = arith.constant 0 : i32
    %9 = arith.cmpi eq, %arg2, %c0_i32_8 : i32
    %10 = arith.extui %9 : i1 to i32
    %c0_i32_9 = arith.constant 0 : i32
    %11 = arith.cmpi ne, %10, %c0_i32_9 : i32
    scf.if %11 {
      %c0_10 = arith.constant 0 : index
      %c0_11 = arith.constant 0 : index
      %12 = vector.load %arg7[%c0_10, %c0_11] : memref<16x512xf32, #tpu.memory_space<vmem>>, vector<16x512xf32>
      %c0_12 = arith.constant 0 : index
      %c0_13 = arith.constant 0 : index
      %13 = vector.load %arg5[%c0_12, %c0_13] : memref<1x512xf32, #tpu.memory_space<vmem>>, vector<1x512xf32>
      %14 = vector.broadcast %13 : vector<1x512xf32> to vector<16x512xf32>
      %15 = arith.addf %12, %14 : vector<16x512xf32>
      %c0_14 = arith.constant 0 : index
      %c0_15 = arith.constant 0 : index
      %16 = vector.load %arg6[%c0_14, %c0_15] : memref<16x512xf32, #tpu.memory_space<vmem>>, vector<16x512xf32>
      tpu.vector_store %arg6[%c0_14, %c0_15], %15 {strides = array<i32>} : memref<16x512xf32, #tpu.memory_space<vmem>>, vector<16x512xf32>,
    } else {
    }
    return
  }
  func.func @transform_0(%arg0: i32, %arg1: i32, %arg2: i32) -> (i32, i32) {
    %c0_i32 = arith.constant 0 : i32
    return %arg0, %arg2 : i32, i32
  }
  func.func @transform_1(%arg0: i32, %arg1: i32, %arg2: i32) -> (i32, i32) {
    %c0_i32 = arith.constant 0 : i32
    return %arg2, %arg1 : i32, i32
  }
  func.func @transform_2(%arg0: i32, %arg1: i32, %arg2: i32) -> (i32, i32) {
    %c0_i32 = arith.constant 0 : i32
    %c0_i32_0 = arith.constant 0 : i32
    return %c0_i32, %arg1 : i32, i32
  }
  func.func @transform_3(%arg0: i32, %arg1: i32, %arg2: i32) -> (i32, i32) {
    %c0_i32 = arith.constant 0 : i32
    return %arg0, %arg1 : i32, i32
  }
}

</mosaic_0001>

<bundles_post_ra>
// kernel: tpu_custom_call.1
= control target key start
LH: loop header
LB: loop body
LE: loop exit
PB: predicated region body
PF: predicated region fallthrough
CT: control target
= control target key end

     0   :  { %s13052_s0 = inlined_call_operand.hbm [shape: bf16[16,3072], index: 0, kind: input, shape index: {}]   ;;  %s13053_s1 = inlined_call_operand.hbm [shape: bf16[3072,1024], index: 1, kind: input, shape index: {}]   ;;  %s13054_s2 = inlined_call_operand.hbm [shape: f32[1,1024], index: 2, kind: input, shape index: {}]   ;;  %s13055_s3 = inlined_call_operand.hbm [shape: f32[16,1024], index: 3, kind: output, shape index: {}]  }
   0x1   :  { %13062 = sst [smem:[#allocation16_spill]] %s13052_s0 }
   0x2   :  { %13063 = sst [smem:[#allocation17_spill]] %s13053_s1 }
   0x3   :  { %8 = vsyncpa [#allocation4], 0 }
   0x4   :  { %9 = vsyncpa [#allocation7], 0 }
   0x5   :  { %11 = vsyncpa [#allocation7 + $0x1], 0 }
   0x6   :  { %12 = vsyncpa [#allocation5], 0 }
   0x7   :  { %14 = vsyncpa [#allocation5 + $0x1], 0  ;;  %s10882_s12 = smov 0   ;;  %s10884_s13 = smov 0  }
   0x8   :  { %s10886_s14 = smov 0   ;;  %s10888_s15 = smov 0  }
   0x9   :  { %s10890_s16 = smov 0   ;;  %s10892_s17 = smov 0  }
   0xa LB: > { %s35_s18 = sadd.s32 1, %s10847_s16  ;;  %s76_s19 = sadd.s32 1, %s10839_s14  ;;  %s10851_s17 = sphi %s10892_s17, %s20_s17   ;;  %s10847_s16 = sphi %s10890_s16, %s13084_s16   ;;  %s10843_s15 = sphi %s10888_s15, %s13083_s15   ;;  %s10839_s14 = sphi %s10886_s14, %s13082_s14   ;;  %s10835_s13 = sphi %s10884_s13, %s13081_s13   ;;  %s10831_s12 = sphi %s10882_s12, %s13080_s12  }
   0xb   : > { %p37_p0 = scmp.ge.s32.totalorder %s35_s18, 2  ;;  %p83_p1 = scmp.ne.s32.totalorder %s10839_s14, %s10835_s13 }
   0xc   : > { %p84_p2 = scmp.eq.s32.totalorder %s10851_s17, 0  ;;  %p6609_p3 = scmp.ge.s32.totalorder %s10851_s17, 2 }
   0xd   : > { %s13086_s18 = smov (%p37_p0, %s35_s18), 0  ;;  %p10613_p5 = scmp.lt.s32.totalorder %s10851_s17, 2 }
   0xe   : > { %p85_p4 = por %p84_p2, %p83_p1  ;;  %s72_s20 = ssub.s32 %s10847_s16, %s13086_s18 }
   0xf   : > { %s187_s21 = sand.u32 1, %s10851_s17   ;;  %p74_p6 = scmp.eq.s32.totalorder %s72_s20, 0 }
  0x10   : > { %s189_s22 = sand.u32 1, %s10839_s14   ;;  %s9791_s23 = sshll.u32 %s10847_s16, 4 }
  0x11   : > { %s10930_s24 = scalar_select %p74_p6, %s10839_s14, %s76_s19  }
  0x12   : > { %s10585_s25 = smul.u32 6144, %s189_s22  ;;  %s13064_s1 = sld [smem:[#allocation17_spill]] }
  0x13   : > { %p10937_p7 = pnand %p10613_p5, %p85_p4  ;;  %s10941_s6 = scalar_lea.sflag [#allocation7], %s187_s21 }
  0x14   : > { %s191_s4 = scalar_lea.vmem [#allocation6], %s10585_s25  ;;  %s10853_s7 = smov 512  }
  0x15   : > { %s202_s5 = sshll.u32 %s191_s4, 4  ;;  %s10854_s8 = smov 256   ;;  %s203_s5 = int_to_ptr.vmem [resolvable:$true] %s202_s5 }
  0x16   : > { %s10855_s9 = smov 16   ;;  %s10947_s10 = sadd.s32 4294967295, %s10851_s17  }
  0x17   : > { %s6606_s11 = sadd.s32 4294967294, %s10851_s17   ;;  %p89_p8 = scmp.ne.s32.totalorder %s10835_s13, %s10831_s12 }
  0x18   : > { %s199_s28 = scalar_lea.hbm %s13064_s1, %s9791_s23  ;;  %p90_p9 = scmp.eq.s32.totalorder %s10947_s10, 0 }
  0x19   : > { %s200_s29 = sshll.u32 %s199_s28, 4  ;;  %p141_p10 = scmp.eq.s32.totalorder %s10947_s10, 1  ;;  %s201_s29 = int_to_ptr.hbm [resolvable:$true] %s200_s29 }
  0x1a   : > { %10604 = dma.hbm_to_vmem [thread:$0]  (!%p10937_p7), %s201_s29, 98304, %s203_s5, %s10941_s6, %s10853_s7, %s10854_s8, %s10855_s9  }
  0x1b   : > { %p147_p11 = scmp.eq.s32.totalorder %s6606_s11, 1  ;;  %p10956_p12 = por %p90_p9, %p89_p8 }
  0x1c   : > { %p6607_p13 = scmp.ge.s32.totalorder %s10851_s17, 1  ;;  %p10964_p0 = por %p141_p10, %p83_p1 }
  0x1d   : > { %p10968_p2 = por %p147_p11, %p89_p8  ;;  %p154_p4 = scmp.lt.s32.totalorder %s10851_s17, 3 }
  0x1e   : > { %s13069_s0 = sld [smem:[#allocation16_spill]]  ;;  %s10856_s28 = smov [#allocation3]  }
  0x1f   : > { %p10976_p5 = pnand %p6607_p13, %p154_p4  ;;  %s173_s29 = sshll.u32 %s10856_s28, 4  ;;  %s174_s29 = int_to_ptr.vmem [resolvable:$true] %s173_s29 }
  0x20   : > { %s6612_s4 = sshll.u32 %s189_s22, 2  ;;  %s6613_s5 = sshll.u32 %s10847_s16, 2 }
  0x21   : > { %p10597_p1 = pneg %p10976_p5  ;;  %s216_s7 = scalar_lea.vmem [#allocation8], %s6612_s4 }
  0x22   : > { %s224_s8 = sshll.u32 %s216_s7, 4  ;;  %s220_s23 = scalar_lea.hbm %s13054_s2, %s6613_s5  ;;  %s225_s8 = int_to_ptr.vmem [resolvable:$true] %s224_s8 }
  0x23   : > { %p10598_p6 = pnand %p10597_p1, %p90_p9  ;;  %s10857_s25 = smov 1536  }
  0x24   : > { %s171_s26 = sshll.u32 %s13069_s0, 4  ;;  %s10858_s0 = smov 96   ;;  %s172_s26 = int_to_ptr.hbm [resolvable:$true] %s171_s26 }
  0x25   : > { %10600 = dma.hbm_to_vmem [thread:$0]  (!%p10598_p6), %s172_s26, 3072, %s174_s29, [#allocation4], %s10857_s25, %s10857_s25, %s10858_s0  }
  0x26   : > { %s222_s1 = sshll.u32 %s220_s23, 4  ;;  %233 = sbr.rel (%p10976_p5) target bundleno = 978 (0x3d2), region = 32  ;;  %s223_s1 = int_to_ptr.hbm [resolvable:$true] %s222_s1 }
  0x27   : > { %10607 = dma.hbm_to_vmem [thread:$0]  (!%p10937_p7), %s223_s1, 64, %s225_s8, %s10941_s6  }
  0x2b   : > { %10818 = dma.done.wait (%p90_p9), [#allocation4], 3072  }
  0x2c   : > { %10820 = vsyncadd (%p90_p9), [#allocation4], 4294964224  ;;  %s240_s22 = sand.u32 1, %s10947_s10   ;;  %s11001_s28 = sand.u32 1, %s10835_s13  }
  0x2d   : > { %s10586_s0 = smul.u32 6144, %s11001_s28  ;;  %s241_s26 = scalar_lea.sflag [#allocation7], %s240_s22 }
  0x2f   : > { %s11004_s30 = scalar_lea.vmem [#allocation6], %s10586_s0 }
  0x30   : > { %10822 = dma.done.wait (%p10956_p12), %s241_s26, 98368  }
  0x31   : > { %10824 = vsyncadd (%p10956_p12), %s241_s26, 4294868928  ;;  %v6828_v0 = vld [vmem:[%s11004_s30 + $0xe0] sm:$0xf]  ;;  %v9846_v1 = vld [vmem:[%s11004_s30 + $0xec] sm:$0xf0]  ;;  %s6616_s1 = sshll.u32 %s11001_s28, 2 }
  0x32   : > { %v6956_v2 = vld [vmem:[%s11004_s30 + $0x1e0] sm:$0xf]  ;;  %v6829_v3 = vor.u32 %v9846_v1, %v6828_v0  ;;  %v9878_v4 = vld [vmem:[%s11004_s30 + $0x1ec] sm:$0xf0]  ;;  %s6617_s6 = sshll.u32 %s11001_s28, 6  ;;  %s11878_s10 = scalar_lea.vmem [#allocation8], %s6616_s1 }
  0x33   : > { %v7084_v5 = vld [vmem:[%s11004_s30 + $0x2e0] sm:$0xf]  ;;  %v9910_v6 = vld [vmem:[%s11004_s30 + $0x2ec] sm:$0xf0]  ;;  %v6957_v7 = vor.u32 %v9878_v4, %v6956_v2  ;;  %s11906_s19 = scalar_lea.vmem [#allocation9], %s6617_s6  ;;  %s10584_s27 = sshll.u32 %s10843_s15, 5 }
  0x34   : > { %v7085_v8 = vor.u32 %v9910_v6, %v7084_v5  ;;  %v7212_v9 = vld [vmem:[%s11004_s30 + $0x3e0] sm:$0xf]  ;;  %v9942_v10 = vld [vmem:[%s11004_s30 + $0x3ec] sm:$0xf0]  ;;  %5062 = vmatpush.bf16.msra.mxu0 %v6829_v3  ;;  %s6474_s5 = scalar_lea.hbm %s13055_s3, %s10584_s27  ;;  %s6475_s7 = sshll.u32 %s11906_s19, 4  ;;  %s6476_s7 = int_to_ptr.vmem [resolvable:$true] %s6475_s7 }
  0x35   : > { %v6812_v11 = vld [vmem:[%s11004_s30 + $0xc0] sm:$0xf]  ;;  %v7213_v12 = vor.u32 %v9942_v10, %v7212_v9  ;;  %v9842_v13 = vld [vmem:[%s11004_s30 + $0xcc] sm:$0xf0]  ;;  %5076 = vmatpush.bf16.msra.mxu1 %v6957_v7  ;;  %s6477_s8 = sshll.u32 %s6474_s5, 4  ;;  %s6460_s15 = scalar_lea.sflag [#allocation5], %s11001_s28  ;;  %s6478_s8 = int_to_ptr.hbm [resolvable:$true] %s6477_s8 }
  0x36   : > { %v6940_v14 = vld [vmem:[%s11004_s30 + $0x1c0] sm:$0xf]  ;;  %v9874_v15 = vld [vmem:[%s11004_s30 + $0x1cc] sm:$0xf0]  ;;  %5090 = vmatpush.bf16.msra.mxu2 %v7085_v8  ;;  %v6813_v16 = vor.u32 %v9842_v13, %v6812_v11  ;;  %s10779_s9 = sshra.s32 %s6478_s8, 4  ;;  %s10785_s22 = scalar_lea.hbm %s13055_s3, 128  ;;  %s10780_s9 = int_to_ptr.hbm [resolvable:$true] %s10779_s9 }
  0x37   : > { %v6941_v17 = vor.u32 %v9874_v15, %v6940_v14  ;;  %v7068_v18 = vld [vmem:[%s11004_s30 + $0x2c0] sm:$0xf]  ;;  %v9906_v19 = vld [vmem:[%s11004_s30 + $0x2cc] sm:$0xf0]  ;;  %5104 = vmatpush.bf16.msra.mxu3 %v7213_v12  ;;  %s10781_s11 = scalar_lea.hbm %s10780_s9, 64  ;;  %p10786_p10 = scmp.lt.s32.totalorder %s10780_s9, %s13055_s3 }
  0x38   : > { %v7196_v20 = vld [vmem:[%s11004_s30 + $0x3c0] sm:$0xf]  ;;  %v7069_v21 = vor.u32 %v9906_v19, %v7068_v18  ;;  %v9938_v22 = vld [vmem:[%s11004_s30 + $0x3cc] sm:$0xf0]  ;;  %5063 = vmatpush.bf16.msra.mxu0 %v6813_v16  ;;  %p10782_p7 = scmp.ne.s32.totalorder %s10780_s9, %s10781_s11  ;;  %p10787_p11 = scmp.lt.s32.totalorder %s10785_s22, %s10781_s11 }
  0x39   : > { %v6796_v23 = vld [vmem:[%s11004_s30 + $0xa0] sm:$0xf]  ;;  %v9838_v24 = vld [vmem:[%s11004_s30 + $0xac] sm:$0xf0]  ;;  %v7197_v25 = vor.u32 %v9938_v22, %v7196_v20  ;;  %5077 = vmatpush.bf16.msra.mxu1 %v6941_v17 }
  0x3a   : > { %v6924_v26 = vld [vmem:[%s11004_s30 + $0x1a0] sm:$0xf]  ;;  %v9870_v27 = vld [vmem:[%s11004_s30 + $0x1ac] sm:$0xf0]  ;;  %v6797_v29 = vor.u32 %v9838_v24, %v6796_v23  ;;  %5091 = vmatpush.bf16.msra.mxu2 %v7069_v21  ;;  %p10783_p8 = pnand %p10782_p7, %p10964_p0  ;;  %p10788_p12 = por %p10787_p11, %p10786_p10 }
  0x3b   : > { %v7052_v28 = vld [vmem:[%s11004_s30 + $0x2a0] sm:$0xf]  ;;  %v9902_v30 = vld [vmem:[%s11004_s30 + $0x2ac] sm:$0xf0]  ;;  %v6925_v33 = vor.u32 %v9870_v27, %v6924_v26  ;;  %5105 = vmatpush.bf16.msra.mxu3 %v7197_v25 }
  0x3c   : > { %v7180_v31 = vld [vmem:[%s11004_s30 + $0x3a0] sm:$0xf]  ;;  %v9934_v32 = vld [vmem:[%s11004_s30 + $0x3ac] sm:$0xf0]  ;;  %v7053_v34 = vor.u32 %v9902_v30, %v7052_v28  ;;  %5064 = vmatpush.bf16.msra.mxu0 %v6797_v29  ;;  %p10784_p9 = pneg %p10783_p8 }
  0x3d   : > { %v6780_v35 = vld [vmem:[%s11004_s30 + $0x80] sm:$0xf]  ;;  %v9834_v36 = vld [vmem:[%s11004_s30 + $0x8c] sm:$0xf0]  ;;  %v7181_v38 = vor.u32 %v9934_v32, %v7180_v31  ;;  %5078 = vmatpush.bf16.msra.mxu1 %v6925_v33 }
  0x3e   : > { %v6908_v37 = vld [vmem:[%s11004_s30 + $0x180] sm:$0xf]  ;;  %v9866_v39 = vld [vmem:[%s11004_s30 + $0x18c] sm:$0xf0]  ;;  %v6781_v44 = vor.u32 %v9834_v36, %v6780_v35  ;;  %5092 = vmatpush.bf16.msra.mxu2 %v7053_v34  ;;  %p10789_p13 = pnand %p10788_p12, %p10784_p9 }
  0x3f   : > { %v7036_v40 = vld [vmem:[%s11004_s30 + $0x280] sm:$0xf]  ;;  %v9898_v41 = vld [vmem:[%s11004_s30 + $0x28c] sm:$0xf0]  ;;  %v6909_v45 = vor.u32 %v9866_v39, %v6908_v37  ;;  %5106 = vmatpush.bf16.msra.mxu3 %v7181_v38 }
  0x40   : > { %v7164_v42 = vld [vmem:[%s11004_s30 + $0x380] sm:$0xf]  ;;  %v9930_v43 = vld [vmem:[%s11004_s30 + $0x38c] sm:$0xf0]  ;;  %v7037_v46 = vor.u32 %v9898_v41, %v7036_v40  ;;  %5065 = vmatpush.bf16.msra.mxu0 %v6781_v44 }
  0x41   : > { %v6764_v47 = vld [vmem:[%s11004_s30 + $0x60] sm:$0xf]  ;;  %v9830_v48 = vld [vmem:[%s11004_s30 + $0x6c] sm:$0xf0]  ;;  %v7165_v50 = vor.u32 %v9930_v43, %v7164_v42  ;;  %5079 = vmatpush.bf16.msra.mxu1 %v6909_v45 }
  0x42   : > { %v6892_v49 = vld [vmem:[%s11004_s30 + $0x160] sm:$0xf]  ;;  %v9862_v51 = vld [vmem:[%s11004_s30 + $0x16c] sm:$0xf0]  ;;  %v6765_v56 = vor.u32 %v9830_v48, %v6764_v47  ;;  %5093 = vmatpush.bf16.msra.mxu2 %v7037_v46 }
  0x43   : > { %v7020_v52 = vld [vmem:[%s11004_s30 + $0x260] sm:$0xf]  ;;  %v9894_v53 = vld [vmem:[%s11004_s30 + $0x26c] sm:$0xf0]  ;;  %v6893_v57 = vor.u32 %v9862_v51, %v6892_v49  ;;  %5107 = vmatpush.bf16.msra.mxu3 %v7165_v50 }
  0x44   : > { %v7148_v54 = vld [vmem:[%s11004_s30 + $0x360] sm:$0xf]  ;;  %v9926_v55 = vld [vmem:[%s11004_s30 + $0x36c] sm:$0xf0]  ;;  %v7021_v58 = vor.u32 %v9894_v53, %v7020_v52  ;;  %5066 = vmatpush.bf16.msra.mxu0 %v6765_v56 }
  0x45   : > { %v6748_v59 = vld [vmem:[%s11004_s30 + $0x40] sm:$0xf]  ;;  %v9826_v60 = vld [vmem:[%s11004_s30 + $0x4c] sm:$0xf0]  ;;  %v7149_v62 = vor.u32 %v9926_v55, %v7148_v54  ;;  %5080 = vmatpush.bf16.msra.mxu1 %v6893_v57  ;;  %v6628_v54 = vld [vmem:[#allocation3 + $0x8] sm:$0xf] }
  0x46   : > { %v6876_v61 = vld [vmem:[%s11004_s30 + $0x140] sm:$0xf]  ;;  %v9858_v63 = vld [vmem:[%s11004_s30 + $0x14c] sm:$0xf0]  ;;  %v6749_v4 = vor.u32 %v9826_v60, %v6748_v59  ;;  %5094 = vmatpush.bf16.msra.mxu2 %v7021_v58  ;;  %v9805_v59 = vld [vmem:[#allocation3 + $0x64] sm:$0xf0] }
  0x47   : > { %v7004_v0 = vld [vmem:[%s11004_s30 + $0x240] sm:$0xf]  ;;  %v9890_v1 = vld [vmem:[%s11004_s30 + $0x24c] sm:$0xf0]  ;;  %v6877_v5 = vor.u32 %v9858_v63, %v6876_v61  ;;  %5108 = vmatpush.bf16.msra.mxu3 %v7149_v62 }
  0x48   : > { %v7132_v2 = vld [vmem:[%s11004_s30 + $0x340] sm:$0xf]  ;;  %v9922_v3 = vld [vmem:[%s11004_s30 + $0x34c] sm:$0xf0]  ;;  %v7005_v6 = vor.u32 %v9890_v1, %v7004_v0  ;;  %5067 = vmatpush.bf16.msra.mxu0 %v6749_v4  ;;  %v11097_v1 = vor.u32 %v9805_v59, %v6628_v54 }
  0x49   : > { %v6732_v7 = vld [vmem:[%s11004_s30 + $0x20] sm:$0xf]  ;;  %v9822_v8 = vld [vmem:[%s11004_s30 + $0x2c] sm:$0xf0]  ;;  %v7133_v10 = vor.u32 %v9922_v3, %v7132_v2  ;;  %5081 = vmatpush.bf16.msra.mxu1 %v6877_v5 }
  0x4a   : > { %v6860_v9 = vld [vmem:[%s11004_s30 + $0x120] sm:$0xf]  ;;  %v9854_v11 = vld [vmem:[%s11004_s30 + $0x12c] sm:$0xf0]  ;;  %v6733_v16 = vor.u32 %v9822_v8, %v6732_v7  ;;  %5095 = vmatpush.bf16.msra.mxu2 %v7005_v6  ;;  %v9792_v6 = vld [vmem:[#allocation3 + $0x4] sm:$0xf] }
  0x4b   : > { %v6988_v12 = vld [vmem:[%s11004_s30 + $0x220] sm:$0xf]  ;;  %v9886_v13 = vld [vmem:[%s11004_s30 + $0x22c] sm:$0xf0]  ;;  %v6861_v19 = vor.u32 %v9854_v11, %v6860_v9  ;;  %5109 = vmatpush.bf16.msra.mxu3 %v7133_v10  ;;  %v6622_v7 = vld [vmem:[#allocation3 + $0x60] sm:$0xf0] }
  0x4c   : > { %v7116_v14 = vld [vmem:[%s11004_s30 + $0x320] sm:$0xf]  ;;  %v9918_v15 = vld [vmem:[%s11004_s30 + $0x32c] sm:$0xf0]  ;;  %v6989_v20 = vor.u32 %v9886_v13, %v6988_v12  ;;  %5068 = vmatpush.bf16.msra.mxu0 %v6733_v16  ;;  %v9793_v8 = vld [vmem:[#allocation3 + $0xc] sm:$0xf]  ;;  %v11104_v10 = vor.u32 %v9792_v6, %v6622_v7 }
  0x4d   : > { %v6716_v17 = vld [vmem:[%s11004_s30] sm:$0xf]  ;;  %v9818_v18 = vld [vmem:[%s11004_s30 + $0xc] sm:$0xf0]  ;;  %v7117_v24 = vor.u32 %v9918_v15, %v7116_v14  ;;  %5082 = vmatpush.bf16.msra.mxu1 %v6861_v19  ;;  %v6630_v11 = vld [vmem:[#allocation3 + $0x68] sm:$0xf0] }
  0x4e   : > { %v6844_v21 = vld [vmem:[%s11004_s30 + $0x100] sm:$0xf]  ;;  %v9850_v22 = vld [vmem:[%s11004_s30 + $0x10c] sm:$0xf0]  ;;  %v6717_v31 = vor.u32 %v9818_v18, %v6716_v17  ;;  %5096 = vmatpush.bf16.msra.mxu2 %v6989_v20  ;;  %v11109_v17 = vor.u32 %v9793_v8, %v6630_v11 }
  0x4f   : > { %v6972_v23 = vld [vmem:[%s11004_s30 + $0x200] sm:$0xf]  ;;  %v9882_v25 = vld [vmem:[%s11004_s30 + $0x20c] sm:$0xf0]  ;;  %v6845_v35 = vor.u32 %v9850_v22, %v6844_v21  ;;  %5110 = vmatpush.bf16.msra.mxu3 %v7117_v24 }
  0x50   : > { %v7100_v26 = vld [vmem:[%s11004_s30 + $0x300] sm:$0xf]  ;;  %v9914_v27 = vld [vmem:[%s11004_s30 + $0x30c] sm:$0xf0]  ;;  %v6973_v36 = vor.u32 %v9882_v25, %v6972_v23  ;;  %5069 = vmatpush.bf16.msra.mxu0 %v6717_v31 }
  0x51   : > { %v7340_v28 = vld [vmem:[%s11004_s30 + $0x4e0] sm:$0xf]  ;;  %v9974_v29 = vld [vmem:[%s11004_s30 + $0x4ec] sm:$0xf0]  ;;  %v7101_v39 = vor.u32 %v9914_v27, %v7100_v26  ;;  %5083 = vmatpush.bf16.msra.mxu1 %v6845_v35 }
  0x52   : > { %v7468_v30 = vld [vmem:[%s11004_s30 + $0x5e0] sm:$0xf]  ;;  %v10006_v32 = vld [vmem:[%s11004_s30 + $0x5ec] sm:$0xf0]  ;;  %v7341_v40 = vor.u32 %v9974_v29, %v7340_v28  ;;  %5097 = vmatpush.bf16.msra.mxu2 %v6973_v36 }
  0x53   : > { %v7596_v33 = vld [vmem:[%s11004_s30 + $0x6e0] sm:$0xf]  ;;  %v10038_v34 = vld [vmem:[%s11004_s30 + $0x6ec] sm:$0xf0]  ;;  %v7469_v43 = vor.u32 %v10006_v32, %v7468_v30  ;;  %5111 = vmatpush.bf16.msra.mxu3 %v7101_v39 }
  0x54   : > { %v7724_v37 = vld [vmem:[%s11004_s30 + $0x7e0] sm:$0xf]  ;;  %v10070_v38 = vld [vmem:[%s11004_s30 + $0x7ec] sm:$0xf0]  ;;  %v7597_v44 = vor.u32 %v10038_v34, %v7596_v33  ;;  %5118 = vmatpush.bf16.msrb.mxu0 %v7341_v40  ;;  %5084 = vmatmul.bf16.vlgmr.msra.gmra.mxu1 %v11104_v10 }
  0x55   : > { %v7324_v41 = vld [vmem:[%s11004_s30 + $0x4c0] sm:$0xf]  ;;  %v9970_v42 = vld [vmem:[%s11004_s30 + $0x4cc] sm:$0xf0]  ;;  %v7725_v48 = vor.u32 %v10070_v38, %v7724_v37  ;;  %5132 = vmatpush.bf16.msrb.mxu1 %v7469_v43  ;;  %5098 = vmatmul.bf16.vlgmr.msra.gmra.mxu2 %v11097_v1 }
  0x56   : > { %v7452_v45 = vld [vmem:[%s11004_s30 + $0x5c0] sm:$0xf]  ;;  %v10002_v46 = vld [vmem:[%s11004_s30 + $0x5cc] sm:$0xf0]  ;;  %v7325_v55 = vor.u32 %v9970_v42, %v7324_v41  ;;  %5146 = vmatpush.bf16.msrb.mxu2 %v7597_v44  ;;  %5112 = vmatmul.bf16.vlgmr.msra.gmra.mxu3 %v11109_v17 }
  0x57   : > { %v7580_v47 = vld [vmem:[%s11004_s30 + $0x6c0] sm:$0xf]  ;;  %v10034_v49 = vld [vmem:[%s11004_s30 + $0x6cc] sm:$0xf0]  ;;  %v7453_v60 = vor.u32 %v10002_v46, %v7452_v45  ;;  %5160 = vmatpush.bf16.msrb.mxu3 %v7725_v48 }
  0x58   : > { %v7708_v50 = vld [vmem:[%s11004_s30 + $0x7c0] sm:$0xf]  ;;  %v10066_v51 = vld [vmem:[%s11004_s30 + $0x7cc] sm:$0xf0]  ;;  %v7581_v61 = vor.u32 %v10034_v49, %v7580_v47  ;;  %5119 = vmatpush.bf16.msrb.mxu0 %v7325_v55 }
  0x59   : > { %v6620_v52 = vld [vmem:[#allocation3] sm:$0xf]  ;;  %v9966_v57 = vld [vmem:[%s11004_s30 + $0x4ac] sm:$0xf0]  ;;  %v7709_v2 = vor.u32 %v10066_v51, %v7708_v50  ;;  %5133 = vmatpush.bf16.msrb.mxu1 %v7453_v60 }
  0x5a   : > { %v9804_v53 = vld [vmem:[#allocation3 + $0x5c] sm:$0xf0]  ;;  %v9998_v63 = vld [vmem:[%s11004_s30 + $0x5ac] sm:$0xf0]  ;;  %5147 = vmatpush.bf16.msrb.mxu2 %v7581_v61 }
  0x5b   : > { %v7308_v56 = vld [vmem:[%s11004_s30 + $0x4a0] sm:$0xf]  ;;  %v11092_v58 = vor.u32 %v9804_v53, %v6620_v52  ;;  %v10030_v3 = vld [vmem:[%s11004_s30 + $0x6ac] sm:$0xf0]  ;;  %5161 = vmatpush.bf16.msrb.mxu3 %v7709_v2 }
  0x5c   : > { %v7436_v62 = vld [vmem:[%s11004_s30 + $0x5a0] sm:$0xf]  ;;  %v10062_v5 = vld [vmem:[%s11004_s30 + $0x7ac] sm:$0xf0]  ;;  %v7309_v9 = vor.u32 %v9966_v57, %v7308_v56 }
  0x5d   : > { %v7564_v0 = vld [vmem:[%s11004_s30 + $0x6a0] sm:$0xf]  ;;  %5070 = vmatmul.bf16.vlgmr.msra.gmra.mxu0 %v11092_v58  ;;  %v7437_v12 = vor.u32 %v9998_v63, %v7436_v62  ;;  %v9962_v15 = vld [vmem:[%s11004_s30 + $0x48c] sm:$0xf0] }
  0x5e   : > { %v7692_v4 = vld [vmem:[%s11004_s30 + $0x7a0] sm:$0xf]  ;;  %v7565_v13 = vor.u32 %v10030_v3, %v7564_v0  ;;  %v9994_v19 = vld [vmem:[%s11004_s30 + $0x58c] sm:$0xf0]  ;;  %5120 = vmatpush.bf16.msrb.mxu0 %v7309_v9 }
  0x5f   : > { %v7292_v14 = vld [vmem:[%s11004_s30 + $0x480] sm:$0xf]  ;;  %v7693_v18 = vor.u32 %v10062_v5, %v7692_v4  ;;  %v10026_v21 = vld [vmem:[%s11004_s30 + $0x68c] sm:$0xf0]  ;;  %5134 = vmatpush.bf16.msrb.mxu1 %v7437_v12 }
  0x60   : > { %v7420_v16 = vld [vmem:[%s11004_s30 + $0x580] sm:$0xf]  ;;  %v10058_v23 = vld [vmem:[%s11004_s30 + $0x78c] sm:$0xf0]  ;;  %v7293_v24 = vor.u32 %v9962_v15, %v7292_v14  ;;  %5148 = vmatpush.bf16.msrb.mxu2 %v7565_v13 }
  0x61   : > { %v7548_v20 = vld [vmem:[%s11004_s30 + $0x680] sm:$0xf]  ;;  %v7421_v25 = vor.u32 %v9994_v19, %v7420_v16  ;;  %v9958_v28 = vld [vmem:[%s11004_s30 + $0x46c] sm:$0xf0]  ;;  %5162 = vmatpush.bf16.msrb.mxu3 %v7693_v18 }
  0x62   : > { %v7676_v22 = vld [vmem:[%s11004_s30 + $0x780] sm:$0xf]  ;;  %v7549_v26 = vor.u32 %v10026_v21, %v7548_v20  ;;  %v9990_v31 = vld [vmem:[%s11004_s30 + $0x56c] sm:$0xf0]  ;;  %5121 = vmatpush.bf16.msrb.mxu0 %v7293_v24 }
  0x63   : > { %v7276_v27 = vld [vmem:[%s11004_s30 + $0x460] sm:$0xf]  ;;  %v7677_v30 = vor.u32 %v10058_v23, %v7676_v22  ;;  %v10022_v33 = vld [vmem:[%s11004_s30 + $0x66c] sm:$0xf0]  ;;  %5135 = vmatpush.bf16.msrb.mxu1 %v7421_v25  ;;  %v6644_v25 = vld [vmem:[#allocation3 + $0x18] sm:$0xf] }
  0x64   : > { %v7404_v29 = vld [vmem:[%s11004_s30 + $0x560] sm:$0xf]  ;;  %v10054_v35 = vld [vmem:[%s11004_s30 + $0x76c] sm:$0xf0]  ;;  %v7277_v36 = vor.u32 %v9958_v28, %v7276_v27  ;;  %5149 = vmatpush.bf16.msrb.mxu2 %v7549_v26  ;;  %v9807_v26 = vld [vmem:[#allocation3 + $0x74] sm:$0xf0] }
  0x65   : > { %v7532_v32 = vld [vmem:[%s11004_s30 + $0x660] sm:$0xf]  ;;  %v7405_v37 = vor.u32 %v9990_v31, %v7404_v29  ;;  %v9954_v40 = vld [vmem:[%s11004_s30 + $0x44c] sm:$0xf0]  ;;  %5163 = vmatpush.bf16.msrb.mxu3 %v7677_v30  ;;  %v9794_v27 = vld [vmem:[#allocation3 + $0x14] sm:$0xf] }
  0x66   : > { %v7660_v34 = vld [vmem:[%s11004_s30 + $0x760] sm:$0xf]  ;;  %v7533_v38 = vor.u32 %v10022_v33, %v7532_v32  ;;  %v9986_v43 = vld [vmem:[%s11004_s30 + $0x54c] sm:$0xf0]  ;;  %5122 = vmatpush.bf16.msrb.mxu0 %v7277_v36  ;;  %v6638_v30 = vld [vmem:[#allocation3 + $0x70] sm:$0xf0] }
  0x67   : > { %v7260_v39 = vld [vmem:[%s11004_s30 + $0x440] sm:$0xf]  ;;  %v7661_v42 = vor.u32 %v10054_v35, %v7660_v34  ;;  %v10018_v45 = vld [vmem:[%s11004_s30 + $0x64c] sm:$0xf0]  ;;  %5136 = vmatpush.bf16.msrb.mxu1 %v7405_v37  ;;  %v9795_v31 = vld [vmem:[#allocation3 + $0x1c] sm:$0xf] }
  0x68   : > { %v7388_v41 = vld [vmem:[%s11004_s30 + $0x540] sm:$0xf]  ;;  %v10050_v47 = vld [vmem:[%s11004_s30 + $0x74c] sm:$0xf0]  ;;  %v7261_v48 = vor.u32 %v9954_v40, %v7260_v39  ;;  %5150 = vmatpush.bf16.msrb.mxu2 %v7533_v38  ;;  %v6646_v32 = vld [vmem:[#allocation3 + $0x78] sm:$0xf0] }
  0x69   : > { %v7516_v44 = vld [vmem:[%s11004_s30 + $0x640] sm:$0xf]  ;;  %v7389_v50 = vor.u32 %v9986_v43, %v7388_v41  ;;  %v9950_v52 = vld [vmem:[%s11004_s30 + $0x42c] sm:$0xf0]  ;;  %5164 = vmatpush.bf16.msrb.mxu3 %v7661_v42  ;;  %v11166_v43 = vor.u32 %v9807_v26, %v6644_v25 }
  0x6a   : > { %v7644_v46 = vld [vmem:[%s11004_s30 + $0x740] sm:$0xf]  ;;  %v7517_v51 = vor.u32 %v10018_v45, %v7516_v44  ;;  %v9982_v54 = vld [vmem:[%s11004_s30 + $0x52c] sm:$0xf0]  ;;  %5123 = vmatpush.bf16.msrb.mxu0 %v7261_v48  ;;  %v11168_v44 = vor.u32 %v9794_v27, %v6638_v30 }
  0x6b   : > { %v7244_v49 = vld [vmem:[%s11004_s30 + $0x420] sm:$0xf]  ;;  %v7645_v55 = vor.u32 %v10050_v47, %v7644_v46  ;;  %v10014_v57 = vld [vmem:[%s11004_s30 + $0x62c] sm:$0xf0]  ;;  %5137 = vmatpush.bf16.msrb.mxu1 %v7389_v50  ;;  %13071 = vst [vmem:[#allocation13_spill] sm:$0xff] %v11166_v43  ;;  %v11172_v47 = vor.u32 %v9795_v31, %v6646_v32 }
  0x6c   : > { %v7372_v53 = vld [vmem:[%s11004_s30 + $0x520] sm:$0xf]  ;;  %v10046_v60 = vld [vmem:[%s11004_s30 + $0x72c] sm:$0xf0]  ;;  %v7245_v63 = vor.u32 %v9950_v52, %v7244_v49  ;;  %5151 = vmatpush.bf16.msrb.mxu2 %v7517_v51  ;;  %13072 = vst [vmem:[#allocation14_spill] sm:$0xff] %v11168_v44 }
  0x6d   : > { %v7500_v56 = vld [vmem:[%s11004_s30 + $0x620] sm:$0xf]  ;;  %v9946_v62 = vld [vmem:[%s11004_s30 + $0x40c] sm:$0xf0]  ;;  %v7373_v5 = vor.u32 %v9982_v54, %v7372_v53  ;;  %5165 = vmatpush.bf16.msrb.mxu3 %v7645_v55  ;;  %13073 = vst [vmem:[#allocation15_spill] sm:$0xff] %v11172_v47 }
  0x6e   : > { %v7628_v59 = vld [vmem:[%s11004_s30 + $0x720] sm:$0xf]  ;;  %v9978_v2 = vld [vmem:[%s11004_s30 + $0x50c] sm:$0xf0]  ;;  %v7501_v6 = vor.u32 %v10014_v57, %v7500_v56  ;;  %5124 = vmatpush.bf16.msrb.mxu0 %v7245_v63 }
  0x6f   : > { %v7228_v61 = vld [vmem:[%s11004_s30 + $0x400] sm:$0xf]  ;;  %v10010_v4 = vld [vmem:[%s11004_s30 + $0x60c] sm:$0xf0]  ;;  %v7629_v11 = vor.u32 %v10046_v60, %v7628_v59  ;;  %5138 = vmatpush.bf16.msrb.mxu1 %v7373_v5 }
  0x70   : > { %v7356_v0 = vld [vmem:[%s11004_s30 + $0x500] sm:$0xf]  ;;  %v10042_v8 = vld [vmem:[%s11004_s30 + $0x70c] sm:$0xf0]  ;;  %v7229_v19 = vor.u32 %v9946_v62, %v7228_v61  ;;  %5152 = vmatpush.bf16.msrb.mxu2 %v7501_v6 }
  0x71   : > { %v7484_v3 = vld [vmem:[%s11004_s30 + $0x600] sm:$0xf]  ;;  %v10102_v12 = vld [vmem:[%s11004_s30 + $0x8ec] sm:$0xf0]  ;;  %v7357_v23 = vor.u32 %v9978_v2, %v7356_v0  ;;  %5166 = vmatpush.bf16.msrb.mxu3 %v7629_v11 }
  0x72   : > { %v7612_v7 = vld [vmem:[%s11004_s30 + $0x700] sm:$0xf]  ;;  %v10134_v14 = vld [vmem:[%s11004_s30 + $0x9ec] sm:$0xf0]  ;;  %v7485_v24 = vor.u32 %v10010_v4, %v7484_v3  ;;  %5125 = vmatpush.bf16.msrb.mxu0 %v7229_v19 }
  0x73   : > { %v7852_v9 = vld [vmem:[%s11004_s30 + $0x8e0] sm:$0xf]  ;;  %v10166_v16 = vld [vmem:[%s11004_s30 + $0xaec] sm:$0xf0]  ;;  %v7613_v28 = vor.u32 %v10042_v8, %v7612_v7  ;;  %5139 = vmatpush.bf16.msrb.mxu1 %v7357_v23 }
  0x74   : > { %v7980_v13 = vld [vmem:[%s11004_s30 + $0x9e0] sm:$0xf]  ;;  %v10198_v20 = vld [vmem:[%s11004_s30 + $0xbec] sm:$0xf0]  ;;  %v7853_v29 = vor.u32 %v10102_v12, %v7852_v9  ;;  %5153 = vmatpush.bf16.msrb.mxu2 %v7485_v24 }
  0x75   : > { %v8108_v15 = vld [vmem:[%s11004_s30 + $0xae0] sm:$0xf]  ;;  %v6636_v21 = vld [vmem:[#allocation3 + $0x10] sm:$0xf]  ;;  %v7981_v33 = vor.u32 %v10134_v14, %v7980_v13  ;;  %5167 = vmatpush.bf16.msrb.mxu3 %v7613_v28 }
  0x76   : > { %v8236_v18 = vld [vmem:[%s11004_s30 + $0xbe0] sm:$0xf]  ;;  %v9806_v22 = vld [vmem:[#allocation3 + $0x6c] sm:$0xf0]  ;;  %v8109_v34 = vor.u32 %v10166_v16, %v8108_v15  ;;  %5174 = vmatpush.bf16.msra.mxu0 %v7853_v29  ;;  %5140 = vmatmul.bf16.vlgmr.msrb.gmra.mxu1 %v11168_v44 }
  0x77   : > { %v7836_v35 = vld [vmem:[%s11004_s30 + $0x8c0] sm:$0xf]  ;;  %v10098_v36 = vld [vmem:[%s11004_s30 + $0x8cc] sm:$0xf0]  ;;  %v8237_v38 = vor.u32 %v10198_v20, %v8236_v18  ;;  %v11161_v39 = vor.u32 %v9806_v22, %v6636_v21  ;;  %5188 = vmatpush.bf16.msra.mxu1 %v7981_v33  ;;  %5154 = vmatmul.bf16.vlgmr.msrb.gmra.mxu2 %v11166_v43 }
  0x78   : > { %v7964_v37 = vld [vmem:[%s11004_s30 + $0x9c0] sm:$0xf]  ;;  %v10130_v40 = vld [vmem:[%s11004_s30 + $0x9cc] sm:$0xf0]  ;;  %v7837_v48 = vor.u32 %v10098_v36, %v7836_v35  ;;  %5202 = vmatpush.bf16.msra.mxu2 %v8109_v34  ;;  %5168 = vmatmul.bf16.vlgmr.msrb.gmra.mxu3 %v11172_v47 }
  0x79   : > { %v8092_v41 = vld [vmem:[%s11004_s30 + $0xac0] sm:$0xf]  ;;  %v10162_v42 = vld [vmem:[%s11004_s30 + $0xacc] sm:$0xf0]  ;;  %v7965_v49 = vor.u32 %v10130_v40, %v7964_v37  ;;  %5216 = vmatpush.bf16.msra.mxu3 %v8237_v38  ;;  %5126 = vmatmul.bf16.vlgmr.msrb.gmra.mxu0 %v11161_v39 }
  0x7a   : > { %v8220_v45 = vld [vmem:[%s11004_s30 + $0xbc0] sm:$0xf]  ;;  %v10194_v46 = vld [vmem:[%s11004_s30 + $0xbcc] sm:$0xf0]  ;;  %v8093_v50 = vor.u32 %v10162_v42, %v8092_v41  ;;  %5175 = vmatpush.bf16.msra.mxu0 %v7837_v48 }
  0x7b   : > { %v7820_v51 = vld [vmem:[%s11004_s30 + $0x8a0] sm:$0xf]  ;;  %v10094_v52 = vld [vmem:[%s11004_s30 + $0x8ac] sm:$0xf0]  ;;  %v8221_v54 = vor.u32 %v10194_v46, %v8220_v45  ;;  %5189 = vmatpush.bf16.msra.mxu1 %v7965_v49 }
  0x7c   : > { %v7948_v53 = vld [vmem:[%s11004_s30 + $0x9a0] sm:$0xf]  ;;  %v10126_v55 = vld [vmem:[%s11004_s30 + $0x9ac] sm:$0xf0]  ;;  %v7821_v61 = vor.u32 %v10094_v52, %v7820_v51  ;;  %5203 = vmatpush.bf16.msra.mxu2 %v8093_v50 }
  0x7d   : > { %v8076_v56 = vld [vmem:[%s11004_s30 + $0xaa0] sm:$0xf]  ;;  %v10158_v57 = vld [vmem:[%s11004_s30 + $0xaac] sm:$0xf0]  ;;  %v7949_v62 = vor.u32 %v10126_v55, %v7948_v53  ;;  %5217 = vmatpush.bf16.msra.mxu3 %v8221_v54 }
  0x7e   : > { %v8204_v59 = vld [vmem:[%s11004_s30 + $0xba0] sm:$0xf]  ;;  %v10190_v60 = vld [vmem:[%s11004_s30 + $0xbac] sm:$0xf0]  ;;  %v8077_v63 = vor.u32 %v10158_v57, %v8076_v56  ;;  %5176 = vmatpush.bf16.msra.mxu0 %v7821_v61 }
  0x7f   : > { %v7804_v0 = vld [vmem:[%s11004_s30 + $0x880] sm:$0xf]  ;;  %v10090_v2 = vld [vmem:[%s11004_s30 + $0x88c] sm:$0xf0]  ;;  %v8205_v4 = vor.u32 %v10190_v60, %v8204_v59  ;;  %5190 = vmatpush.bf16.msra.mxu1 %v7949_v62 }
  0x80   : > { %v7932_v3 = vld [vmem:[%s11004_s30 + $0x980] sm:$0xf]  ;;  %v10122_v5 = vld [vmem:[%s11004_s30 + $0x98c] sm:$0xf0]  ;;  %v7805_v11 = vor.u32 %v10090_v2, %v7804_v0  ;;  %5204 = vmatpush.bf16.msra.mxu2 %v8077_v63 }
  0x81   : > { %v8060_v6 = vld [vmem:[%s11004_s30 + $0xa80] sm:$0xf]  ;;  %v10154_v7 = vld [vmem:[%s11004_s30 + $0xa8c] sm:$0xf0]  ;;  %v7933_v12 = vor.u32 %v10122_v5, %v7932_v3  ;;  %5218 = vmatpush.bf16.msra.mxu3 %v8205_v4 }
  0x82   : > { %v8188_v8 = vld [vmem:[%s11004_s30 + $0xb80] sm:$0xf]  ;;  %v10186_v9 = vld [vmem:[%s11004_s30 + $0xb8c] sm:$0xf0]  ;;  %v8061_v13 = vor.u32 %v10154_v7, %v8060_v6  ;;  %5177 = vmatpush.bf16.msra.mxu0 %v7805_v11 }
  0x83   : > { %v7788_v14 = vld [vmem:[%s11004_s30 + $0x860] sm:$0xf]  ;;  %v10086_v15 = vld [vmem:[%s11004_s30 + $0x86c] sm:$0xf0]  ;;  %v8189_v18 = vor.u32 %v10186_v9, %v8188_v8  ;;  %5191 = vmatpush.bf16.msra.mxu1 %v7933_v12 }
  0x84   : > { %v7916_v16 = vld [vmem:[%s11004_s30 + $0x960] sm:$0xf]  ;;  %v10118_v19 = vld [vmem:[%s11004_s30 + $0x96c] sm:$0xf0]  ;;  %v7789_v24 = vor.u32 %v10086_v15, %v7788_v14  ;;  %5205 = vmatpush.bf16.msra.mxu2 %v8061_v13 }
  0x85   : > { %v8044_v20 = vld [vmem:[%s11004_s30 + $0xa60] sm:$0xf]  ;;  %v10150_v21 = vld [vmem:[%s11004_s30 + $0xa6c] sm:$0xf0]  ;;  %v7917_v25 = vor.u32 %v10118_v19, %v7916_v16  ;;  %5219 = vmatpush.bf16.msra.mxu3 %v8189_v18  ;;  %v6660_v16 = vld [vmem:[#allocation3 + $0x28] sm:$0xf] }
  0x86   : > { %v8172_v22 = vld [vmem:[%s11004_s30 + $0xb60] sm:$0xf]  ;;  %v10182_v23 = vld [vmem:[%s11004_s30 + $0xb6c] sm:$0xf0]  ;;  %v8045_v26 = vor.u32 %v10150_v21, %v8044_v20  ;;  %5178 = vmatpush.bf16.msra.mxu0 %v7789_v24  ;;  %v9809_v18 = vld [vmem:[#allocation3 + $0x84] sm:$0xf0] }
  0x87   : > { %v7772_v27 = vld [vmem:[%s11004_s30 + $0x840] sm:$0xf]  ;;  %v10082_v28 = vld [vmem:[%s11004_s30 + $0x84c] sm:$0xf0]  ;;  %v8173_v30 = vor.u32 %v10182_v23, %v8172_v22  ;;  %5192 = vmatpush.bf16.msra.mxu1 %v7917_v25  ;;  %v9796_v19 = vld [vmem:[#allocation3 + $0x24] sm:$0xf] }
  0x88   : > { %v7900_v29 = vld [vmem:[%s11004_s30 + $0x940] sm:$0xf]  ;;  %v10114_v31 = vld [vmem:[%s11004_s30 + $0x94c] sm:$0xf0]  ;;  %v7773_v36 = vor.u32 %v10082_v28, %v7772_v27  ;;  %5206 = vmatpush.bf16.msra.mxu2 %v8045_v26  ;;  %v6654_v22 = vld [vmem:[#allocation3 + $0x80] sm:$0xf0] }
  0x89   : > { %v8028_v32 = vld [vmem:[%s11004_s30 + $0xa40] sm:$0xf]  ;;  %v10146_v33 = vld [vmem:[%s11004_s30 + $0xa4c] sm:$0xf0]  ;;  %v7901_v38 = vor.u32 %v10114_v31, %v7900_v29  ;;  %5220 = vmatpush.bf16.msra.mxu3 %v8173_v30  ;;  %v9797_v23 = vld [vmem:[#allocation3 + $0x2c] sm:$0xf] }
  0x8a   : > { %v8156_v34 = vld [vmem:[%s11004_s30 + $0xb40] sm:$0xf]  ;;  %v10178_v35 = vld [vmem:[%s11004_s30 + $0xb4c] sm:$0xf0]  ;;  %v8029_v40 = vor.u32 %v10146_v33, %v8028_v32  ;;  %5179 = vmatpush.bf16.msra.mxu0 %v7773_v36  ;;  %v6662_v24 = vld [vmem:[#allocation3 + $0x88] sm:$0xf0]  ;;  %v11244_v36 = vor.u32 %v9796_v19, %v6654_v22 }
  0x8b   : > { %v7756_v37 = vld [vmem:[%s11004_s30 + $0x820] sm:$0xf]  ;;  %v10078_v41 = vld [vmem:[%s11004_s30 + $0x82c] sm:$0xf0]  ;;  %v8157_v46 = vor.u32 %v10178_v35, %v8156_v34  ;;  %5193 = vmatpush.bf16.msra.mxu1 %v7901_v38  ;;  %v11242_v35 = vor.u32 %v9809_v18, %v6660_v16 }
  0x8c   : > { %v7884_v42 = vld [vmem:[%s11004_s30 + $0x920] sm:$0xf]  ;;  %v10110_v45 = vld [vmem:[%s11004_s30 + $0x92c] sm:$0xf0]  ;;  %v7757_v54 = vor.u32 %v10078_v41, %v7756_v37  ;;  %5207 = vmatpush.bf16.msra.mxu2 %v8029_v40  ;;  %v11248_v40 = vor.u32 %v9797_v23, %v6662_v24 }
  0x8d   : > { %v8012_v48 = vld [vmem:[%s11004_s30 + $0xa20] sm:$0xf]  ;;  %v10142_v49 = vld [vmem:[%s11004_s30 + $0xa2c] sm:$0xf0]  ;;  %v7885_v60 = vor.u32 %v10110_v45, %v7884_v42  ;;  %5221 = vmatpush.bf16.msra.mxu3 %v8157_v46 }
  0x8e   : > { %v8140_v50 = vld [vmem:[%s11004_s30 + $0xb20] sm:$0xf]  ;;  %v10174_v51 = vld [vmem:[%s11004_s30 + $0xb2c] sm:$0xf0]  ;;  %v8013_v61 = vor.u32 %v10142_v49, %v8012_v48  ;;  %5180 = vmatpush.bf16.msra.mxu0 %v7757_v54 }
  0x8f   : > { %v7740_v52 = vld [vmem:[%s11004_s30 + $0x800] sm:$0xf]  ;;  %v10074_v53 = vld [vmem:[%s11004_s30 + $0x80c] sm:$0xf0]  ;;  %v8141_v2 = vor.u32 %v10174_v51, %v8140_v50  ;;  %5194 = vmatpush.bf16.msra.mxu1 %v7885_v60 }
  0x90   : > { %v7868_v55 = vld [vmem:[%s11004_s30 + $0x900] sm:$0xf]  ;;  %v10106_v56 = vld [vmem:[%s11004_s30 + $0x90c] sm:$0xf0]  ;;  %v7741_v9 = vor.u32 %v10074_v53, %v7740_v52  ;;  %5208 = vmatpush.bf16.msra.mxu2 %v8013_v61 }
  0x91   : > { %v7996_v57 = vld [vmem:[%s11004_s30 + $0xa00] sm:$0xf]  ;;  %v10138_v59 = vld [vmem:[%s11004_s30 + $0xa0c] sm:$0xf0]  ;;  %v7869_v14 = vor.u32 %v10106_v56, %v7868_v55  ;;  %5222 = vmatpush.bf16.msra.mxu3 %v8141_v2 }
  0x92   : > { %v8124_v62 = vld [vmem:[%s11004_s30 + $0xb00] sm:$0xf]  ;;  %v10170_v63 = vld [vmem:[%s11004_s30 + $0xb0c] sm:$0xf0]  ;;  %v7997_v15 = vor.u32 %v10138_v59, %v7996_v57  ;;  %5181 = vmatpush.bf16.msra.mxu0 %v7741_v9 }
  0x93   : > { %v8364_v0 = vld [vmem:[%s11004_s30 + $0xce0] sm:$0xf]  ;;  %v10230_v3 = vld [vmem:[%s11004_s30 + $0xcec] sm:$0xf0]  ;;  %v8125_v20 = vor.u32 %v10170_v63, %v8124_v62  ;;  %5195 = vmatpush.bf16.msra.mxu1 %v7869_v14 }
  0x94   : > { %v8492_v4 = vld [vmem:[%s11004_s30 + $0xde0] sm:$0xf]  ;;  %v10262_v5 = vld [vmem:[%s11004_s30 + $0xdec] sm:$0xf0]  ;;  %v8365_v21 = vor.u32 %v10230_v3, %v8364_v0  ;;  %5209 = vmatpush.bf16.msra.mxu2 %v7997_v15 }
  0x95   : > { %v8620_v6 = vld [vmem:[%s11004_s30 + $0xee0] sm:$0xf]  ;;  %v10294_v7 = vld [vmem:[%s11004_s30 + $0xeec] sm:$0xf0]  ;;  %v8493_v25 = vor.u32 %v10262_v5, %v8492_v4  ;;  %5223 = vmatpush.bf16.msra.mxu3 %v8125_v20 }
  0x96   : > { %v8748_v8 = vld [vmem:[%s11004_s30 + $0xfe0] sm:$0xf]  ;;  %v10326_v11 = vld [vmem:[%s11004_s30 + $0xfec] sm:$0xf0]  ;;  %v8621_v26 = vor.u32 %v10294_v7, %v8620_v6  ;;  %5230 = vmatpush.bf16.msrb.mxu0 %v8365_v21  ;;  %5196 = vmatmul.bf16.vlgmr.msra.gmra.mxu1 %v11244_v36 }
  0x97   : > { %v6652_v12 = vld [vmem:[#allocation3 + $0x20] sm:$0xf]  ;;  %v10226_v28 = vld [vmem:[%s11004_s30 + $0xccc] sm:$0xf0]  ;;  %v8749_v30 = vor.u32 %v10326_v11, %v8748_v8  ;;  %5244 = vmatpush.bf16.msrb.mxu1 %v8493_v25  ;;  %5210 = vmatmul.bf16.vlgmr.msra.gmra.mxu2 %v11242_v35 }
  0x98   : > { %v9808_v13 = vld [vmem:[#allocation3 + $0x7c] sm:$0xf0]  ;;  %v10258_v32 = vld [vmem:[%s11004_s30 + $0xdcc] sm:$0xf0]  ;;  %5258 = vmatpush.bf16.msrb.mxu2 %v8621_v26  ;;  %5224 = vmatmul.bf16.vlgmr.msra.gmra.mxu3 %v11248_v40 }
  0x99   : > { %v8348_v27 = vld [vmem:[%s11004_s30 + $0xcc0] sm:$0xf]  ;;  %v11237_v31 = vor.u32 %v9808_v13, %v6652_v12  ;;  %v10290_v34 = vld [vmem:[%s11004_s30 + $0xecc] sm:$0xf0]  ;;  %5272 = vmatpush.bf16.msrb.mxu3 %v8749_v30 }
  0x9a   : > { %v8476_v29 = vld [vmem:[%s11004_s30 + $0xdc0] sm:$0xf]  ;;  %v10322_v38 = vld [vmem:[%s11004_s30 + $0xfcc] sm:$0xf0]  ;;  %v8349_v41 = vor.u32 %v10226_v28, %v8348_v27 }
  0x9b   : > { %v8604_v33 = vld [vmem:[%s11004_s30 + $0xec0] sm:$0xf]  ;;  %v8477_v42 = vor.u32 %v10258_v32, %v8476_v29  ;;  %v10222_v48 = vld [vmem:[%s11004_s30 + $0xcac] sm:$0xf0]  ;;  %5182 = vmatmul.bf16.vlgmr.msra.gmra.mxu0 %v11237_v31 }
  0x9c   : > { %v8732_v37 = vld [vmem:[%s11004_s30 + $0xfc0] sm:$0xf]  ;;  %v8605_v45 = vor.u32 %v10290_v34, %v8604_v33  ;;  %v10254_v51 = vld [vmem:[%s11004_s30 + $0xdac] sm:$0xf0]  ;;  %5231 = vmatpush.bf16.msrb.mxu0 %v8349_v41 }
  0x9d   : > { %v8332_v46 = vld [vmem:[%s11004_s30 + $0xca0] sm:$0xf]  ;;  %v8733_v50 = vor.u32 %v10322_v38, %v8732_v37  ;;  %v10286_v53 = vld [vmem:[%s11004_s30 + $0xeac] sm:$0xf0]  ;;  %5245 = vmatpush.bf16.msrb.mxu1 %v8477_v42 }
  0x9e   : > { %v8460_v49 = vld [vmem:[%s11004_s30 + $0xda0] sm:$0xf]  ;;  %v10318_v55 = vld [vmem:[%s11004_s30 + $0xfac] sm:$0xf0]  ;;  %v8333_v56 = vor.u32 %v10222_v48, %v8332_v46  ;;  %5259 = vmatpush.bf16.msrb.mxu2 %v8605_v45 }
  0x9f   : > { %v8588_v52 = vld [vmem:[%s11004_s30 + $0xea0] sm:$0xf]  ;;  %v8461_v57 = vor.u32 %v10254_v51, %v8460_v49  ;;  %v10218_v61 = vld [vmem:[%s11004_s30 + $0xc8c] sm:$0xf0]  ;;  %5273 = vmatpush.bf16.msrb.mxu3 %v8733_v50 }
  0xa0   : > { %v8716_v54 = vld [vmem:[%s11004_s30 + $0xfa0] sm:$0xf]  ;;  %v8589_v59 = vor.u32 %v10286_v53, %v8588_v52  ;;  %v10250_v0 = vld [vmem:[%s11004_s30 + $0xd8c] sm:$0xf0]  ;;  %5232 = vmatpush.bf16.msrb.mxu0 %v8333_v56 }
  0xa1   : > { %v8316_v60 = vld [vmem:[%s11004_s30 + $0xc80] sm:$0xf]  ;;  %v8717_v63 = vor.u32 %v10318_v55, %v8716_v54  ;;  %v10282_v3 = vld [vmem:[%s11004_s30 + $0xe8c] sm:$0xf0]  ;;  %5246 = vmatpush.bf16.msrb.mxu1 %v8461_v57 }
  0xa2   : > { %v8444_v62 = vld [vmem:[%s11004_s30 + $0xd80] sm:$0xf]  ;;  %v10314_v5 = vld [vmem:[%s11004_s30 + $0xf8c] sm:$0xf0]  ;;  %v8317_v6 = vor.u32 %v10218_v61, %v8316_v60  ;;  %5260 = vmatpush.bf16.msrb.mxu2 %v8589_v59 }
  0xa3   : > { %v8572_v2 = vld [vmem:[%s11004_s30 + $0xe80] sm:$0xf]  ;;  %v8445_v7 = vor.u32 %v10250_v0, %v8444_v62  ;;  %v10214_v11 = vld [vmem:[%s11004_s30 + $0xc6c] sm:$0xf0]  ;;  %5274 = vmatpush.bf16.msrb.mxu3 %v8717_v63 }
  0xa4   : > { %v8700_v4 = vld [vmem:[%s11004_s30 + $0xf80] sm:$0xf]  ;;  %v8573_v8 = vor.u32 %v10282_v3, %v8572_v2  ;;  %v10246_v14 = vld [vmem:[%s11004_s30 + $0xd6c] sm:$0xf0]  ;;  %5233 = vmatpush.bf16.msrb.mxu0 %v8317_v6 }
  0xa5   : > { %v8300_v9 = vld [vmem:[%s11004_s30 + $0xc60] sm:$0xf]  ;;  %v8701_v13 = vor.u32 %v10314_v5, %v8700_v4  ;;  %v10278_v16 = vld [vmem:[%s11004_s30 + $0xe6c] sm:$0xf0]  ;;  %5247 = vmatpush.bf16.msrb.mxu1 %v8445_v7 }
  0xa6   : > { %v8428_v12 = vld [vmem:[%s11004_s30 + $0xd60] sm:$0xf]  ;;  %v10310_v19 = vld [vmem:[%s11004_s30 + $0xf6c] sm:$0xf0]  ;;  %v8301_v20 = vor.u32 %v10214_v11, %v8300_v9  ;;  %5261 = vmatpush.bf16.msrb.mxu2 %v8573_v8 }
  0xa7   : > { %v8556_v15 = vld [vmem:[%s11004_s30 + $0xe60] sm:$0xf]  ;;  %v8429_v21 = vor.u32 %v10246_v14, %v8428_v12  ;;  %v10210_v24 = vld [vmem:[%s11004_s30 + $0xc4c] sm:$0xf0]  ;;  %5275 = vmatpush.bf16.msrb.mxu3 %v8701_v13 }
  0xa8   : > { %v8684_v18 = vld [vmem:[%s11004_s30 + $0xf60] sm:$0xf]  ;;  %v8557_v22 = vor.u32 %v10278_v16, %v8556_v15  ;;  %v10242_v27 = vld [vmem:[%s11004_s30 + $0xd4c] sm:$0xf0]  ;;  %5234 = vmatpush.bf16.msrb.mxu0 %v8301_v20  ;;  %v6676_v16 = vld [vmem:[#allocation3 + $0x38] sm:$0xf] }
  0xa9   : > { %v8284_v23 = vld [vmem:[%s11004_s30 + $0xc40] sm:$0xf]  ;;  %v8685_v26 = vor.u32 %v10310_v19, %v8684_v18  ;;  %v10274_v29 = vld [vmem:[%s11004_s30 + $0xe4c] sm:$0xf0]  ;;  %5248 = vmatpush.bf16.msrb.mxu1 %v8429_v21  ;;  %v9811_v18 = vld [vmem:[#allocation3 + $0x94] sm:$0xf0] }
  0xaa   : > { %v8412_v25 = vld [vmem:[%s11004_s30 + $0xd40] sm:$0xf]  ;;  %v10306_v32 = vld [vmem:[%s11004_s30 + $0xf4c] sm:$0xf0]  ;;  %v8285_v33 = vor.u32 %v10210_v24, %v8284_v23  ;;  %5262 = vmatpush.bf16.msrb.mxu2 %v8557_v22  ;;  %v9798_v19 = vld [vmem:[#allocation3 + $0x34] sm:$0xf] }
  0xab   : > { %v8540_v28 = vld [vmem:[%s11004_s30 + $0xe40] sm:$0xf]  ;;  %v8413_v37 = vor.u32 %v10242_v27, %v8412_v25  ;;  %v10206_v41 = vld [vmem:[%s11004_s30 + $0xc2c] sm:$0xf0]  ;;  %5276 = vmatpush.bf16.msrb.mxu3 %v8685_v26  ;;  %v6670_v22 = vld [vmem:[#allocation3 + $0x90] sm:$0xf0] }
  0xac   : > { %v8668_v30 = vld [vmem:[%s11004_s30 + $0xf40] sm:$0xf]  ;;  %v8541_v38 = vor.u32 %v10274_v29, %v8540_v28  ;;  %v10238_v45 = vld [vmem:[%s11004_s30 + $0xd2c] sm:$0xf0]  ;;  %5235 = vmatpush.bf16.msrb.mxu0 %v8285_v33  ;;  %v9799_v23 = vld [vmem:[#allocation3 + $0x3c] sm:$0xf] }
  0xad   : > { %v8268_v34 = vld [vmem:[%s11004_s30 + $0xc20] sm:$0xf]  ;;  %v8669_v46 = vor.u32 %v10306_v32, %v8668_v30  ;;  %v10270_v49 = vld [vmem:[%s11004_s30 + $0xe2c] sm:$0xf0]  ;;  %5249 = vmatpush.bf16.msrb.mxu1 %v8413_v37  ;;  %v6678_v24 = vld [vmem:[#allocation3 + $0x98] sm:$0xf0] }
  0xae   : > { %v8396_v42 = vld [vmem:[%s11004_s30 + $0xd20] sm:$0xf]  ;;  %v10302_v51 = vld [vmem:[%s11004_s30 + $0xf2c] sm:$0xf0]  ;;  %v8269_v54 = vor.u32 %v10206_v41, %v8268_v34  ;;  %5263 = vmatpush.bf16.msrb.mxu2 %v8541_v38  ;;  %v11318_v38 = vor.u32 %v9811_v18, %v6676_v16  ;;  %v11320_v41 = vor.u32 %v9798_v19, %v6670_v22 }
  0xaf   : > { %v8524_v48 = vld [vmem:[%s11004_s30 + $0xe20] sm:$0xf]  ;;  %v10202_v53 = vld [vmem:[%s11004_s30 + $0xc0c] sm:$0xf0]  ;;  %v8397_v60 = vor.u32 %v10238_v45, %v8396_v42  ;;  %5277 = vmatpush.bf16.msrb.mxu3 %v8669_v46  ;;  %v11324_v46 = vor.u32 %v9799_v23, %v6678_v24 }
  0xb0   : > { %v8652_v50 = vld [vmem:[%s11004_s30 + $0xf20] sm:$0xf]  ;;  %v10234_v56 = vld [vmem:[%s11004_s30 + $0xd0c] sm:$0xf0]  ;;  %v8525_v61 = vor.u32 %v10270_v49, %v8524_v48  ;;  %5236 = vmatpush.bf16.msrb.mxu0 %v8269_v54 }
  0xb1   : > { %v8252_v52 = vld [vmem:[%s11004_s30 + $0xc00] sm:$0xf]  ;;  %v10266_v59 = vld [vmem:[%s11004_s30 + $0xe0c] sm:$0xf0]  ;;  %v8653_v2 = vor.u32 %v10302_v51, %v8652_v50  ;;  %5250 = vmatpush.bf16.msrb.mxu1 %v8397_v60 }
  0xb2   : > { %v8380_v55 = vld [vmem:[%s11004_s30 + $0xd00] sm:$0xf]  ;;  %v10298_v63 = vld [vmem:[%s11004_s30 + $0xf0c] sm:$0xf0]  ;;  %v8253_v9 = vor.u32 %v10202_v53, %v8252_v52  ;;  %5264 = vmatpush.bf16.msrb.mxu2 %v8525_v61 }
  0xb3   : > { %v8508_v57 = vld [vmem:[%s11004_s30 + $0xe00] sm:$0xf]  ;;  %v10358_v3 = vld [vmem:[%s11004_s30 + $0x10ec] sm:$0xf0]  ;;  %v8381_v14 = vor.u32 %v10234_v56, %v8380_v55  ;;  %5278 = vmatpush.bf16.msrb.mxu3 %v8653_v2 }
  0xb4   : > { %v8636_v62 = vld [vmem:[%s11004_s30 + $0xf00] sm:$0xf]  ;;  %v10390_v5 = vld [vmem:[%s11004_s30 + $0x11ec] sm:$0xf0]  ;;  %v8509_v15 = vor.u32 %v10266_v59, %v8508_v57  ;;  %5237 = vmatpush.bf16.msrb.mxu0 %v8253_v9 }
  0xb5   : > { %v8876_v0 = vld [vmem:[%s11004_s30 + $0x10e0] sm:$0xf]  ;;  %v10422_v7 = vld [vmem:[%s11004_s30 + $0x12ec] sm:$0xf0]  ;;  %v8637_v20 = vor.u32 %v10298_v63, %v8636_v62  ;;  %5251 = vmatpush.bf16.msrb.mxu1 %v8381_v14 }
  0xb6   : > { %v9004_v4 = vld [vmem:[%s11004_s30 + $0x11e0] sm:$0xf]  ;;  %v10454_v11 = vld [vmem:[%s11004_s30 + $0x13ec] sm:$0xf0]  ;;  %v8877_v21 = vor.u32 %v10358_v3, %v8876_v0  ;;  %5265 = vmatpush.bf16.msrb.mxu2 %v8509_v15 }
  0xb7   : > { %v9132_v6 = vld [vmem:[%s11004_s30 + $0x12e0] sm:$0xf]  ;;  %v6668_v12 = vld [vmem:[#allocation3 + $0x30] sm:$0xf]  ;;  %v9005_v25 = vor.u32 %v10390_v5, %v9004_v4  ;;  %5279 = vmatpush.bf16.msrb.mxu3 %v8637_v20 }
  0xb8   : > { %v9260_v8 = vld [vmem:[%s11004_s30 + $0x13e0] sm:$0xf]  ;;  %v9810_v13 = vld [vmem:[#allocation3 + $0x8c] sm:$0xf0]  ;;  %v9133_v26 = vor.u32 %v10422_v7, %v9132_v6  ;;  %5286 = vmatpush.bf16.msra.mxu0 %v8877_v21  ;;  %5252 = vmatmul.bf16.vlgmr.msrb.gmra.mxu1 %v11320_v41 }
  0xb9   : > { %v8860_v27 = vld [vmem:[%s11004_s30 + $0x10c0] sm:$0xf]  ;;  %v10354_v28 = vld [vmem:[%s11004_s30 + $0x10cc] sm:$0xf0]  ;;  %v9261_v30 = vor.u32 %v10454_v11, %v9260_v8  ;;  %v11313_v32 = vor.u32 %v9810_v13, %v6668_v12  ;;  %5300 = vmatpush.bf16.msra.mxu1 %v9005_v25  ;;  %5266 = vmatmul.bf16.vlgmr.msrb.gmra.mxu2 %v11318_v38 }
  0xba   : > { %v8988_v29 = vld [vmem:[%s11004_s30 + $0x11c0] sm:$0xf]  ;;  %v10386_v33 = vld [vmem:[%s11004_s30 + $0x11cc] sm:$0xf0]  ;;  %v8861_v48 = vor.u32 %v10354_v28, %v8860_v27  ;;  %5314 = vmatpush.bf16.msra.mxu2 %v9133_v26  ;;  %5280 = vmatmul.bf16.vlgmr.msrb.gmra.mxu3 %v11324_v46 }
  0xbb   : > { %v9116_v34 = vld [vmem:[%s11004_s30 + $0x12c0] sm:$0xf]  ;;  %v10418_v37 = vld [vmem:[%s11004_s30 + $0x12cc] sm:$0xf0]  ;;  %v8989_v49 = vor.u32 %v10386_v33, %v8988_v29  ;;  %5328 = vmatpush.bf16.msra.mxu3 %v9261_v30  ;;  %5238 = vmatmul.bf16.vlgmr.msrb.gmra.mxu0 %v11313_v32 }
  0xbc   : > { %v9244_v42 = vld [vmem:[%s11004_s30 + $0x13c0] sm:$0xf]  ;;  %v10450_v45 = vld [vmem:[%s11004_s30 + $0x13cc] sm:$0xf0]  ;;  %v9117_v50 = vor.u32 %v10418_v37, %v9116_v34  ;;  %5287 = vmatpush.bf16.msra.mxu0 %v8861_v48 }
  0xbd   : > { %v8844_v51 = vld [vmem:[%s11004_s30 + $0x10a0] sm:$0xf]  ;;  %v10350_v52 = vld [vmem:[%s11004_s30 + $0x10ac] sm:$0xf0]  ;;  %v9245_v54 = vor.u32 %v10450_v45, %v9244_v42  ;;  %5301 = vmatpush.bf16.msra.mxu1 %v8989_v49 }
  0xbe   : > { %v8972_v53 = vld [vmem:[%s11004_s30 + $0x11a0] sm:$0xf]  ;;  %v10382_v55 = vld [vmem:[%s11004_s30 + $0x11ac] sm:$0xf0]  ;;  %v8845_v61 = vor.u32 %v10350_v52, %v8844_v51  ;;  %5315 = vmatpush.bf16.msra.mxu2 %v9117_v50 }
  0xbf   : > { %v9100_v56 = vld [vmem:[%s11004_s30 + $0x12a0] sm:$0xf]  ;;  %v10414_v57 = vld [vmem:[%s11004_s30 + $0x12ac] sm:$0xf0]  ;;  %v8973_v62 = vor.u32 %v10382_v55, %v8972_v53  ;;  %5329 = vmatpush.bf16.msra.mxu3 %v9245_v54 }
  0xc0   : > { %v9228_v59 = vld [vmem:[%s11004_s30 + $0x13a0] sm:$0xf]  ;;  %v10446_v60 = vld [vmem:[%s11004_s30 + $0x13ac] sm:$0xf0]  ;;  %v9101_v63 = vor.u32 %v10414_v57, %v9100_v56  ;;  %5288 = vmatpush.bf16.msra.mxu0 %v8845_v61 }
  0xc1   : > { %v8828_v0 = vld [vmem:[%s11004_s30 + $0x1080] sm:$0xf]  ;;  %v10346_v2 = vld [vmem:[%s11004_s30 + $0x108c] sm:$0xf0]  ;;  %v9229_v4 = vor.u32 %v10446_v60, %v9228_v59  ;;  %5302 = vmatpush.bf16.msra.mxu1 %v8973_v62 }
  0xc2   : > { %v8956_v3 = vld [vmem:[%s11004_s30 + $0x1180] sm:$0xf]  ;;  %v10378_v5 = vld [vmem:[%s11004_s30 + $0x118c] sm:$0xf0]  ;;  %v8829_v11 = vor.u32 %v10346_v2, %v8828_v0  ;;  %5316 = vmatpush.bf16.msra.mxu2 %v9101_v63 }
  0xc3   : > { %v9084_v6 = vld [vmem:[%s11004_s30 + $0x1280] sm:$0xf]  ;;  %v10410_v7 = vld [vmem:[%s11004_s30 + $0x128c] sm:$0xf0]  ;;  %v8957_v12 = vor.u32 %v10378_v5, %v8956_v3  ;;  %5330 = vmatpush.bf16.msra.mxu3 %v9229_v4 }
  0xc4   : > { %v9212_v8 = vld [vmem:[%s11004_s30 + $0x1380] sm:$0xf]  ;;  %v10442_v9 = vld [vmem:[%s11004_s30 + $0x138c] sm:$0xf0]  ;;  %v9085_v13 = vor.u32 %v10410_v7, %v9084_v6  ;;  %5289 = vmatpush.bf16.msra.mxu0 %v8829_v11 }
  0xc5   : > { %v8812_v14 = vld [vmem:[%s11004_s30 + $0x1060] sm:$0xf]  ;;  %v10342_v15 = vld [vmem:[%s11004_s30 + $0x106c] sm:$0xf0]  ;;  %v9213_v18 = vor.u32 %v10442_v9, %v9212_v8  ;;  %5303 = vmatpush.bf16.msra.mxu1 %v8957_v12 }
  0xc6   : > { %v8940_v16 = vld [vmem:[%s11004_s30 + $0x1160] sm:$0xf]  ;;  %v10374_v19 = vld [vmem:[%s11004_s30 + $0x116c] sm:$0xf0]  ;;  %v8813_v24 = vor.u32 %v10342_v15, %v8812_v14  ;;  %5317 = vmatpush.bf16.msra.mxu2 %v9085_v13 }
  0xc7   : > { %v9068_v20 = vld [vmem:[%s11004_s30 + $0x1260] sm:$0xf]  ;;  %v10406_v21 = vld [vmem:[%s11004_s30 + $0x126c] sm:$0xf0]  ;;  %v8941_v25 = vor.u32 %v10374_v19, %v8940_v16  ;;  %5331 = vmatpush.bf16.msra.mxu3 %v9213_v18 }
  0xc8   : > { %v9196_v22 = vld [vmem:[%s11004_s30 + $0x1360] sm:$0xf]  ;;  %v10438_v23 = vld [vmem:[%s11004_s30 + $0x136c] sm:$0xf0]  ;;  %v9069_v26 = vor.u32 %v10406_v21, %v9068_v20  ;;  %5290 = vmatpush.bf16.msra.mxu0 %v8813_v24 }
  0xc9   : > { %v8796_v27 = vld [vmem:[%s11004_s30 + $0x1040] sm:$0xf]  ;;  %v10338_v28 = vld [vmem:[%s11004_s30 + $0x104c] sm:$0xf0]  ;;  %v9197_v30 = vor.u32 %v10438_v23, %v9196_v22  ;;  %5304 = vmatpush.bf16.msra.mxu1 %v8941_v25  ;;  %v6692_v25 = vld [vmem:[#allocation3 + $0x48] sm:$0xf] }
  0xca   : > { %v8924_v29 = vld [vmem:[%s11004_s30 + $0x1140] sm:$0xf]  ;;  %v10370_v33 = vld [vmem:[%s11004_s30 + $0x114c] sm:$0xf0]  ;;  %v8797_v48 = vor.u32 %v10338_v28, %v8796_v27  ;;  %5318 = vmatpush.bf16.msra.mxu2 %v9069_v26  ;;  %v9813_v26 = vld [vmem:[#allocation3 + $0xa4] sm:$0xf0] }
  0xcb   : > { %v9052_v34 = vld [vmem:[%s11004_s30 + $0x1240] sm:$0xf]  ;;  %v10402_v37 = vld [vmem:[%s11004_s30 + $0x124c] sm:$0xf0]  ;;  %v8925_v50 = vor.u32 %v10370_v33, %v8924_v29  ;;  %5332 = vmatpush.bf16.msra.mxu3 %v9197_v30  ;;  %v9800_v27 = vld [vmem:[#allocation3 + $0x44] sm:$0xf] }
  0xcc   : > { %v9180_v42 = vld [vmem:[%s11004_s30 + $0x1340] sm:$0xf]  ;;  %v10434_v45 = vld [vmem:[%s11004_s30 + $0x134c] sm:$0xf0]  ;;  %v9053_v51 = vor.u32 %v10402_v37, %v9052_v34  ;;  %5291 = vmatpush.bf16.msra.mxu0 %v8797_v48  ;;  %v6686_v30 = vld [vmem:[#allocation3 + $0xa0] sm:$0xf0] }
  0xcd   : > { %v8780_v49 = vld [vmem:[%s11004_s30 + $0x1020] sm:$0xf]  ;;  %v10334_v52 = vld [vmem:[%s11004_s30 + $0x102c] sm:$0xf0]  ;;  %v9181_v55 = vor.u32 %v10434_v45, %v9180_v42  ;;  %5305 = vmatpush.bf16.msra.mxu1 %v8925_v50  ;;  %v9801_v33 = vld [vmem:[#allocation3 + $0x4c] sm:$0xf] }
  0xce   : > { %v8908_v53 = vld [vmem:[%s11004_s30 + $0x1120] sm:$0xf]  ;;  %v10366_v54 = vld [vmem:[%s11004_s30 + $0x112c] sm:$0xf0]  ;;  %v8781_v63 = vor.u32 %v10334_v52, %v8780_v49  ;;  %5319 = vmatpush.bf16.msra.mxu2 %v9053_v51  ;;  %v6694_v34 = vld [vmem:[#allocation3 + $0xa8] sm:$0xf0] }
  0xcf   : > { %v9036_v56 = vld [vmem:[%s11004_s30 + $0x1220] sm:$0xf]  ;;  %v10398_v57 = vld [vmem:[%s11004_s30 + $0x122c] sm:$0xf0]  ;;  %v8909_v5 = vor.u32 %v10366_v54, %v8908_v53  ;;  %5333 = vmatpush.bf16.msra.mxu3 %v9181_v55  ;;  %v11394_v55 = vor.u32 %v9813_v26, %v6692_v25 }
  0xd0   : > { %v9164_v59 = vld [vmem:[%s11004_s30 + $0x1320] sm:$0xf]  ;;  %v10430_v60 = vld [vmem:[%s11004_s30 + $0x132c] sm:$0xf0]  ;;  %v9037_v6 = vor.u32 %v10398_v57, %v9036_v56  ;;  %5292 = vmatpush.bf16.msra.mxu0 %v8781_v63  ;;  %v11396_v56 = vor.u32 %v9800_v27, %v6686_v30 }
  0xd1   : > { %v8764_v61 = vld [vmem:[%s11004_s30 + $0x1000] sm:$0xf]  ;;  %v10330_v62 = vld [vmem:[%s11004_s30 + $0x100c] sm:$0xf0]  ;;  %v9165_v11 = vor.u32 %v10430_v60, %v9164_v59  ;;  %5306 = vmatpush.bf16.msra.mxu1 %v8909_v5  ;;  %v11400_v60 = vor.u32 %v9801_v33, %v6694_v34 }
  0xd2   : > { %v8892_v0 = vld [vmem:[%s11004_s30 + $0x1100] sm:$0xf]  ;;  %v10362_v2 = vld [vmem:[%s11004_s30 + $0x110c] sm:$0xf0]  ;;  %v8765_v19 = vor.u32 %v10330_v62, %v8764_v61  ;;  %5320 = vmatpush.bf16.msra.mxu2 %v9037_v6 }
  0xd3   : > { %v9020_v3 = vld [vmem:[%s11004_s30 + $0x1200] sm:$0xf]  ;;  %v10394_v4 = vld [vmem:[%s11004_s30 + $0x120c] sm:$0xf0]  ;;  %v8893_v23 = vor.u32 %v10362_v2, %v8892_v0  ;;  %5334 = vmatpush.bf16.msra.mxu3 %v9165_v11 }
  0xd4   : > { %v9148_v7 = vld [vmem:[%s11004_s30 + $0x1300] sm:$0xf]  ;;  %v10426_v8 = vld [vmem:[%s11004_s30 + $0x130c] sm:$0xf0]  ;;  %v9021_v24 = vor.u32 %v10394_v4, %v9020_v3  ;;  %5293 = vmatpush.bf16.msra.mxu0 %v8765_v19 }
  0xd5   : > { %v9388_v9 = vld [vmem:[%s11004_s30 + $0x14e0] sm:$0xf]  ;;  %v10486_v12 = vld [vmem:[%s11004_s30 + $0x14ec] sm:$0xf0]  ;;  %v9149_v28 = vor.u32 %v10426_v8, %v9148_v7  ;;  %5307 = vmatpush.bf16.msra.mxu1 %v8893_v23 }
  0xd6   : > { %v9516_v13 = vld [vmem:[%s11004_s30 + $0x15e0] sm:$0xf]  ;;  %v10518_v14 = vld [vmem:[%s11004_s30 + $0x15ec] sm:$0xf0]  ;;  %v9389_v29 = vor.u32 %v10486_v12, %v9388_v9  ;;  %5321 = vmatpush.bf16.msra.mxu2 %v9021_v24 }
  0xd7   : > { %v9644_v15 = vld [vmem:[%s11004_s30 + $0x16e0] sm:$0xf]  ;;  %v10550_v16 = vld [vmem:[%s11004_s30 + $0x16ec] sm:$0xf0]  ;;  %v9517_v37 = vor.u32 %v10518_v14, %v9516_v13  ;;  %5335 = vmatpush.bf16.msra.mxu3 %v9149_v28 }
  0xd8   : > { %v9772_v18 = vld [vmem:[%s11004_s30 + $0x17e0] sm:$0xf]  ;;  %v10582_v20 = vld [vmem:[%s11004_s30 + $0x17ec] sm:$0xf0]  ;;  %v9645_v42 = vor.u32 %v10550_v16, %v9644_v15  ;;  %5342 = vmatpush.bf16.msrb.mxu0 %v9389_v29  ;;  %5308 = vmatmul.bf16.vlgmr.msra.gmra.mxu1 %v11396_v56 }
  0xd9   : > { %v6684_v21 = vld [vmem:[#allocation3 + $0x40] sm:$0xf]  ;;  %v10482_v48 = vld [vmem:[%s11004_s30 + $0x14cc] sm:$0xf0]  ;;  %v9773_v50 = vor.u32 %v10582_v20, %v9772_v18  ;;  %5356 = vmatpush.bf16.msrb.mxu1 %v9517_v37  ;;  %5322 = vmatmul.bf16.vlgmr.msra.gmra.mxu2 %v11394_v55 }
  0xda   : > { %v9812_v22 = vld [vmem:[#allocation3 + $0x9c] sm:$0xf0]  ;;  %v10514_v52 = vld [vmem:[%s11004_s30 + $0x15cc] sm:$0xf0]  ;;  %5370 = vmatpush.bf16.msrb.mxu2 %v9645_v42  ;;  %5336 = vmatmul.bf16.vlgmr.msra.gmra.mxu3 %v11400_v60 }
  0xdb   : > { %v9372_v45 = vld [vmem:[%s11004_s30 + $0x14c0] sm:$0xf]  ;;  %v11389_v51 = vor.u32 %v9812_v22, %v6684_v21  ;;  %v10546_v54 = vld [vmem:[%s11004_s30 + $0x16cc] sm:$0xf0]  ;;  %5384 = vmatpush.bf16.msrb.mxu3 %v9773_v50 }
  0xdc   : > { %v9500_v49 = vld [vmem:[%s11004_s30 + $0x15c0] sm:$0xf]  ;;  %v10578_v59 = vld [vmem:[%s11004_s30 + $0x17cc] sm:$0xf0]  ;;  %v9373_v61 = vor.u32 %v10482_v48, %v9372_v45 }
  0xdd   : > { %v9628_v53 = vld [vmem:[%s11004_s30 + $0x16c0] sm:$0xf]  ;;  %v9501_v62 = vor.u32 %v10514_v52, %v9500_v49  ;;  %v10478_v2 = vld [vmem:[%s11004_s30 + $0x14ac] sm:$0xf0]  ;;  %5294 = vmatmul.bf16.vlgmr.msra.gmra.mxu0 %v11389_v51 }
  0xde   : > { %v9756_v57 = vld [vmem:[%s11004_s30 + $0x17c0] sm:$0xf]  ;;  %v9629_v63 = vor.u32 %v10546_v54, %v9628_v53  ;;  %v10510_v5 = vld [vmem:[%s11004_s30 + $0x15ac] sm:$0xf0]  ;;  %5343 = vmatpush.bf16.msrb.mxu0 %v9373_v61 }
  0xdf   : > { %v9356_v0 = vld [vmem:[%s11004_s30 + $0x14a0] sm:$0xf]  ;;  %v9757_v4 = vor.u32 %v10578_v59, %v9756_v57  ;;  %v10542_v7 = vld [vmem:[%s11004_s30 + $0x16ac] sm:$0xf0]  ;;  %5357 = vmatpush.bf16.msrb.mxu1 %v9501_v62 }
  0xe0   : > { %v9484_v3 = vld [vmem:[%s11004_s30 + $0x15a0] sm:$0xf]  ;;  %v10574_v9 = vld [vmem:[%s11004_s30 + $0x17ac] sm:$0xf0]  ;;  %v9357_v11 = vor.u32 %v10478_v2, %v9356_v0  ;;  %5371 = vmatpush.bf16.msrb.mxu2 %v9629_v63 }
  0xe1   : > { %v9612_v6 = vld [vmem:[%s11004_s30 + $0x16a0] sm:$0xf]  ;;  %v9485_v12 = vor.u32 %v10510_v5, %v9484_v3  ;;  %v10474_v15 = vld [vmem:[%s11004_s30 + $0x148c] sm:$0xf0]  ;;  %5385 = vmatpush.bf16.msrb.mxu3 %v9757_v4 }
  0xe2   : > { %v9740_v8 = vld [vmem:[%s11004_s30 + $0x17a0] sm:$0xf]  ;;  %v9613_v13 = vor.u32 %v10542_v7, %v9612_v6  ;;  %v10506_v19 = vld [vmem:[%s11004_s30 + $0x158c] sm:$0xf0]  ;;  %5344 = vmatpush.bf16.msrb.mxu0 %v9357_v11 }
  0xe3   : > { %v9340_v14 = vld [vmem:[%s11004_s30 + $0x1480] sm:$0xf]  ;;  %v9741_v18 = vor.u32 %v10574_v9, %v9740_v8  ;;  %v10538_v21 = vld [vmem:[%s11004_s30 + $0x168c] sm:$0xf0]  ;;  %5358 = vmatpush.bf16.msrb.mxu1 %v9485_v12 }
  0xe4   : > { %v9468_v16 = vld [vmem:[%s11004_s30 + $0x1580] sm:$0xf]  ;;  %v10570_v23 = vld [vmem:[%s11004_s30 + $0x178c] sm:$0xf0]  ;;  %v9341_v24 = vor.u32 %v10474_v15, %v9340_v14  ;;  %5372 = vmatpush.bf16.msrb.mxu2 %v9613_v13 }
  0xe5   : > { %v9596_v20 = vld [vmem:[%s11004_s30 + $0x1680] sm:$0xf]  ;;  %v9469_v25 = vor.u32 %v10506_v19, %v9468_v16  ;;  %v10470_v28 = vld [vmem:[%s11004_s30 + $0x146c] sm:$0xf0]  ;;  %5386 = vmatpush.bf16.msrb.mxu3 %v9741_v18 }
  0xe6   : > { %v9724_v22 = vld [vmem:[%s11004_s30 + $0x1780] sm:$0xf]  ;;  %v9597_v26 = vor.u32 %v10538_v21, %v9596_v20  ;;  %v10502_v33 = vld [vmem:[%s11004_s30 + $0x156c] sm:$0xf0]  ;;  %5345 = vmatpush.bf16.msrb.mxu0 %v9341_v24 }
  0xe7   : > { %v9324_v27 = vld [vmem:[%s11004_s30 + $0x1460] sm:$0xf]  ;;  %v9725_v30 = vor.u32 %v10570_v23, %v9724_v22  ;;  %v10534_v37 = vld [vmem:[%s11004_s30 + $0x166c] sm:$0xf0]  ;;  %5359 = vmatpush.bf16.msrb.mxu1 %v9469_v25 }
  0xe8   : > { %v9452_v29 = vld [vmem:[%s11004_s30 + $0x1560] sm:$0xf]  ;;  %v10566_v45 = vld [vmem:[%s11004_s30 + $0x176c] sm:$0xf0]  ;;  %v9325_v48 = vor.u32 %v10470_v28, %v9324_v27  ;;  %5373 = vmatpush.bf16.msrb.mxu2 %v9597_v26  ;;  %v9844_v27 = vld [vmem:[%s11004_s30 + $0xe4] sm:$0xf] }
  0xe9   : > { %v9580_v34 = vld [vmem:[%s11004_s30 + $0x1660] sm:$0xf]  ;;  %v9453_v49 = vor.u32 %v10502_v33, %v9452_v29  ;;  %v10466_v53 = vld [vmem:[%s11004_s30 + $0x144c] sm:$0xf0]  ;;  %5387 = vmatpush.bf16.msrb.mxu3 %v9725_v30  ;;  %v6830_v29 = vld [vmem:[%s11004_s30 + $0xf0] sm:$0xf0] }
  0xea   : > { %v9708_v42 = vld [vmem:[%s11004_s30 + $0x1760] sm:$0xf]  ;;  %v9581_v50 = vor.u32 %v10534_v37, %v9580_v34  ;;  %v10498_v59 = vld [vmem:[%s11004_s30 + $0x154c] sm:$0xf0]  ;;  %5346 = vmatpush.bf16.msrb.mxu0 %v9325_v48  ;;  %v9876_v30 = vld [vmem:[%s11004_s30 + $0x1e4] sm:$0xf] }
  0xeb   : > { %v9308_v52 = vld [vmem:[%s11004_s30 + $0x1440] sm:$0xf]  ;;  %v9709_v57 = vor.u32 %v10566_v45, %v9708_v42  ;;  %v10530_v62 = vld [vmem:[%s11004_s30 + $0x164c] sm:$0xf0]  ;;  %5360 = vmatpush.bf16.msrb.mxu1 %v9453_v49  ;;  %v6958_v33 = vld [vmem:[%s11004_s30 + $0x1f0] sm:$0xf0] }
  0xec   : > { %v9436_v54 = vld [vmem:[%s11004_s30 + $0x1540] sm:$0xf]  ;;  %v10562_v0 = vld [vmem:[%s11004_s30 + $0x174c] sm:$0xf0]  ;;  %v9309_v2 = vor.u32 %v10466_v53, %v9308_v52  ;;  %5374 = vmatpush.bf16.msrb.mxu2 %v9581_v50  ;;  %v9908_v34 = vld [vmem:[%s11004_s30 + $0x2e4] sm:$0xf] }
  0xed   : > { %v9564_v61 = vld [vmem:[%s11004_s30 + $0x1640] sm:$0xf]  ;;  %v9437_v4 = vor.u32 %v10498_v59, %v9436_v54  ;;  %v10462_v6 = vld [vmem:[%s11004_s30 + $0x142c] sm:$0xf0]  ;;  %5388 = vmatpush.bf16.msrb.mxu3 %v9709_v57  ;;  %v7086_v37 = vld [vmem:[%s11004_s30 + $0x2f0] sm:$0xf0] }
  0xee   : > { %v9692_v63 = vld [vmem:[%s11004_s30 + $0x1740] sm:$0xf]  ;;  %v9565_v5 = vor.u32 %v10530_v62, %v9564_v61  ;;  %v10494_v8 = vld [vmem:[%s11004_s30 + $0x152c] sm:$0xf0]  ;;  %5347 = vmatpush.bf16.msrb.mxu0 %v9309_v2  ;;  %v9940_v42 = vld [vmem:[%s11004_s30 + $0x3e4] sm:$0xf]  ;;  %v6833_v62 = vor.u32 %v9844_v27, %v6830_v29 }
  0xef   : > { %v9292_v3 = vld [vmem:[%s11004_s30 + $0x1420] sm:$0xf]  ;;  %v9693_v9 = vor.u32 %v10562_v0, %v9692_v63  ;;  %v10526_v12 = vld [vmem:[%s11004_s30 + $0x162c] sm:$0xf0]  ;;  %5361 = vmatpush.bf16.msrb.mxu1 %v9437_v4  ;;  %v7214_v48 = vld [vmem:[%s11004_s30 + $0x3f0] sm:$0xf0]  ;;  %v7089_v4 = vor.u32 %v9908_v34, %v7086_v37 }
  0xf0   : > { %v9420_v7 = vld [vmem:[%s11004_s30 + $0x1520] sm:$0xf]  ;;  %v10558_v14 = vld [vmem:[%s11004_s30 + $0x172c] sm:$0xf0]  ;;  %v9293_v18 = vor.u32 %v10462_v6, %v9292_v3  ;;  %5375 = vmatpush.bf16.msrb.mxu2 %v9565_v5  ;;  %v6708_v54 = vld [vmem:[#allocation3 + $0x58] sm:$0xf]  ;;  %v6961_v3 = vor.u32 %v9876_v30, %v6958_v33 }
  0xf1   : > { %v9548_v11 = vld [vmem:[%s11004_s30 + $0x1620] sm:$0xf]  ;;  %v10458_v16 = vld [vmem:[%s11004_s30 + $0x140c] sm:$0xf0]  ;;  %v9421_v23 = vor.u32 %v10494_v8, %v9420_v7  ;;  %5389 = vmatpush.bf16.msrb.mxu3 %v9693_v9  ;;  %v9815_v57 = vld [vmem:[#allocation3 + $0xb4] sm:$0xf0]  ;;  %v7217_v8 = vor.u32 %v9940_v42, %v7214_v48 }
  0xf2   : > { %v9676_v13 = vld [vmem:[%s11004_s30 + $0x1720] sm:$0xf]  ;;  %v10490_v20 = vld [vmem:[%s11004_s30 + $0x150c] sm:$0xf0]  ;;  %v9549_v24 = vor.u32 %v10526_v12, %v9548_v11  ;;  %5348 = vmatpush.bf16.msrb.mxu0 %v9293_v18  ;;  %v9802_v59 = vld [vmem:[#allocation3 + $0x54] sm:$0xf] }
  0xf3   : > { %v9276_v15 = vld [vmem:[%s11004_s30 + $0x1400] sm:$0xf]  ;;  %v10522_v22 = vld [vmem:[%s11004_s30 + $0x160c] sm:$0xf0]  ;;  %v9677_v28 = vor.u32 %v10558_v14, %v9676_v13  ;;  %5362 = vmatpush.bf16.msrb.mxu1 %v9421_v23  ;;  %v6702_v63 = vld [vmem:[#allocation3 + $0xb0] sm:$0xf0]  ;;  %v11470_v14 = vor.u32 %v9815_v57, %v6708_v54 }
  0xf4   : > { %v9404_v19 = vld [vmem:[%s11004_s30 + $0x1500] sm:$0xf]  ;;  %v10554_v26 = vld [vmem:[%s11004_s30 + $0x170c] sm:$0xf0]  ;;  %v9277_v45 = vor.u32 %v10458_v16, %v9276_v15  ;;  %5376 = vmatpush.bf16.msrb.mxu2 %v9549_v24  ;;  %v9803_v0 = vld [vmem:[#allocation3 + $0x5c] sm:$0xf]  ;;  %v11472_v15 = vor.u32 %v9802_v59, %v6702_v63 }
  0xf5   : > { %v9532_v21 = vld [vmem:[%s11004_s30 + $0x1600] sm:$0xf]  ;;  %v6700_v49 = vld [vmem:[#allocation3 + $0x50] sm:$0xf]  ;;  %v9405_v52 = vor.u32 %v10490_v20, %v9404_v19  ;;  %5390 = vmatpush.bf16.msrb.mxu3 %v9677_v28  ;;  %v6710_v2 = vld [vmem:[#allocation3 + $0xb8] sm:$0xf0] }
  0xf6   : > { %v9660_v25 = vld [vmem:[%s11004_s30 + $0x1700] sm:$0xf]  ;;  %v9814_v50 = vld [vmem:[#allocation3 + $0xac] sm:$0xf0]  ;;  %v9533_v53 = vor.u32 %v10522_v22, %v9532_v21  ;;  %v9840_v5 = vld [vmem:[%s11004_s30 + $0xc4] sm:$0xf]  ;;  %5349 = vmatpush.bf16.msrb.mxu0 %v9277_v45  ;;  %v11476_v19 = vor.u32 %v9803_v0, %v6710_v2 }
  0xf7   : > { %v9661_v61 = vor.u32 %v10554_v26, %v9660_v25  ;;  %v6814_v6 = vld [vmem:[%s11004_s30 + $0xd0] sm:$0xf0]  ;;  %v9872_v7 = vld [vmem:[%s11004_s30 + $0x1c4] sm:$0xf]  ;;  %v11465_v9 = vor.u32 %v9814_v50, %v6700_v49  ;;  %5363 = vmatpush.bf16.msrb.mxu1 %v9405_v52 }
  0xf8   : > { %v6942_v11 = vld [vmem:[%s11004_s30 + $0x1d0] sm:$0xf0]  ;;  %v9904_v12 = vld [vmem:[%s11004_s30 + $0x2c4] sm:$0xf]  ;;  %5377 = vmatpush.bf16.msrb.mxu2 %v9533_v53  ;;  %v6817_v20 = vor.u32 %v9840_v5, %v6814_v6 }
  0xf9   : > { %v7070_v13 = vld [vmem:[%s11004_s30 + $0x2d0] sm:$0xf0]  ;;  %v9936_v16 = vld [vmem:[%s11004_s30 + $0x3c4] sm:$0xf]  ;;  %5391 = vmatpush.bf16.msrb.mxu3 %v9661_v61  ;;  %v6945_v21 = vor.u32 %v9872_v7, %v6942_v11  ;;  %5350 = vmatmul.bf16.vlgmr.msrb.gmra.mxu0 %v11465_v9 }
  0xfa   : > { %v7198_v18 = vld [vmem:[%s11004_s30 + $0x3d0] sm:$0xf0]  ;;  %5398 = vmatpush.bf16.msra.mxu0 %v6833_v62  ;;  %v7073_v22 = vor.u32 %v9904_v12, %v7070_v13  ;;  %v9836_v23 = vld [vmem:[%s11004_s30 + $0xa4] sm:$0xf]  ;;  %5364 = vmatmul.bf16.vlgmr.msrb.gmra.mxu1 %v11472_v15 }
  0xfb   : > { %5412 = vmatpush.bf16.msra.mxu1 %v6961_v3  ;;  %v6798_v24 = vld [vmem:[%s11004_s30 + $0xb0] sm:$0xf0]  ;;  %v9868_v25 = vld [vmem:[%s11004_s30 + $0x1a4] sm:$0xf]  ;;  %v7201_v26 = vor.u32 %v9936_v16, %v7198_v18  ;;  %5378 = vmatmul.bf16.vlgmr.msrb.gmra.mxu2 %v11470_v14 }
  0xfc   : > { %5426 = vmatpush.bf16.msra.mxu2 %v7089_v4  ;;  %v6926_v27 = vld [vmem:[%s11004_s30 + $0x1b0] sm:$0xf0]  ;;  %v9900_v28 = vld [vmem:[%s11004_s30 + $0x2a4] sm:$0xf]  ;;  %5392 = vmatmul.bf16.vlgmr.msrb.gmra.mxu3 %v11476_v19  ;;  %v6801_v34 = vor.u32 %v9836_v23, %v6798_v24 }
  0xfd   : > { %5440 = vmatpush.bf16.msra.mxu3 %v7217_v8  ;;  %v7054_v29 = vld [vmem:[%s11004_s30 + $0x2b0] sm:$0xf0]  ;;  %v9932_v30 = vld [vmem:[%s11004_s30 + $0x3a4] sm:$0xf]  ;;  %v6929_v37 = vor.u32 %v9868_v25, %v6926_v27 }
  0xfe   : > { %v7182_v33 = vld [vmem:[%s11004_s30 + $0x3b0] sm:$0xf0]  ;;  %5399 = vmatpush.bf16.msra.mxu0 %v6817_v20  ;;  %v7057_v42 = vor.u32 %v9900_v28, %v7054_v29  ;;  %v9832_v45 = vld [vmem:[%s11004_s30 + $0x84] sm:$0xf] }
  0xff   : > { %5413 = vmatpush.bf16.msra.mxu1 %v6945_v21  ;;  %v6782_v48 = vld [vmem:[%s11004_s30 + $0x90] sm:$0xf0]  ;;  %v9864_v49 = vld [vmem:[%s11004_s30 + $0x184] sm:$0xf]  ;;  %v7185_v50 = vor.u32 %v9932_v30, %v7182_v33 }
 0x100   : > { %5427 = vmatpush.bf16.msra.mxu2 %v7073_v22  ;;  %v6910_v52 = vld [vmem:[%s11004_s30 + $0x190] sm:$0xf0]  ;;  %v9896_v53 = vld [vmem:[%s11004_s30 + $0x284] sm:$0xf]  ;;  %v6785_v61 = vor.u32 %v9832_v45, %v6782_v48 }
 0x101   : > { %5441 = vmatpush.bf16.msra.mxu3 %v7201_v26  ;;  %v7038_v54 = vld [vmem:[%s11004_s30 + $0x290] sm:$0xf0]  ;;  %v9928_v57 = vld [vmem:[%s11004_s30 + $0x384] sm:$0xf]  ;;  %v6913_v62 = vor.u32 %v9864_v49, %v6910_v52 }
 0x102   : > { %v7166_v59 = vld [vmem:[%s11004_s30 + $0x390] sm:$0xf0]  ;;  %5400 = vmatpush.bf16.msra.mxu0 %v6801_v34  ;;  %v7041_v63 = vor.u32 %v9896_v53, %v7038_v54  ;;  %v9828_v0 = vld [vmem:[%s11004_s30 + $0x64] sm:$0xf] }
 0x103   : > { %5414 = vmatpush.bf16.msra.mxu1 %v6929_v37  ;;  %v6766_v2 = vld [vmem:[%s11004_s30 + $0x70] sm:$0xf0]  ;;  %v9860_v3 = vld [vmem:[%s11004_s30 + $0x164] sm:$0xf]  ;;  %v7169_v4 = vor.u32 %v9928_v57, %v7166_v59 }
 0x104   : > { %5428 = vmatpush.bf16.msra.mxu2 %v7057_v42  ;;  %v6894_v5 = vld [vmem:[%s11004_s30 + $0x170] sm:$0xf0]  ;;  %v9892_v6 = vld [vmem:[%s11004_s30 + $0x264] sm:$0xf]  ;;  %v6769_v12 = vor.u32 %v9828_v0, %v6766_v2 }
 0x105   : > { %5442 = vmatpush.bf16.msra.mxu3 %v7185_v50  ;;  %v7022_v7 = vld [vmem:[%s11004_s30 + $0x270] sm:$0xf0]  ;;  %v9924_v8 = vld [vmem:[%s11004_s30 + $0x364] sm:$0xf]  ;;  %v6897_v13 = vor.u32 %v9860_v3, %v6894_v5 }
 0x106   : > { %v7150_v11 = vld [vmem:[%s11004_s30 + $0x370] sm:$0xf0]  ;;  %5401 = vmatpush.bf16.msra.mxu0 %v6785_v61  ;;  %v7025_v16 = vor.u32 %v9892_v6, %v7022_v7  ;;  %v9824_v18 = vld [vmem:[%s11004_s30 + $0x44] sm:$0xf] }
 0x107   : > { %5415 = vmatpush.bf16.msra.mxu1 %v6913_v62  ;;  %v6750_v20 = vld [vmem:[%s11004_s30 + $0x50] sm:$0xf0]  ;;  %v9856_v21 = vld [vmem:[%s11004_s30 + $0x144] sm:$0xf]  ;;  %v7153_v22 = vor.u32 %v9924_v8, %v7150_v11 }
 0x108   : > { %5429 = vmatpush.bf16.msra.mxu2 %v7041_v63  ;;  %v6878_v23 = vld [vmem:[%s11004_s30 + $0x150] sm:$0xf0]  ;;  %v9888_v24 = vld [vmem:[%s11004_s30 + $0x244] sm:$0xf]  ;;  %v6753_v28 = vor.u32 %v9824_v18, %v6750_v20 }
 0x109   : > { %5443 = vmatpush.bf16.msra.mxu3 %v7169_v4  ;;  %v7006_v25 = vld [vmem:[%s11004_s30 + $0x250] sm:$0xf0]  ;;  %v9920_v26 = vld [vmem:[%s11004_s30 + $0x344] sm:$0xf]  ;;  %v6881_v29 = vor.u32 %v9856_v21, %v6878_v23 }
 0x10a   : > { %v7134_v27 = vld [vmem:[%s11004_s30 + $0x350] sm:$0xf0]  ;;  %5402 = vmatpush.bf16.msra.mxu0 %v6769_v12  ;;  %v7009_v30 = vor.u32 %v9888_v24, %v7006_v25  ;;  %v9820_v33 = vld [vmem:[%s11004_s30 + $0x24] sm:$0xf] }
 0x10b   : > { %5416 = vmatpush.bf16.msra.mxu1 %v6897_v13  ;;  %v6734_v34 = vld [vmem:[%s11004_s30 + $0x30] sm:$0xf0]  ;;  %v9852_v37 = vld [vmem:[%s11004_s30 + $0x124] sm:$0xf]  ;;  %v7137_v42 = vor.u32 %v9920_v26, %v7134_v27 }
 0x10c   : > { %5430 = vmatpush.bf16.msra.mxu2 %v7025_v16  ;;  %v6862_v45 = vld [vmem:[%s11004_s30 + $0x130] sm:$0xf0]  ;;  %v9884_v48 = vld [vmem:[%s11004_s30 + $0x224] sm:$0xf]  ;;  %v6737_v53 = vor.u32 %v9820_v33, %v6734_v34 }
 0x10d   : > { %5444 = vmatpush.bf16.msra.mxu3 %v7153_v22  ;;  %v6990_v49 = vld [vmem:[%s11004_s30 + $0x230] sm:$0xf0]  ;;  %v9916_v50 = vld [vmem:[%s11004_s30 + $0x324] sm:$0xf]  ;;  %v6865_v59 = vor.u32 %v9852_v37, %v6862_v45 }
 0x10e   : > { %v7118_v52 = vld [vmem:[%s11004_s30 + $0x330] sm:$0xf0]  ;;  %5403 = vmatpush.bf16.msra.mxu0 %v6753_v28  ;;  %v9816_v54 = vld [vmem:[%s11004_s30 + $0x4] sm:$0xf]  ;;  %v6993_v61 = vor.u32 %v9884_v48, %v6990_v49 }
 0x10f   : > { %v6718_v57 = vld [vmem:[%s11004_s30 + $0x10] sm:$0xf0]  ;;  %5417 = vmatpush.bf16.msra.mxu1 %v6881_v29  ;;  %v9848_v62 = vld [vmem:[%s11004_s30 + $0x104] sm:$0xf]  ;;  %v7121_v2 = vor.u32 %v9916_v50, %v7118_v52 }
 0x110   : > { %5431 = vmatpush.bf16.msra.mxu2 %v7009_v30  ;;  %v6846_v63 = vld [vmem:[%s11004_s30 + $0x110] sm:$0xf0]  ;;  %v9880_v0 = vld [vmem:[%s11004_s30 + $0x204] sm:$0xf]  ;;  %v6721_v11 = vor.u32 %v9816_v54, %v6718_v57 }
 0x111   : > { %5445 = vmatpush.bf16.msra.mxu3 %v7137_v42  ;;  %v6974_v3 = vld [vmem:[%s11004_s30 + $0x210] sm:$0xf0]  ;;  %v9912_v4 = vld [vmem:[%s11004_s30 + $0x304] sm:$0xf]  ;;  %v6849_v18 = vor.u32 %v9848_v62, %v6846_v63 }
 0x112   : > { %v7102_v5 = vld [vmem:[%s11004_s30 + $0x310] sm:$0xf0]  ;;  %v9972_v6 = vld [vmem:[%s11004_s30 + $0x4e4] sm:$0xf]  ;;  %5404 = vmatpush.bf16.msra.mxu0 %v6737_v53  ;;  %v6977_v20 = vor.u32 %v9880_v0, %v6974_v3  ;;  %v11558_v3 = vpop.f32.mrf.mxu0 }
 0x113   : > { %v7342_v7 = vld [vmem:[%s11004_s30 + $0x4f0] sm:$0xf0]  ;;  %v10004_v8 = vld [vmem:[%s11004_s30 + $0x5e4] sm:$0xf]  ;;  %5418 = vmatpush.bf16.msra.mxu1 %v6865_v59  ;;  %v7105_v23 = vor.u32 %v9912_v4, %v7102_v5 }
 0x114   : > { %v7470_v12 = vld [vmem:[%s11004_s30 + $0x5f0] sm:$0xf0]  ;;  %v10036_v13 = vld [vmem:[%s11004_s30 + $0x6e4] sm:$0xf]  ;;  %5432 = vmatpush.bf16.msra.mxu2 %v6993_v61  ;;  %v7345_v24 = vor.u32 %v9972_v6, %v7342_v7 }
 0x115   : > { %v7598_v16 = vld [vmem:[%s11004_s30 + $0x6f0] sm:$0xf0]  ;;  %v10068_v21 = vld [vmem:[%s11004_s30 + $0x7e4] sm:$0xf]  ;;  %5446 = vmatpush.bf16.msra.mxu3 %v7121_v2  ;;  %v7473_v25 = vor.u32 %v10004_v8, %v7470_v12 }
 0x116   : > { %v7726_v22 = vld [vmem:[%s11004_s30 + $0x7f0] sm:$0xf0]  ;;  %v7601_v26 = vor.u32 %v10036_v13, %v7598_v16  ;;  %v9968_v27 = vld [vmem:[%s11004_s30 + $0x4c4] sm:$0xf]  ;;  %5405 = vmatpush.bf16.msra.mxu0 %v6721_v11  ;;  %v11563_v11 = vpop.f32.mrf.mxu1 }
 0x117   : > { %v7326_v28 = vld [vmem:[%s11004_s30 + $0x4d0] sm:$0xf0]  ;;  %v10000_v29 = vld [vmem:[%s11004_s30 + $0x5c4] sm:$0xf]  ;;  %v7729_v30 = vor.u32 %v10068_v21, %v7726_v22  ;;  %5419 = vmatpush.bf16.msra.mxu1 %v6849_v18 }
 0x118   : > { %v7454_v33 = vld [vmem:[%s11004_s30 + $0x5d0] sm:$0xf0]  ;;  %v10032_v34 = vld [vmem:[%s11004_s30 + $0x6c4] sm:$0xf]  ;;  %5433 = vmatpush.bf16.msra.mxu2 %v6977_v20  ;;  %v7329_v48 = vor.u32 %v9968_v27, %v7326_v28 }
 0x119   : > { %v7582_v37 = vld [vmem:[%s11004_s30 + $0x6d0] sm:$0xf0]  ;;  %v10064_v42 = vld [vmem:[%s11004_s30 + $0x7c4] sm:$0xf]  ;;  %5447 = vmatpush.bf16.msra.mxu3 %v7105_v23  ;;  %v7457_v49 = vor.u32 %v10000_v29, %v7454_v33  ;;  %5406 = vmatmul.bf16.vlgmr.msra.gmra.mxu0 %v11092_v58 }
 0x11a   : > { %v7710_v45 = vld [vmem:[%s11004_s30 + $0x7d0] sm:$0xf0]  ;;  %5454 = vmatpush.bf16.msrb.mxu0 %v7345_v24  ;;  %v7585_v50 = vor.u32 %v10032_v34, %v7582_v37  ;;  %v9964_v52 = vld [vmem:[%s11004_s30 + $0x4a4] sm:$0xf]  ;;  %5420 = vmatmul.bf16.vlgmr.msra.gmra.mxu1 %v11104_v10 }
 0x11b   : > { %5468 = vmatpush.bf16.msrb.mxu1 %v7473_v25  ;;  %v7310_v53 = vld [vmem:[%s11004_s30 + $0x4b0] sm:$0xf0]  ;;  %v9996_v54 = vld [vmem:[%s11004_s30 + $0x5a4] sm:$0xf]  ;;  %v7713_v57 = vor.u32 %v10064_v42, %v7710_v45  ;;  %5434 = vmatmul.bf16.vlgmr.msra.gmra.mxu2 %v11097_v1  ;;  %v11578_v42 = vpop.f32.mrf.mxu2 }
 0x11c   : > { %5482 = vmatpush.bf16.msrb.mxu2 %v7601_v26  ;;  %v7438_v59 = vld [vmem:[%s11004_s30 + $0x5b0] sm:$0xf0]  ;;  %v10028_v61 = vld [vmem:[%s11004_s30 + $0x6a4] sm:$0xf]  ;;  %v7313_v2 = vor.u32 %v9964_v52, %v7310_v53  ;;  %5448 = vmatmul.bf16.vlgmr.msra.gmra.mxu3 %v11109_v17 }
 0x11d   : > { %5496 = vmatpush.bf16.msrb.mxu3 %v7729_v30  ;;  %v7566_v62 = vld [vmem:[%s11004_s30 + $0x6b0] sm:$0xf0]  ;;  %v10060_v63 = vld [vmem:[%s11004_s30 + $0x7a4] sm:$0xf]  ;;  %v7441_v4 = vor.u32 %v9996_v54, %v7438_v59 }
 0x11e   : > { %v7694_v0 = vld [vmem:[%s11004_s30 + $0x7b0] sm:$0xf0]  ;;  %5455 = vmatpush.bf16.msrb.mxu0 %v7329_v48  ;;  %v7569_v5 = vor.u32 %v10028_v61, %v7566_v62  ;;  %v9960_v6 = vld [vmem:[%s11004_s30 + $0x484] sm:$0xf]  ;;  %v11580_v48 = vpop.f32.mrf.mxu3 }
 0x11f   : > { %5469 = vmatpush.bf16.msrb.mxu1 %v7457_v49  ;;  %v7294_v7 = vld [vmem:[%s11004_s30 + $0x490] sm:$0xf0]  ;;  %v9992_v8 = vld [vmem:[%s11004_s30 + $0x584] sm:$0xf]  ;;  %v7697_v12 = vor.u32 %v10060_v63, %v7694_v0  ;;  %v11588_v63 = vpop.f32.mrf.mxu0 }
 0x120   : > { %5483 = vmatpush.bf16.msrb.mxu2 %v7585_v50  ;;  %v7422_v13 = vld [vmem:[%s11004_s30 + $0x590] sm:$0xf0]  ;;  %v10024_v16 = vld [vmem:[%s11004_s30 + $0x684] sm:$0xf]  ;;  %v7297_v22 = vor.u32 %v9960_v6, %v7294_v7 }
 0x121   : > { %5497 = vmatpush.bf16.msrb.mxu3 %v7713_v57  ;;  %v7550_v18 = vld [vmem:[%s11004_s30 + $0x690] sm:$0xf0]  ;;  %v10056_v20 = vld [vmem:[%s11004_s30 + $0x784] sm:$0xf]  ;;  %v7425_v23 = vor.u32 %v9992_v8, %v7422_v13 }
 0x122   : > { %v7678_v21 = vld [vmem:[%s11004_s30 + $0x790] sm:$0xf0]  ;;  %5456 = vmatpush.bf16.msrb.mxu0 %v7313_v2  ;;  %v7553_v24 = vor.u32 %v10024_v16, %v7550_v18  ;;  %v9956_v25 = vld [vmem:[%s11004_s30 + $0x464] sm:$0xf] }
 0x123   : > { %5470 = vmatpush.bf16.msrb.mxu1 %v7441_v4  ;;  %v7278_v26 = vld [vmem:[%s11004_s30 + $0x470] sm:$0xf0]  ;;  %v9988_v27 = vld [vmem:[%s11004_s30 + $0x564] sm:$0xf]  ;;  %v7681_v28 = vor.u32 %v10056_v20, %v7678_v21  ;;  %v11592_v4 = vpop.f32.mrf.mxu1 }
 0x124   : > { %5484 = vmatpush.bf16.msrb.mxu2 %v7569_v5  ;;  %v7406_v29 = vld [vmem:[%s11004_s30 + $0x570] sm:$0xf0]  ;;  %v10020_v30 = vld [vmem:[%s11004_s30 + $0x664] sm:$0xf]  ;;  %v7281_v45 = vor.u32 %v9956_v25, %v7278_v26 }
 0x125   : > { %5498 = vmatpush.bf16.msrb.mxu3 %v7697_v12  ;;  %v7534_v33 = vld [vmem:[%s11004_s30 + $0x670] sm:$0xf0]  ;;  %v10052_v34 = vld [vmem:[%s11004_s30 + $0x764] sm:$0xf]  ;;  %v7409_v49 = vor.u32 %v9988_v27, %v7406_v29 }
 0x126   : > { %v7662_v37 = vld [vmem:[%s11004_s30 + $0x770] sm:$0xf0]  ;;  %5457 = vmatpush.bf16.msrb.mxu0 %v7297_v22  ;;  %v7537_v50 = vor.u32 %v10020_v30, %v7534_v33  ;;  %v9952_v52 = vld [vmem:[%s11004_s30 + $0x444] sm:$0xf] }
 0x127   : > { %5471 = vmatpush.bf16.msrb.mxu1 %v7425_v23  ;;  %v7262_v53 = vld [vmem:[%s11004_s30 + $0x450] sm:$0xf0]  ;;  %v9984_v54 = vld [vmem:[%s11004_s30 + $0x544] sm:$0xf]  ;;  %v7665_v57 = vor.u32 %v10052_v34, %v7662_v37  ;;  %v11607_v34 = vpop.f32.mrf.mxu2 }
 0x128   : > { %5485 = vmatpush.bf16.msrb.mxu2 %v7553_v24  ;;  %v7390_v59 = vld [vmem:[%s11004_s30 + $0x550] sm:$0xf0]  ;;  %v10016_v61 = vld [vmem:[%s11004_s30 + $0x644] sm:$0xf]  ;;  %v7265_v5 = vor.u32 %v9952_v52, %v7262_v53  ;;  %v11612_v52 = vpop.f32.mrf.mxu3 }
 0x129   : > { %5499 = vmatpush.bf16.msrb.mxu3 %v7681_v28  ;;  %v7518_v62 = vld [vmem:[%s11004_s30 + $0x650] sm:$0xf0]  ;;  %v10048_v0 = vld [vmem:[%s11004_s30 + $0x744] sm:$0xf]  ;;  %v7393_v6 = vor.u32 %v9984_v54, %v7390_v59 }
 0x12a   : > { %v7646_v2 = vld [vmem:[%s11004_s30 + $0x750] sm:$0xf0]  ;;  %5458 = vmatpush.bf16.msrb.mxu0 %v7281_v45  ;;  %v7521_v7 = vor.u32 %v10016_v61, %v7518_v62  ;;  %v9948_v8 = vld [vmem:[%s11004_s30 + $0x424] sm:$0xf] }
 0x12b   : > { %5472 = vmatpush.bf16.msrb.mxu1 %v7409_v49  ;;  %v7246_v12 = vld [vmem:[%s11004_s30 + $0x430] sm:$0xf0]  ;;  %v9980_v13 = vld [vmem:[%s11004_s30 + $0x524] sm:$0xf]  ;;  %v7649_v16 = vor.u32 %v10048_v0, %v7646_v2  ;;  %v11620_v2 = vpop.f32.mrf.mxu0 }
 0x12c   : > { %5486 = vmatpush.bf16.msrb.mxu2 %v7537_v50  ;;  %v7374_v18 = vld [vmem:[%s11004_s30 + $0x530] sm:$0xf0]  ;;  %v10012_v20 = vld [vmem:[%s11004_s30 + $0x624] sm:$0xf]  ;;  %v7249_v24 = vor.u32 %v9948_v8, %v7246_v12  ;;  %v11624_v12 = vpop.f32.mrf.mxu1 }
 0x12d   : > { %5500 = vmatpush.bf16.msrb.mxu3 %v7665_v57  ;;  %v7502_v21 = vld [vmem:[%s11004_s30 + $0x630] sm:$0xf0]  ;;  %v10044_v22 = vld [vmem:[%s11004_s30 + $0x724] sm:$0xf]  ;;  %v7377_v27 = vor.u32 %v9980_v13, %v7374_v18 }
 0x12e   : > { %v7630_v23 = vld [vmem:[%s11004_s30 + $0x730] sm:$0xf0]  ;;  %5459 = vmatpush.bf16.msrb.mxu0 %v7265_v5  ;;  %v9944_v25 = vld [vmem:[%s11004_s30 + $0x404] sm:$0xf]  ;;  %v7505_v28 = vor.u32 %v10012_v20, %v7502_v21 }
 0x12f   : > { %v7230_v26 = vld [vmem:[%s11004_s30 + $0x410] sm:$0xf0]  ;;  %5473 = vmatpush.bf16.msrb.mxu1 %v7393_v6  ;;  %v9976_v29 = vld [vmem:[%s11004_s30 + $0x504] sm:$0xf]  ;;  %v7633_v37 = vor.u32 %v10044_v22, %v7630_v23 }
 0x130   : > { %5487 = vmatpush.bf16.msrb.mxu2 %v7521_v7  ;;  %v7358_v30 = vld [vmem:[%s11004_s30 + $0x510] sm:$0xf0]  ;;  %v10008_v33 = vld [vmem:[%s11004_s30 + $0x604] sm:$0xf]  ;;  %v7233_v59 = vor.u32 %v9944_v25, %v7230_v26 }
 0x131   : > { %5501 = vmatpush.bf16.msrb.mxu3 %v7649_v16  ;;  %v7486_v45 = vld [vmem:[%s11004_s30 + $0x610] sm:$0xf0]  ;;  %v10040_v49 = vld [vmem:[%s11004_s30 + $0x704] sm:$0xf]  ;;  %v7361_v5 = vor.u32 %v9976_v29, %v7358_v30 }
 0x132   : > { %v7614_v50 = vld [vmem:[%s11004_s30 + $0x710] sm:$0xf0]  ;;  %v10100_v53 = vld [vmem:[%s11004_s30 + $0x8e4] sm:$0xf]  ;;  %5460 = vmatpush.bf16.msrb.mxu0 %v7249_v24  ;;  %v7489_v6 = vor.u32 %v10008_v33, %v7486_v45 }
 0x133   : > { %v7854_v54 = vld [vmem:[%s11004_s30 + $0x8f0] sm:$0xf0]  ;;  %v10132_v57 = vld [vmem:[%s11004_s30 + $0x9e4] sm:$0xf]  ;;  %5474 = vmatpush.bf16.msrb.mxu1 %v7377_v27  ;;  %v7617_v13 = vor.u32 %v10040_v49, %v7614_v50 }
 0x134   : > { %v7982_v61 = vld [vmem:[%s11004_s30 + $0x9f0] sm:$0xf0]  ;;  %v10164_v62 = vld [vmem:[%s11004_s30 + $0xae4] sm:$0xf]  ;;  %5488 = vmatpush.bf16.msrb.mxu2 %v7505_v28  ;;  %v7857_v16 = vor.u32 %v10100_v53, %v7854_v54  ;;  %v11637_v53 = vpop.f32.mrf.mxu2 }
 0x135   : > { %v8110_v0 = vld [vmem:[%s11004_s30 + $0xaf0] sm:$0xf0]  ;;  %v10196_v7 = vld [vmem:[%s11004_s30 + $0xbe4] sm:$0xf]  ;;  %5502 = vmatpush.bf16.msrb.mxu3 %v7633_v37  ;;  %v7985_v18 = vor.u32 %v10132_v57, %v7982_v61 }
 0x136   : > { %v8238_v8 = vld [vmem:[%s11004_s30 + $0xbf0] sm:$0xf0]  ;;  %v8113_v20 = vor.u32 %v10164_v62, %v8110_v0  ;;  %v10096_v21 = vld [vmem:[%s11004_s30 + $0x8c4] sm:$0xf]  ;;  %5461 = vmatpush.bf16.msrb.mxu0 %v7233_v59  ;;  %v11643_v62 = vpop.f32.mrf.mxu3 }
 0x137   : > { %v7838_v22 = vld [vmem:[%s11004_s30 + $0x8d0] sm:$0xf0]  ;;  %v10128_v23 = vld [vmem:[%s11004_s30 + $0x9c4] sm:$0xf]  ;;  %v8241_v24 = vor.u32 %v10196_v7, %v8238_v8  ;;  %5475 = vmatpush.bf16.msrb.mxu1 %v7361_v5  ;;  %v11650_v7 = vpop.f32.mrf.mxu0 }
 0x138   : > { %v7966_v25 = vld [vmem:[%s11004_s30 + $0x9d0] sm:$0xf0]  ;;  %v10160_v26 = vld [vmem:[%s11004_s30 + $0xac4] sm:$0xf]  ;;  %5489 = vmatpush.bf16.msrb.mxu2 %v7489_v6  ;;  %v7841_v30 = vor.u32 %v10096_v21, %v7838_v22  ;;  %v11655_v21 = vpop.f32.mrf.mxu1 }
 0x139   : > { %v8094_v27 = vld [vmem:[%s11004_s30 + $0xad0] sm:$0xf0]  ;;  %v10192_v28 = vld [vmem:[%s11004_s30 + $0xbc4] sm:$0xf]  ;;  %5503 = vmatpush.bf16.msrb.mxu3 %v7617_v13  ;;  %v7969_v33 = vor.u32 %v10128_v23, %v7966_v25  ;;  %5462 = vmatmul.bf16.vlgmr.msrb.gmra.mxu0 %v11161_v39 }
 0x13a   : > { %v8222_v29 = vld [vmem:[%s11004_s30 + $0xbd0] sm:$0xf0]  ;;  %5510 = vmatpush.bf16.msra.mxu0 %v7857_v16  ;;  %v8097_v37 = vor.u32 %v10160_v26, %v8094_v27  ;;  %v10092_v45 = vld [vmem:[%s11004_s30 + $0x8a4] sm:$0xf]  ;;  %5476 = vmatmul.bf16.vlgmr.msrb.gmra.mxu1 %v11168_v44  ;;  %v5086_v26 = vadd.f32 %v11563_v11, %v11558_v3 }
 0x13b   : > { %5524 = vmatpush.bf16.msra.mxu1 %v7985_v18  ;;  %v7822_v49 = vld [vmem:[%s11004_s30 + $0x8b0] sm:$0xf0]  ;;  %v10124_v50 = vld [vmem:[%s11004_s30 + $0x9a4] sm:$0xf]  ;;  %v8225_v54 = vor.u32 %v10192_v28, %v8222_v29  ;;  %5490 = vmatmul.bf16.vlgmr.msrb.gmra.mxu2 %v11166_v43 }
 0x13c   : > { %5538 = vmatpush.bf16.msra.mxu2 %v8113_v20  ;;  %v7950_v57 = vld [vmem:[%s11004_s30 + $0x9b0] sm:$0xf0]  ;;  %v10156_v59 = vld [vmem:[%s11004_s30 + $0xaa4] sm:$0xf]  ;;  %5504 = vmatmul.bf16.vlgmr.msrb.gmra.mxu3 %v11172_v47  ;;  %v7825_v6 = vor.u32 %v10092_v45, %v7822_v49 }
 0x13d   : > { %5552 = vmatpush.bf16.msra.mxu3 %v8241_v24  ;;  %v8078_v61 = vld [vmem:[%s11004_s30 + $0xab0] sm:$0xf0]  ;;  %v10188_v0 = vld [vmem:[%s11004_s30 + $0xba4] sm:$0xf]  ;;  %v7953_v8 = vor.u32 %v10124_v50, %v7950_v57  ;;  %v5100_v57 = vadd.f32 %v11578_v42, %v5086_v26 }
 0x13e   : > { %v8206_v5 = vld [vmem:[%s11004_s30 + $0xbb0] sm:$0xf0]  ;;  %5511 = vmatpush.bf16.msra.mxu0 %v7841_v30  ;;  %v8081_v13 = vor.u32 %v10156_v59, %v8078_v61  ;;  %v10088_v16 = vld [vmem:[%s11004_s30 + $0x884] sm:$0xf] }
 0x13f   : > { %5525 = vmatpush.bf16.msra.mxu1 %v7969_v33  ;;  %v7806_v18 = vld [vmem:[%s11004_s30 + $0x890] sm:$0xf0]  ;;  %v10120_v20 = vld [vmem:[%s11004_s30 + $0x984] sm:$0xf]  ;;  %v8209_v22 = vor.u32 %v10188_v0, %v8206_v5  ;;  %v11673_v0 = vpop.f32.mrf.mxu2 }
 0x140   : > { %5539 = vmatpush.bf16.msra.mxu2 %v8097_v37  ;;  %v7934_v23 = vld [vmem:[%s11004_s30 + $0x990] sm:$0xf0]  ;;  %v10152_v24 = vld [vmem:[%s11004_s30 + $0xa84] sm:$0xf]  ;;  %v7809_v29 = vor.u32 %v10088_v16, %v7806_v18 }
 0x141   : > { %5553 = vmatpush.bf16.msra.mxu3 %v8225_v54  ;;  %v8062_v25 = vld [vmem:[%s11004_s30 + $0xa90] sm:$0xf0]  ;;  %v10184_v27 = vld [vmem:[%s11004_s30 + $0xb84] sm:$0xf]  ;;  %v7937_v30 = vor.u32 %v10120_v20, %v7934_v23 }
 0x142   : > { %v8190_v28 = vld [vmem:[%s11004_s30 + $0xb90] sm:$0xf0]  ;;  %5512 = vmatpush.bf16.msra.mxu0 %v7825_v6  ;;  %v8065_v33 = vor.u32 %v10152_v24, %v8062_v25  ;;  %v10084_v37 = vld [vmem:[%s11004_s30 + $0x864] sm:$0xf]  ;;  %v11675_v6 = vpop.f32.mrf.mxu3 }
 0x143   : > { %5526 = vmatpush.bf16.msra.mxu1 %v7953_v8  ;;  %v7790_v45 = vld [vmem:[%s11004_s30 + $0x870] sm:$0xf0]  ;;  %v10116_v49 = vld [vmem:[%s11004_s30 + $0x964] sm:$0xf]  ;;  %v8193_v50 = vor.u32 %v10184_v27, %v8190_v28  ;;  %v11677_v8 = vpop.f32.mrf.mxu0  ;;  %v5114_v27 = vadd.f32 %v11580_v48, %v5100_v57  ;;  %v5088_v48 = vadd.f32 %v11592_v4, %v11588_v63 }
 0x144   : > { %5540 = vmatpush.bf16.msra.mxu2 %v8081_v13  ;;  %v7918_v54 = vld [vmem:[%s11004_s30 + $0x970] sm:$0xf0]  ;;  %v10148_v3 = vld [vmem:[%s11004_s30 + $0xa64] sm:$0xf]  ;;  %v7793_v5 = vor.u32 %v10084_v37, %v7790_v45 }
 0x145   : > { %5554 = vmatpush.bf16.msra.mxu3 %v8209_v22  ;;  %v8046_v11 = vld [vmem:[%s11004_s30 + $0xa70] sm:$0xf0]  ;;  %v10180_v59 = vld [vmem:[%s11004_s30 + $0xb64] sm:$0xf]  ;;  %v7921_v13 = vor.u32 %v10116_v49, %v7918_v54  ;;  %v11682_v22 = vpop.f32.mrf.mxu1 }
 0x146   : > { %v8174_v61 = vld [vmem:[%s11004_s30 + $0xb70] sm:$0xf0]  ;;  %5513 = vmatpush.bf16.msra.mxu0 %v7809_v29  ;;  %v8049_v16 = vor.u32 %v10148_v3, %v8046_v11  ;;  %v10080_v42 = vld [vmem:[%s11004_s30 + $0x844] sm:$0xf] }
 0x147   : > { %5527 = vmatpush.bf16.msra.mxu1 %v7937_v30  ;;  %v7774_v18 = vld [vmem:[%s11004_s30 + $0x850] sm:$0xf0]  ;;  %v10112_v20 = vld [vmem:[%s11004_s30 + $0x944] sm:$0xf]  ;;  %v8177_v23 = vor.u32 %v10180_v59, %v8174_v61  ;;  %v5128_v59 = vadd.f32 %v11620_v2, %v5114_v27 }
 0x148   : > { %5541 = vmatpush.bf16.msra.mxu2 %v8065_v33  ;;  %v7902_v24 = vld [vmem:[%s11004_s30 + $0x950] sm:$0xf0]  ;;  %v10144_v25 = vld [vmem:[%s11004_s30 + $0xa44] sm:$0xf]  ;;  %v7777_v30 = vor.u32 %v10080_v42, %v7774_v18 }
 0x149   : > { %5555 = vmatpush.bf16.msra.mxu3 %v8193_v50  ;;  %v8030_v26 = vld [vmem:[%s11004_s30 + $0xa50] sm:$0xf0]  ;;  %v10176_v28 = vld [vmem:[%s11004_s30 + $0xb44] sm:$0xf]  ;;  %v7905_v33 = vor.u32 %v10112_v20, %v7902_v24 }
 0x14a   : > { %v8158_v29 = vld [vmem:[%s11004_s30 + $0xb50] sm:$0xf0]  ;;  %5514 = vmatpush.bf16.msra.mxu0 %v7793_v5  ;;  %v8033_v37 = vor.u32 %v10144_v25, %v8030_v26  ;;  %v10076_v45 = vld [vmem:[%s11004_s30 + $0x824] sm:$0xf]  ;;  %v11705_v42 = vpop.f32.mrf.mxu3  ;;  %v5102_v25 = vadd.f32 %v11607_v34, %v5088_v48 }
 0x14b   : > { %5528 = vmatpush.bf16.msra.mxu1 %v7921_v13  ;;  %v7758_v49 = vld [vmem:[%s11004_s30 + $0x830] sm:$0xf0]  ;;  %v10108_v50 = vld [vmem:[%s11004_s30 + $0x924] sm:$0xf]  ;;  %v8161_v54 = vor.u32 %v10176_v28, %v8158_v29  ;;  %v11701_v13 = vpop.f32.mrf.mxu2 }
 0x14c   : > { %5542 = vmatpush.bf16.msra.mxu2 %v8049_v16  ;;  %v7886_v3 = vld [vmem:[%s11004_s30 + $0x930] sm:$0xf0]  ;;  %v10140_v11 = vld [vmem:[%s11004_s30 + $0xa24] sm:$0xf]  ;;  %v7761_v16 = vor.u32 %v10076_v45, %v7758_v49 }
 0x14d   : > { %5556 = vmatpush.bf16.msra.mxu3 %v8177_v23  ;;  %v8014_v57 = vld [vmem:[%s11004_s30 + $0xa30] sm:$0xf0]  ;;  %v10172_v61 = vld [vmem:[%s11004_s30 + $0xb24] sm:$0xf]  ;;  %v7889_v18 = vor.u32 %v10108_v50, %v7886_v3  ;;  %v11720_v50 = vpop.f32.mrf.mxu1 }
 0x14e   : > { %v8142_v5 = vld [vmem:[%s11004_s30 + $0xb30] sm:$0xf0]  ;;  %5515 = vmatpush.bf16.msra.mxu0 %v7777_v30  ;;  %v10072_v63 = vld [vmem:[%s11004_s30 + $0x804] sm:$0xf]  ;;  %v8017_v2 = vor.u32 %v10140_v11, %v8014_v57  ;;  %v5142_v30 = vadd.f32 %v11624_v12, %v5128_v59 }
 0x14f   : > { %v7742_v4 = vld [vmem:[%s11004_s30 + $0x810] sm:$0xf0]  ;;  %5529 = vmatpush.bf16.msra.mxu1 %v7905_v33  ;;  %v10104_v20 = vld [vmem:[%s11004_s30 + $0x904] sm:$0xf]  ;;  %v8145_v26 = vor.u32 %v10172_v61, %v8142_v5  ;;  %v11715_v33 = vpop.f32.mrf.mxu0  ;;  %v5116_v61 = vadd.f32 %v11612_v52, %v5102_v25 }
 0x150   : > { %5543 = vmatpush.bf16.msra.mxu2 %v8033_v37  ;;  %v7870_v23 = vld [vmem:[%s11004_s30 + $0x910] sm:$0xf0]  ;;  %v10136_v24 = vld [vmem:[%s11004_s30 + $0xa04] sm:$0xf]  ;;  %v7745_v3 = vor.u32 %v10072_v63, %v7742_v4  ;;  %v5156_v63 = vadd.f32 %v11637_v53, %v5142_v30 }
 0x151   : > { %5557 = vmatpush.bf16.msra.mxu3 %v8161_v54  ;;  %v7998_v27 = vld [vmem:[%s11004_s30 + $0xa10] sm:$0xf0]  ;;  %v10168_v28 = vld [vmem:[%s11004_s30 + $0xb04] sm:$0xf]  ;;  %v7873_v11 = vor.u32 %v10104_v20, %v7870_v23  ;;  %v5130_v23 = vadd.f32 %v11650_v7, %v5116_v61 }
 0x152   : > { %v8126_v29 = vld [vmem:[%s11004_s30 + $0xb10] sm:$0xf0]  ;;  %v10228_v37 = vld [vmem:[%s11004_s30 + $0xce4] sm:$0xf]  ;;  %5516 = vmatpush.bf16.msra.mxu0 %v7761_v16  ;;  %v8001_v12 = vor.u32 %v10136_v24, %v7998_v27  ;;  %v5170_v7 = vadd.f32 %v11643_v62, %v5156_v63 }
 0x153   : > { %v8366_v45 = vld [vmem:[%s11004_s30 + $0xcf0] sm:$0xf0]  ;;  %v10260_v49 = vld [vmem:[%s11004_s30 + $0xde4] sm:$0xf]  ;;  %5530 = vmatpush.bf16.msra.mxu1 %v7889_v18  ;;  %v8129_v5 = vor.u32 %v10168_v28, %v8126_v29  ;;  %v11738_v53 = vpop.f32.mrf.mxu2  ;;  %v11741_v28 = vpop.f32.mrf.mxu3 }
 0x154   : > { %v8494_v34 = vld [vmem:[%s11004_s30 + $0xdf0] sm:$0xf0]  ;;  %v10292_v48 = vld [vmem:[%s11004_s30 + $0xee4] sm:$0xf]  ;;  %5544 = vmatpush.bf16.msra.mxu2 %v8017_v2  ;;  %v8369_v16 = vor.u32 %v10228_v37, %v8366_v45 }
 0x155   : > { %v8622_v54 = vld [vmem:[%s11004_s30 + $0xef0] sm:$0xf0]  ;;  %v10324_v57 = vld [vmem:[%s11004_s30 + $0xfe4] sm:$0xf]  ;;  %5558 = vmatpush.bf16.msra.mxu3 %v8145_v26  ;;  %v8497_v4 = vor.u32 %v10260_v49, %v8494_v34  ;;  %v5144_v34 = vadd.f32 %v11655_v21, %v5130_v23 }
 0x156   : > { %v8750_v59 = vld [vmem:[%s11004_s30 + $0xff0] sm:$0xf0]  ;;  %v8625_v47 = vor.u32 %v10292_v48, %v8622_v54  ;;  %v10224_v18 = vld [vmem:[%s11004_s30 + $0xcc4] sm:$0xf]  ;;  %5517 = vmatpush.bf16.msra.mxu0 %v7745_v3  ;;  %v11749_v48 = vpop.f32.mrf.mxu1 }
 0x157   : > { %v8350_v2 = vld [vmem:[%s11004_s30 + $0xcd0] sm:$0xf0]  ;;  %v10256_v20 = vld [vmem:[%s11004_s30 + $0xdc4] sm:$0xf]  ;;  %v8753_v24 = vor.u32 %v10324_v57, %v8750_v59  ;;  %5531 = vmatpush.bf16.msra.mxu1 %v7873_v11  ;;  %v11743_v29 = vpop.f32.mrf.mxu0 }
 0x158   : > { %v8478_v27 = vld [vmem:[%s11004_s30 + $0xdd0] sm:$0xf0]  ;;  %v10288_v44 = vld [vmem:[%s11004_s30 + $0xec4] sm:$0xf]  ;;  %5545 = vmatpush.bf16.msra.mxu2 %v8001_v12  ;;  %v8353_v26 = vor.u32 %v10224_v18, %v8350_v2  ;;  %v5158_v12 = vadd.f32 %v11673_v0, %v5144_v34 }
 0x159   : > { %v8606_v43 = vld [vmem:[%s11004_s30 + $0xed0] sm:$0xf0]  ;;  %v10320_v52 = vld [vmem:[%s11004_s30 + $0xfc4] sm:$0xf]  ;;  %5559 = vmatpush.bf16.msra.mxu3 %v8129_v5  ;;  %v8481_v30 = vor.u32 %v10256_v20, %v8478_v27  ;;  %5518 = vmatmul.bf16.vlgmr.msra.gmra.mxu0 %v11237_v31 }
 0x15a   : > { %v8734_v25 = vld [vmem:[%s11004_s30 + $0xfd0] sm:$0xf0]  ;;  %5566 = vmatpush.bf16.msrb.mxu0 %v8369_v16  ;;  %v8609_v37 = vor.u32 %v10288_v44, %v8606_v43  ;;  %v10220_v45 = vld [vmem:[%s11004_s30 + $0xca4] sm:$0xf]  ;;  %v5184_v43 = vadd.f32 %v11677_v8, %v5170_v7  ;;  %5532 = vmatmul.bf16.vlgmr.msra.gmra.mxu1 %v11244_v36 }
 0x15b   : > { %5580 = vmatpush.bf16.msrb.mxu1 %v8497_v4  ;;  %v8334_v49 = vld [vmem:[%s11004_s30 + $0xcb0] sm:$0xf0]  ;;  %v10252_v3 = vld [vmem:[%s11004_s30 + $0xda4] sm:$0xf]  ;;  %v8737_v62 = vor.u32 %v10320_v52, %v8734_v25  ;;  %5546 = vmatmul.bf16.vlgmr.msra.gmra.mxu2 %v11242_v35  ;;  %v11772_v27 = vpop.f32.mrf.mxu2 }
 0x15c   : > { %5594 = vmatpush.bf16.msrb.mxu2 %v8625_v47  ;;  %v8462_v54 = vld [vmem:[%s11004_s30 + $0xdb0] sm:$0xf0]  ;;  %v10284_v11 = vld [vmem:[%s11004_s30 + $0xea4] sm:$0xf]  ;;  %5560 = vmatmul.bf16.vlgmr.msra.gmra.mxu3 %v11248_v40  ;;  %v8337_v57 = vor.u32 %v10220_v45, %v8334_v49  ;;  %v5198_v2 = vadd.f32 %v11682_v22, %v5184_v43 }
 0x15d   : > { %5608 = vmatpush.bf16.msrb.mxu3 %v8753_v24  ;;  %v8590_v47 = vld [vmem:[%s11004_s30 + $0xeb0] sm:$0xf0]  ;;  %v10316_v44 = vld [vmem:[%s11004_s30 + $0xfa4] sm:$0xf]  ;;  %v8465_v8 = vor.u32 %v10252_v3, %v8462_v54  ;;  %v5172_v24 = vadd.f32 %v11675_v6, %v5158_v12 }
 0x15e   : > { %v8718_v21 = vld [vmem:[%s11004_s30 + $0xfb0] sm:$0xf0]  ;;  %5567 = vmatpush.bf16.msrb.mxu0 %v8353_v26  ;;  %v8593_v59 = vor.u32 %v10284_v11, %v8590_v47  ;;  %v10216_v61 = vld [vmem:[%s11004_s30 + $0xc84] sm:$0xf]  ;;  %v5212_v25 = vadd.f32 %v11701_v13, %v5198_v2  ;;  %v11775_v26 = vpop.f32.mrf.mxu3  ;;  %v11788_v47 = vpop.f32.mrf.mxu1 }
 0x15f   : > { %5581 = vmatpush.bf16.msrb.mxu1 %v8481_v30  ;;  %v8318_v5 = vld [vmem:[%s11004_s30 + $0xc90] sm:$0xf0]  ;;  %v10248_v16 = vld [vmem:[%s11004_s30 + $0xd84] sm:$0xf]  ;;  %v8721_v63 = vor.u32 %v10316_v44, %v8718_v21  ;;  %v5186_v45 = vadd.f32 %v11715_v33, %v5172_v24 }
 0x160   : > { %5595 = vmatpush.bf16.msrb.mxu2 %v8609_v37  ;;  %v8446_v4 = vld [vmem:[%s11004_s30 + $0xd90] sm:$0xf0]  ;;  %v10280_v18 = vld [vmem:[%s11004_s30 + $0xe84] sm:$0xf]  ;;  %v8321_v52 = vor.u32 %v10216_v61, %v8318_v5  ;;  %v5226_v33 = vadd.f32 %v11705_v42, %v5212_v25 }
 0x161   : > { %5609 = vmatpush.bf16.msrb.mxu3 %v8737_v62  ;;  %v8574_v0 = vld [vmem:[%s11004_s30 + $0xe90] sm:$0xf0]  ;;  %v10312_v20 = vld [vmem:[%s11004_s30 + $0xf84] sm:$0xf]  ;;  %v8449_v22 = vor.u32 %v10248_v16, %v8446_v4  ;;  %v11784_v62 = vpop.f32.mrf.mxu0 }
 0x162   : > { %v8702_v23 = vld [vmem:[%s11004_s30 + $0xf90] sm:$0xf0]  ;;  %5568 = vmatpush.bf16.msrb.mxu0 %v8337_v57  ;;  %v8577_v7 = vor.u32 %v10280_v18, %v8574_v0  ;;  %v10212_v30 = vld [vmem:[%s11004_s30 + $0xc64] sm:$0xf]  ;;  %v5240_v42 = vadd.f32 %v11743_v29, %v5226_v33 }
 0x163   : > { %5582 = vmatpush.bf16.msrb.mxu1 %v8465_v8  ;;  %v8302_v37 = vld [vmem:[%s11004_s30 + $0xc70] sm:$0xf0]  ;;  %v10244_v6 = vld [vmem:[%s11004_s30 + $0xd64] sm:$0xf]  ;;  %v8705_v49 = vor.u32 %v10312_v20, %v8702_v23  ;;  %v11805_v29 = vpop.f32.mrf.mxu2 }
 0x164   : > { %5596 = vmatpush.bf16.msrb.mxu2 %v8593_v59  ;;  %v8430_v3 = vld [vmem:[%s11004_s30 + $0xd70] sm:$0xf0]  ;;  %v10276_v13 = vld [vmem:[%s11004_s30 + $0xe64] sm:$0xf]  ;;  %v8305_v43 = vor.u32 %v10212_v30, %v8302_v37  ;;  %v5200_v59 = vadd.f32 %v11720_v50, %v5186_v45  ;;  %v5254_v30 = vadd.f32 %v11749_v48, %v5240_v42 }
 0x165   : > { %5610 = vmatpush.bf16.msrb.mxu3 %v8721_v63  ;;  %v8558_v34 = vld [vmem:[%s11004_s30 + $0xe70] sm:$0xf0]  ;;  %v10308_v54 = vld [vmem:[%s11004_s30 + $0xf64] sm:$0xf]  ;;  %v8433_v44 = vor.u32 %v10244_v6, %v8430_v3 }
 0x166   : > { %v8686_v11 = vld [vmem:[%s11004_s30 + $0xf70] sm:$0xf0]  ;;  %5569 = vmatpush.bf16.msrb.mxu0 %v8321_v52  ;;  %v8561_v21 = vor.u32 %v10276_v13, %v8558_v34  ;;  %v10208_v12 = vld [vmem:[%s11004_s30 + $0xc44] sm:$0xf]  ;;  %v5214_v0 = vadd.f32 %v11738_v53, %v5200_v59  ;;  %v11811_v37 = vpop.f32.mrf.mxu3  ;;  %v5309_v13 = vpop.f32.mrf.mxu1  ;;  %v5268_v48 = vadd.f32 %v11772_v27, %v5254_v30 }
 0x167   : > { %5583 = vmatpush.bf16.msrb.mxu1 %v8449_v22  ;;  %v8286_v57 = vld [vmem:[%s11004_s30 + $0xc50] sm:$0xf0]  ;;  %v10240_v8 = vld [vmem:[%s11004_s30 + $0xd44] sm:$0xf]  ;;  %v8689_v61 = vor.u32 %v10308_v54, %v8686_v11 }
 0x168   : > { %5597 = vmatpush.bf16.msrb.mxu2 %v8577_v7  ;;  %v8414_v5 = vld [vmem:[%s11004_s30 + $0xd50] sm:$0xf0]  ;;  %v10272_v16 = vld [vmem:[%s11004_s30 + $0xe44] sm:$0xf]  ;;  %v8289_v2 = vor.u32 %v10208_v12, %v8286_v57  ;;  %v5228_v3 = vadd.f32 %v11741_v28, %v5214_v0  ;;  %v5282_v0 = vadd.f32 %v11775_v26, %v5268_v48 }
 0x169   : > { %5611 = vmatpush.bf16.msrb.mxu3 %v8705_v49  ;;  %v8542_v63 = vld [vmem:[%s11004_s30 + $0xe50] sm:$0xf0]  ;;  %v10304_v4 = vld [vmem:[%s11004_s30 + $0xf44] sm:$0xf]  ;;  %v8417_v50 = vor.u32 %v10240_v8, %v8414_v5  ;;  %v5295_v6 = vpop.f32.mrf.mxu0 }
 0x16a   : > { %v8670_v18 = vld [vmem:[%s11004_s30 + $0xf50] sm:$0xf0]  ;;  %5570 = vmatpush.bf16.msrb.mxu0 %v8305_v43  ;;  %v8545_v20 = vor.u32 %v10272_v16, %v8542_v63  ;;  %v10204_v23 = vld [vmem:[%s11004_s30 + $0xc24] sm:$0xf]  ;;  %v5242_v27 = vadd.f32 %v11784_v62, %v5228_v3 }
 0x16b   : > { %5584 = vmatpush.bf16.msrb.mxu1 %v8433_v44  ;;  %v8270_v24 = vld [vmem:[%s11004_s30 + $0xc30] sm:$0xf0]  ;;  %v10236_v52 = vld [vmem:[%s11004_s30 + $0xd24] sm:$0xf]  ;;  %v8673_v25 = vor.u32 %v10304_v4, %v8670_v18 }
 0x16c   : > { %5598 = vmatpush.bf16.msrb.mxu2 %v8561_v21  ;;  %v8398_v22 = vld [vmem:[%s11004_s30 + $0xd30] sm:$0xf0]  ;;  %v10268_v7 = vld [vmem:[%s11004_s30 + $0xe24] sm:$0xf]  ;;  %v8273_v34 = vor.u32 %v10204_v23, %v8270_v24  ;;  %v5323_v23 = vpop.f32.mrf.mxu2 }
 0x16d   : > { %5612 = vmatpush.bf16.msrb.mxu3 %v8689_v61  ;;  %v8526_v53 = vld [vmem:[%s11004_s30 + $0xe30] sm:$0xf0]  ;;  %v10300_v45 = vld [vmem:[%s11004_s30 + $0xf24] sm:$0xf]  ;;  %v8401_v43 = vor.u32 %v10236_v52, %v8398_v22  ;;  %v5296_v22 = vadd.f32 %v5295_v6, %v5282_v0 }
 0x16e   : > { %v8654_v49 = vld [vmem:[%s11004_s30 + $0xf30] sm:$0xf0]  ;;  %5571 = vmatpush.bf16.msrb.mxu0 %v8289_v2  ;;  %v10200_v54 = vld [vmem:[%s11004_s30 + $0xc04] sm:$0xf]  ;;  %v8529_v33 = vor.u32 %v10268_v7, %v8526_v53  ;;  %v5337_v26 = vpop.f32.mrf.mxu3 }
 0x16f   : > { %v8254_v11 = vld [vmem:[%s11004_s30 + $0xc10] sm:$0xf0]  ;;  %5585 = vmatpush.bf16.msrb.mxu1 %v8417_v50  ;;  %v10232_v28 = vld [vmem:[%s11004_s30 + $0xd04] sm:$0xf]  ;;  %v8657_v12 = vor.u32 %v10300_v45, %v8654_v49 }
 0x170   : > { %5599 = vmatpush.bf16.msrb.mxu2 %v8545_v20  ;;  %v8382_v44 = vld [vmem:[%s11004_s30 + $0xd10] sm:$0xf0]  ;;  %v10264_v21 = vld [vmem:[%s11004_s30 + $0xe04] sm:$0xf]  ;;  %v8257_v63 = vor.u32 %v10200_v54, %v8254_v11 }
 0x171   : > { %5613 = vmatpush.bf16.msrb.mxu3 %v8673_v25  ;;  %v8510_v57 = vld [vmem:[%s11004_s30 + $0xe10] sm:$0xf0]  ;;  %v10296_v8 = vld [vmem:[%s11004_s30 + $0xf04] sm:$0xf]  ;;  %v8385_v2 = vor.u32 %v10232_v28, %v8382_v44  ;;  %v5256_v25 = vadd.f32 %v11788_v47, %v5242_v27  ;;  %v5310_v44 = vadd.f32 %v5309_v13, %v5296_v22 }
 0x172   : > { %v8638_v59 = vld [vmem:[%s11004_s30 + $0xf10] sm:$0xf0]  ;;  %v10356_v61 = vld [vmem:[%s11004_s30 + $0x10e4] sm:$0xf]  ;;  %5572 = vmatpush.bf16.msrb.mxu0 %v8273_v34  ;;  %v8513_v50 = vor.u32 %v10264_v21, %v8510_v57 }
 0x173   : > { %v8878_v5 = vld [vmem:[%s11004_s30 + $0x10f0] sm:$0xf0]  ;;  %v10388_v16 = vld [vmem:[%s11004_s30 + $0x11e4] sm:$0xf]  ;;  %5586 = vmatpush.bf16.msrb.mxu1 %v8401_v43  ;;  %v8641_v24 = vor.u32 %v10296_v8, %v8638_v59  ;;  %v5270_v48 = vadd.f32 %v11805_v29, %v5256_v25  ;;  %v5297_v43 = vpop.f32.mrf.mxu0 }
 0x174   : > { %v9006_v42 = vld [vmem:[%s11004_s30 + $0x11f0] sm:$0xf0]  ;;  %v10420_v4 = vld [vmem:[%s11004_s30 + $0x12e4] sm:$0xf]  ;;  %5600 = vmatpush.bf16.msrb.mxu2 %v8529_v33  ;;  %v8881_v52 = vor.u32 %v10356_v61, %v8878_v5  ;;  %v5311_v33 = vpop.f32.mrf.mxu1 }
 0x175   : > { %v9134_v18 = vld [vmem:[%s11004_s30 + $0x12f0] sm:$0xf0]  ;;  %v10452_v20 = vld [vmem:[%s11004_s30 + $0x13e4] sm:$0xf]  ;;  %5614 = vmatpush.bf16.msrb.mxu3 %v8657_v12  ;;  %v9009_v7 = vor.u32 %v10388_v16, %v9006_v42  ;;  %v5284_v13 = vadd.f32 %v11811_v37, %v5270_v48  ;;  %v5324_v16 = vadd.f32 %v5323_v23, %v5310_v44  ;;  %v5325_v23 = vpop.f32.mrf.mxu2 }
 0x176   : > { %v9262_v62 = vld [vmem:[%s11004_s30 + $0x13f0] sm:$0xf0]  ;;  %v9137_v53 = vor.u32 %v10420_v4, %v9134_v18  ;;  %v10352_v30 = vld [vmem:[%s11004_s30 + $0x10c4] sm:$0xf]  ;;  %5573 = vmatpush.bf16.msrb.mxu0 %v8257_v63 }
 0x177   : > { %v8862_v45 = vld [vmem:[%s11004_s30 + $0x10d0] sm:$0xf0]  ;;  %v10384_v49 = vld [vmem:[%s11004_s30 + $0x11c4] sm:$0xf]  ;;  %v9265_v3 = vor.u32 %v10452_v20, %v9262_v62  ;;  %5587 = vmatpush.bf16.msrb.mxu1 %v8385_v2  ;;  %v5298_v0 = vadd.f32 %v5297_v43, %v5284_v13  ;;  %v5338_v22 = vadd.f32 %v5337_v26, %v5324_v16 }
 0x178   : > { %v8990_v34 = vld [vmem:[%s11004_s30 + $0x11d0] sm:$0xf0]  ;;  %v10416_v54 = vld [vmem:[%s11004_s30 + $0x12c4] sm:$0xf]  ;;  %5601 = vmatpush.bf16.msrb.mxu2 %v8513_v50  ;;  %v8865_v28 = vor.u32 %v10352_v30, %v8862_v45 }
 0x179   : > { %v9118_v11 = vld [vmem:[%s11004_s30 + $0x12d0] sm:$0xf0]  ;;  %v10448_v47 = vld [vmem:[%s11004_s30 + $0x13c4] sm:$0xf]  ;;  %5615 = vmatpush.bf16.msrb.mxu3 %v8641_v24  ;;  %v8993_v21 = vor.u32 %v10384_v49, %v8990_v34  ;;  %5574 = vmatmul.bf16.vlgmr.msrb.gmra.mxu0 %v11313_v32 }
 0x17a   : > { %v9246_v6 = vld [vmem:[%s11004_s30 + $0x13d0] sm:$0xf0]  ;;  %5622 = vmatpush.bf16.msra.mxu0 %v8881_v52  ;;  %v9121_v29 = vor.u32 %v10416_v54, %v9118_v11  ;;  %v10348_v12 = vld [vmem:[%s11004_s30 + $0x10a4] sm:$0xf]  ;;  %5588 = vmatmul.bf16.vlgmr.msrb.gmra.mxu1 %v11320_v41  ;;  %v5312_v54 = vadd.f32 %v5311_v33, %v5298_v0 }
 0x17b   : > { %5636 = vmatpush.bf16.msra.mxu1 %v9009_v7  ;;  %v8846_v57 = vld [vmem:[%s11004_s30 + $0x10b0] sm:$0xf0]  ;;  %v10380_v8 = vld [vmem:[%s11004_s30 + $0x11a4] sm:$0xf]  ;;  %v9249_v59 = vor.u32 %v10448_v47, %v9246_v6  ;;  %5602 = vmatmul.bf16.vlgmr.msrb.gmra.mxu2 %v11318_v38  ;;  %v5339_v7 = vpop.f32.mrf.mxu3 }
 0x17c   : > { %5650 = vmatpush.bf16.msra.mxu2 %v9137_v53  ;;  %v8974_v27 = vld [vmem:[%s11004_s30 + $0x11b0] sm:$0xf0]  ;;  %v10412_v61 = vld [vmem:[%s11004_s30 + $0x12a4] sm:$0xf]  ;;  %5616 = vmatmul.bf16.vlgmr.msrb.gmra.mxu3 %v11324_v46  ;;  %v8849_v4 = vor.u32 %v10348_v12, %v8846_v57  ;;  %v5351_v53 = vpop.f32.mrf.mxu0  ;;  %v5365_v34 = vpop.f32.mrf.mxu1 }
 0x17d   : > { %5664 = vmatpush.bf16.msra.mxu3 %v9265_v3  ;;  %v9102_v5 = vld [vmem:[%s11004_s30 + $0x12b0] sm:$0xf0]  ;;  %v10444_v63 = vld [vmem:[%s11004_s30 + $0x13a4] sm:$0xf]  ;;  %v8977_v37 = vor.u32 %v10380_v8, %v8974_v27  ;;  %v5352_v11 = vadd.f32 %v5351_v53, %v5338_v22 }
 0x17e   : > { %v9230_v42 = vld [vmem:[%s11004_s30 + $0x13b0] sm:$0xf0]  ;;  %5623 = vmatpush.bf16.msra.mxu0 %v8865_v28  ;;  %v10344_v18 = vld [vmem:[%s11004_s30 + $0x1084] sm:$0xf]  ;;  %v9105_v2 = vor.u32 %v10412_v61, %v9102_v5 }
 0x17f   : > { %5637 = vmatpush.bf16.msra.mxu1 %v8993_v21  ;;  %v8830_v50 = vld [vmem:[%s11004_s30 + $0x1090] sm:$0xf0]  ;;  %v10376_v20 = vld [vmem:[%s11004_s30 + $0x1184] sm:$0xf]  ;;  %v9233_v24 = vor.u32 %v10444_v63, %v9230_v42  ;;  %v5366_v27 = vadd.f32 %v5365_v34, %v5352_v11 }
 0x180   : > { %5651 = vmatpush.bf16.msra.mxu2 %v9121_v29  ;;  %v8958_v62 = vld [vmem:[%s11004_s30 + $0x1190] sm:$0xf0]  ;;  %v10408_v52 = vld [vmem:[%s11004_s30 + $0x1284] sm:$0xf]  ;;  %v8833_v49 = vor.u32 %v10344_v18, %v8830_v50  ;;  %v5326_v29 = vadd.f32 %v5325_v23, %v5312_v54 }
 0x181   : > { %5665 = vmatpush.bf16.msra.mxu3 %v9249_v59  ;;  %v9086_v25 = vld [vmem:[%s11004_s30 + $0x1290] sm:$0xf0]  ;;  %v10440_v30 = vld [vmem:[%s11004_s30 + $0x1384] sm:$0xf]  ;;  %v8961_v3 = vor.u32 %v10376_v20, %v8958_v62 }
 0x182   : > { %v9214_v45 = vld [vmem:[%s11004_s30 + $0x1390] sm:$0xf0]  ;;  %5624 = vmatpush.bf16.msra.mxu0 %v8849_v4  ;;  %v9089_v26 = vor.u32 %v10408_v52, %v9086_v25  ;;  %v10340_v48 = vld [vmem:[%s11004_s30 + $0x1064] sm:$0xf]  ;;  %v5379_v4 = vpop.f32.mrf.mxu2 }
 0x183   : > { %5638 = vmatpush.bf16.msra.mxu1 %v8977_v37  ;;  %v8814_v43 = vld [vmem:[%s11004_s30 + $0x1070] sm:$0xf0]  ;;  %v10372_v47 = vld [vmem:[%s11004_s30 + $0x1164] sm:$0xf]  ;;  %v9217_v6 = vor.u32 %v10440_v30, %v9214_v45  ;;  %v5340_v37 = vadd.f32 %v5339_v7, %v5326_v29  ;;  %v5393_v20 = vpop.f32.mrf.mxu3 }
 0x184   : > { %5652 = vmatpush.bf16.msra.mxu2 %v9105_v2  ;;  %v8942_v28 = vld [vmem:[%s11004_s30 + $0x1170] sm:$0xf0]  ;;  %v10404_v44 = vld [vmem:[%s11004_s30 + $0x1264] sm:$0xf]  ;;  %v8817_v57 = vor.u32 %v10340_v48, %v8814_v43  ;;  %v5380_v2 = vadd.f32 %v5379_v4, %v5366_v27  ;;  %v5353_v50 = vpop.f32.mrf.mxu0  ;;  %v5367_v34 = vpop.f32.mrf.mxu1 }
 0x185   : > { %5666 = vmatpush.bf16.msra.mxu3 %v9233_v24  ;;  %v9070_v21 = vld [vmem:[%s11004_s30 + $0x1270] sm:$0xf0]  ;;  %v10436_v33 = vld [vmem:[%s11004_s30 + $0x1364] sm:$0xf]  ;;  %v8945_v61 = vor.u32 %v10372_v47, %v8942_v28  ;;  %v5354_v22 = vadd.f32 %v5353_v50, %v5340_v37 }
 0x186   : > { %v9198_v12 = vld [vmem:[%s11004_s30 + $0x1370] sm:$0xf0]  ;;  %5625 = vmatpush.bf16.msra.mxu0 %v8833_v49  ;;  %v11881_v8 = vld [vmem:[%s11878_s10] sm:$0xf]  ;;  %v9073_v5 = vor.u32 %v10404_v44, %v9070_v21  ;;  %v5394_v7 = vadd.f32 %v5393_v20, %v5380_v2 }
 0x187   : > { %v10336_v59 = vld [vmem:[%s11004_s30 + $0x1044] sm:$0xf]  ;;  %5639 = vmatpush.bf16.msra.mxu1 %v8961_v3  ;;  %v8798_v13 = vld [vmem:[%s11004_s30 + $0x1050] sm:$0xf0]  ;;  %v9201_v42 = vor.u32 %v10436_v33, %v9198_v12  ;;  %v6435_v62 = vperm.slane %v11881_v8, 0  ;;  %v5368_v21 = vadd.f32 %v5367_v34, %v5354_v22 }
 0x188   : > { %5653 = vmatpush.bf16.msra.mxu2 %v9089_v26  ;;  %v10368_v16 = vld [vmem:[%s11004_s30 + $0x1144] sm:$0xf]  ;;  %v8926_v63 = vld [vmem:[%s11004_s30 + $0x1150] sm:$0xf0]  ;;  %v8801_v52 = vor.u32 %v10336_v59, %v8798_v13 }
 0x189   : > { %5667 = vmatpush.bf16.msra.mxu3 %v9217_v6  ;;  %v10400_v18 = vld [vmem:[%s11004_s30 + $0x1244] sm:$0xf]  ;;  %v9054_v0 = vld [vmem:[%s11004_s30 + $0x1250] sm:$0xf0]  ;;  %v8929_v25 = vor.u32 %v10368_v16, %v8926_v63  ;;  %v6443_v48 = vadd.f32 %v6435_v62, %v5394_v7 }
 0x18a   : > { %v10432_v23 = vld [vmem:[%s11004_s30 + $0x1344] sm:$0xf]  ;;  %v9182_v24 = vld [vmem:[%s11004_s30 + $0x1350] sm:$0xf0]  ;;  %5626 = vmatpush.bf16.msra.mxu0 %v8817_v57  ;;  %v9057_v53 = vor.u32 %v10400_v18, %v9054_v0 }
 0x18b   : > { %5640 = vmatpush.bf16.msra.mxu1 %v8945_v61  ;;  %v10332_v30 = vld [vmem:[%s11004_s30 + $0x1024] sm:$0xf]  ;;  %v8782_v45 = vld [vmem:[%s11004_s30 + $0x1030] sm:$0xf0]  ;;  %v9185_v3 = vor.u32 %v10432_v23, %v9182_v24  ;;  %6451 = vst [vmem:[%s11906_s19] sm:$0xff] %v6443_v48  ;;  %v5381_v61 = vpop.f32.mrf.mxu2 }
 0x18c   : > { %5654 = vmatpush.bf16.msra.mxu2 %v9073_v5  ;;  %v10364_v49 = vld [vmem:[%s11004_s30 + $0x1124] sm:$0xf]  ;;  %v8910_v54 = vld [vmem:[%s11004_s30 + $0x1130] sm:$0xf0]  ;;  %v8785_v6 = vor.u32 %v10332_v30, %v8782_v45  ;;  %v5382_v63 = vadd.f32 %v5381_v61, %v5368_v21 }
 0x18d   : > { %5668 = vmatpush.bf16.msra.mxu3 %v9201_v42  ;;  %v10396_v11 = vld [vmem:[%s11004_s30 + $0x1224] sm:$0xf]  ;;  %v9038_v26 = vld [vmem:[%s11004_s30 + $0x1230] sm:$0xf0]  ;;  %v8913_v29 = vor.u32 %v10364_v49, %v8910_v54  ;;  %v5395_v42 = vpop.f32.mrf.mxu3 }
 0x18e   : > { %v10428_v43 = vld [vmem:[%s11004_s30 + $0x1324] sm:$0xf]  ;;  %v9166_v47 = vld [vmem:[%s11004_s30 + $0x1330] sm:$0xf0]  ;;  %5627 = vmatpush.bf16.msra.mxu0 %v8801_v52  ;;  %v9041_v33 = vor.u32 %v10396_v11, %v9038_v26  ;;  %v5396_v23 = vadd.f32 %v5395_v42, %v5382_v63 }
 0x18f   : > { %v10328_v28 = vld [vmem:[%s11004_s30 + $0x1004] sm:$0xf]  ;;  %v8766_v44 = vld [vmem:[%s11004_s30 + $0x1010] sm:$0xf0]  ;;  %5641 = vmatpush.bf16.msra.mxu1 %v8929_v25  ;;  %v9169_v27 = vor.u32 %v10428_v43, %v9166_v47 }
 0x190   : > { %5655 = vmatpush.bf16.msra.mxu2 %v9057_v53  ;;  %v10360_v12 = vld [vmem:[%s11004_s30 + $0x1104] sm:$0xf]  ;;  %v8894_v57 = vld [vmem:[%s11004_s30 + $0x1110] sm:$0xf0]  ;;  %v8769_v37 = vor.u32 %v10328_v28, %v8766_v44  ;;  %v6447_v30 = vadd.f32 %v6435_v62, %v5396_v23 }
 0x191   : > { %v10392_v59 = vld [vmem:[%s11004_s30 + $0x1204] sm:$0xf]  ;;  %5669 = vmatpush.bf16.msra.mxu3 %v9185_v3  ;;  %v9022_v5 = vld [vmem:[%s11004_s30 + $0x1210] sm:$0xf0]  ;;  %v8897_v24 = vor.u32 %v10360_v12, %v8894_v57 }
 0x192   : > { %v10424_v13 = vld [vmem:[%s11004_s30 + $0x1304] sm:$0xf]  ;;  %v9150_v16 = vld [vmem:[%s11004_s30 + $0x1310] sm:$0xf0]  ;;  %5628 = vmatpush.bf16.msra.mxu0 %v8785_v6  ;;  %v9025_v52 = vor.u32 %v10392_v59, %v9022_v5  ;;  %6455 = vst [vmem:[%s11906_s19 + $0x20] sm:$0xff] %v6447_v30 }
 0x193   : > { %v10484_v4 = vld [vmem:[%s11004_s30 + $0x14e4] sm:$0xf]  ;;  %v9390_v18 = vld [vmem:[%s11004_s30 + $0x14f0] sm:$0xf0]  ;;  %5642 = vmatpush.bf16.msra.mxu1 %v8913_v29  ;;  %v9153_v7 = vor.u32 %v10424_v13, %v9150_v16 }
 0x194   : > { %v10516_v0 = vld [vmem:[%s11004_s30 + $0x15e4] sm:$0xf]  ;;  %v9518_v2 = vld [vmem:[%s11004_s30 + $0x15f0] sm:$0xf0]  ;;  %5656 = vmatpush.bf16.msra.mxu2 %v9041_v33  ;;  %v9393_v53 = vor.u32 %v10484_v4, %v9390_v18 }
 0x195   : > { %v10548_v50 = vld [vmem:[%s11004_s30 + $0x16e4] sm:$0xf]  ;;  %v9646_v20 = vld [vmem:[%s11004_s30 + $0x16f0] sm:$0xf0]  ;;  %5670 = vmatpush.bf16.msra.mxu3 %v9169_v27  ;;  %v9521_v45 = vor.u32 %v10516_v0, %v9518_v2 }
 0x196   : > { %v10580_v25 = vld [vmem:[%s11004_s30 + $0x17e4] sm:$0xf]  ;;  %v9774_v22 = vld [vmem:[%s11004_s30 + $0x17f0] sm:$0xf0]  ;;  %v9649_v49 = vor.u32 %v10548_v50, %v9646_v20  ;;  %5629 = vmatpush.bf16.msra.mxu0 %v8769_v37 }
 0x197   : > { %v10480_v3 = vld [vmem:[%s11004_s30 + $0x14c4] sm:$0xf]  ;;  %v9374_v34 = vld [vmem:[%s11004_s30 + $0x14d0] sm:$0xf0]  ;;  %v9777_v11 = vor.u32 %v10580_v25, %v9774_v22  ;;  %5643 = vmatpush.bf16.msra.mxu1 %v8897_v24 }
 0x198   : > { %v10512_v54 = vld [vmem:[%s11004_s30 + $0x15c4] sm:$0xf]  ;;  %v9502_v26 = vld [vmem:[%s11004_s30 + $0x15d0] sm:$0xf0]  ;;  %5657 = vmatpush.bf16.msra.mxu2 %v9025_v52  ;;  %v9377_v47 = vor.u32 %v10480_v3, %v9374_v34 }
 0x199   : > { %v10544_v48 = vld [vmem:[%s11004_s30 + $0x16c4] sm:$0xf]  ;;  %v9630_v43 = vld [vmem:[%s11004_s30 + $0x16d0] sm:$0xf0]  ;;  %5671 = vmatpush.bf16.msra.mxu3 %v9153_v7  ;;  %v9505_v6 = vor.u32 %v10512_v54, %v9502_v26  ;;  %5630 = vmatmul.bf16.vlgmr.msra.gmra.mxu0 %v11389_v51 }
 0x19a   : > { %v10576_v8 = vld [vmem:[%s11004_s30 + $0x17c4] sm:$0xf]  ;;  %v9758_v62 = vld [vmem:[%s11004_s30 + $0x17d0] sm:$0xf0]  ;;  %5678 = vmatpush.bf16.msrb.mxu0 %v9393_v53  ;;  %v9633_v28 = vor.u32 %v10544_v48, %v9630_v43  ;;  %5644 = vmatmul.bf16.vlgmr.msra.gmra.mxu1 %v11396_v56 }
 0x19b   : > { %5692 = vmatpush.bf16.msrb.mxu1 %v9521_v45  ;;  %v10476_v44 = vld [vmem:[%s11004_s30 + $0x14a4] sm:$0xf]  ;;  %v9358_v21 = vld [vmem:[%s11004_s30 + $0x14b0] sm:$0xf0]  ;;  %v9761_v33 = vor.u32 %v10576_v8, %v9758_v62  ;;  %5658 = vmatmul.bf16.vlgmr.msra.gmra.mxu2 %v11394_v55 }
 0x19c   : > { %5706 = vmatpush.bf16.msrb.mxu2 %v9649_v49  ;;  %v10508_v29 = vld [vmem:[%s11004_s30 + $0x15a4] sm:$0xf]  ;;  %v9486_v12 = vld [vmem:[%s11004_s30 + $0x15b0] sm:$0xf0]  ;;  %5672 = vmatmul.bf16.vlgmr.msra.gmra.mxu3 %v11400_v60  ;;  %v9361_v5 = vor.u32 %v10476_v44, %v9358_v21 }
 0x19d   : > { %5720 = vmatpush.bf16.msrb.mxu3 %v9777_v11  ;;  %v10540_v57 = vld [vmem:[%s11004_s30 + $0x16a4] sm:$0xf]  ;;  %v9614_v59 = vld [vmem:[%s11004_s30 + $0x16b0] sm:$0xf0]  ;;  %v9489_v13 = vor.u32 %v10508_v29, %v9486_v12 }
 0x19e   : > { %v10572_v27 = vld [vmem:[%s11004_s30 + $0x17a4] sm:$0xf]  ;;  %v9742_v61 = vld [vmem:[%s11004_s30 + $0x17b0] sm:$0xf0]  ;;  %5679 = vmatpush.bf16.msrb.mxu0 %v9377_v47  ;;  %v9617_v16 = vor.u32 %v10540_v57, %v9614_v59 }
 0x19f   : > { %5693 = vmatpush.bf16.msrb.mxu1 %v9505_v6  ;;  %v10472_v63 = vld [vmem:[%s11004_s30 + $0x1484] sm:$0xf]  ;;  %v9342_v42 = vld [vmem:[%s11004_s30 + $0x1490] sm:$0xf0]  ;;  %v9745_v18 = vor.u32 %v10572_v27, %v9742_v61 }
 0x1a0   : > { %5707 = vmatpush.bf16.msrb.mxu2 %v9633_v28  ;;  %v10504_v4 = vld [vmem:[%s11004_s30 + $0x1584] sm:$0xf]  ;;  %v9470_v0 = vld [vmem:[%s11004_s30 + $0x1590] sm:$0xf0]  ;;  %v9345_v23 = vor.u32 %v10472_v63, %v9342_v42 }
 0x1a1   : > { %5721 = vmatpush.bf16.msrb.mxu3 %v9761_v33  ;;  %v10536_v37 = vld [vmem:[%s11004_s30 + $0x1684] sm:$0xf]  ;;  %v9598_v2 = vld [vmem:[%s11004_s30 + $0x1690] sm:$0xf0]  ;;  %v9473_v24 = vor.u32 %v10504_v4, %v9470_v0 }
 0x1a2   : > { %v10568_v50 = vld [vmem:[%s11004_s30 + $0x1784] sm:$0xf]  ;;  %v9726_v20 = vld [vmem:[%s11004_s30 + $0x1790] sm:$0xf0]  ;;  %5680 = vmatpush.bf16.msrb.mxu0 %v9361_v5  ;;  %v9601_v52 = vor.u32 %v10536_v37, %v9598_v2 }
 0x1a3   : > { %5694 = vmatpush.bf16.msrb.mxu1 %v9489_v13  ;;  %v10468_v25 = vld [vmem:[%s11004_s30 + $0x1464] sm:$0xf]  ;;  %v9326_v22 = vld [vmem:[%s11004_s30 + $0x1470] sm:$0xf0]  ;;  %v9729_v53 = vor.u32 %v10568_v50, %v9726_v20 }
 0x1a4   : > { %5708 = vmatpush.bf16.msrb.mxu2 %v9617_v16  ;;  %v10500_v7 = vld [vmem:[%s11004_s30 + $0x1564] sm:$0xf]  ;;  %v9454_v30 = vld [vmem:[%s11004_s30 + $0x1570] sm:$0xf0]  ;;  %v9329_v54 = vor.u32 %v10468_v25, %v9326_v22 }
 0x1a5   : > { %5722 = vmatpush.bf16.msrb.mxu3 %v9745_v18  ;;  %v10532_v45 = vld [vmem:[%s11004_s30 + $0x1664] sm:$0xf]  ;;  %v9582_v49 = vld [vmem:[%s11004_s30 + $0x1670] sm:$0xf0]  ;;  %v9457_v11 = vor.u32 %v10500_v7, %v9454_v30  ;;  %v6836_v7 = vld [vmem:[%s11004_s30 + $0xe8] sm:$0xf] }
 0x1a6   : > { %v10564_v3 = vld [vmem:[%s11004_s30 + $0x1764] sm:$0xf]  ;;  %v9710_v34 = vld [vmem:[%s11004_s30 + $0x1770] sm:$0xf0]  ;;  %5681 = vmatpush.bf16.msrb.mxu0 %v9345_v23  ;;  %v9585_v26 = vor.u32 %v10532_v45, %v9582_v49  ;;  %v6964_v30 = vld [vmem:[%s11004_s30 + $0x1e8] sm:$0xf] }
 0x1a7   : > { %5695 = vmatpush.bf16.msrb.mxu1 %v9473_v24  ;;  %v10464_v48 = vld [vmem:[%s11004_s30 + $0x1444] sm:$0xf]  ;;  %v9310_v43 = vld [vmem:[%s11004_s30 + $0x1450] sm:$0xf0]  ;;  %v9713_v62 = vor.u32 %v10564_v3, %v9710_v34  ;;  %v9879_v49 = vld [vmem:[%s11004_s30 + $0x1f4] sm:$0xf0] }
 0x1a8   : > { %5709 = vmatpush.bf16.msrb.mxu2 %v9601_v52  ;;  %v10496_v8 = vld [vmem:[%s11004_s30 + $0x1544] sm:$0xf]  ;;  %v9438_v47 = vld [vmem:[%s11004_s30 + $0x1550] sm:$0xf0]  ;;  %v9313_v29 = vor.u32 %v10464_v48, %v9310_v43  ;;  %v7092_v3 = vld [vmem:[%s11004_s30 + $0x2e8] sm:$0xf] }
 0x1a9   : > { %5723 = vmatpush.bf16.msrb.mxu3 %v9729_v53  ;;  %v10528_v6 = vld [vmem:[%s11004_s30 + $0x1644] sm:$0xf]  ;;  %v9566_v28 = vld [vmem:[%s11004_s30 + $0x1650] sm:$0xf0]  ;;  %v9441_v33 = vor.u32 %v10496_v8, %v9438_v47  ;;  %v9847_v53 = vld [vmem:[%s11004_s30 + $0xf4] sm:$0xf0] }
 0x1aa   : > { %v10560_v44 = vld [vmem:[%s11004_s30 + $0x1744] sm:$0xf]  ;;  %v9694_v21 = vld [vmem:[%s11004_s30 + $0x1750] sm:$0xf0]  ;;  %5682 = vmatpush.bf16.msrb.mxu0 %v9329_v54  ;;  %v9569_v12 = vor.u32 %v10528_v6, %v9566_v28  ;;  %v9911_v34 = vld [vmem:[%s11004_s30 + $0x2f4] sm:$0xf0]  ;;  %v6837_v8 = vor.u32 %v9847_v53, %v6836_v7 }
 0x1ab   : > { %5696 = vmatpush.bf16.msrb.mxu1 %v9457_v11  ;;  %v10460_v57 = vld [vmem:[%s11004_s30 + $0x1424] sm:$0xf]  ;;  %v9294_v59 = vld [vmem:[%s11004_s30 + $0x1430] sm:$0xf0]  ;;  %v9697_v61 = vor.u32 %v10560_v44, %v9694_v21  ;;  %v9943_v48 = vld [vmem:[%s11004_s30 + $0x3f4] sm:$0xf0]  ;;  %v7093_v47 = vor.u32 %v9911_v34, %v7092_v3 }
 0x1ac   : > { %5710 = vmatpush.bf16.msrb.mxu2 %v9585_v26  ;;  %v10492_v27 = vld [vmem:[%s11004_s30 + $0x1524] sm:$0xf]  ;;  %v9422_v5 = vld [vmem:[%s11004_s30 + $0x1530] sm:$0xf0]  ;;  %v9297_v4 = vor.u32 %v10460_v57, %v9294_v59  ;;  %v7220_v26 = vld [vmem:[%s11004_s30 + $0x3e8] sm:$0xf] }
 0x1ad   : > { %5724 = vmatpush.bf16.msrb.mxu3 %v9713_v62  ;;  %v10524_v13 = vld [vmem:[%s11004_s30 + $0x1624] sm:$0xf]  ;;  %v9550_v16 = vld [vmem:[%s11004_s30 + $0x1630] sm:$0xf0]  ;;  %v9425_v37 = vor.u32 %v10492_v27, %v9422_v5  ;;  %v6965_v62 = vor.u32 %v9879_v49, %v6964_v30  ;;  %v6820_v6 = vld [vmem:[%s11004_s30 + $0xc8] sm:$0xf]  ;;  %v7221_v21 = vor.u32 %v9943_v48, %v7220_v26 }
 0x1ae   : > { %v10556_v63 = vld [vmem:[%s11004_s30 + $0x1724] sm:$0xf]  ;;  %v9678_v42 = vld [vmem:[%s11004_s30 + $0x1730] sm:$0xf0]  ;;  %5683 = vmatpush.bf16.msrb.mxu0 %v9313_v29  ;;  %v9553_v2 = vor.u32 %v10524_v13, %v9550_v16  ;;  %v9843_v28 = vld [vmem:[%s11004_s30 + $0xd4] sm:$0xf0] }
 0x1af   : > { %v10456_v18 = vld [vmem:[%s11004_s30 + $0x1404] sm:$0xf]  ;;  %v9278_v0 = vld [vmem:[%s11004_s30 + $0x1410] sm:$0xf0]  ;;  %5697 = vmatpush.bf16.msrb.mxu1 %v9441_v33  ;;  %v9681_v24 = vor.u32 %v10556_v63, %v9678_v42  ;;  %v6948_v44 = vld [vmem:[%s11004_s30 + $0x1c8] sm:$0xf]  ;;  %v6821_v27 = vor.u32 %v9843_v28, %v6820_v6 }
 0x1b0   : > { %5711 = vmatpush.bf16.msrb.mxu2 %v9569_v12  ;;  %v10488_v50 = vld [vmem:[%s11004_s30 + $0x1504] sm:$0xf]  ;;  %v9406_v20 = vld [vmem:[%s11004_s30 + $0x1510] sm:$0xf0]  ;;  %v9281_v45 = vor.u32 %v10456_v18, %v9278_v0  ;;  %v9875_v29 = vld [vmem:[%s11004_s30 + $0x1d4] sm:$0xf0] }
 0x1b1   : > { %v10520_v23 = vld [vmem:[%s11004_s30 + $0x1604] sm:$0xf]  ;;  %5725 = vmatpush.bf16.msrb.mxu3 %v9697_v61  ;;  %v9534_v52 = vld [vmem:[%s11004_s30 + $0x1610] sm:$0xf0]  ;;  %v9409_v54 = vor.u32 %v10488_v50, %v9406_v20  ;;  %v7076_v33 = vld [vmem:[%s11004_s30 + $0x2c8] sm:$0xf]  ;;  %v6949_v61 = vor.u32 %v9875_v29, %v6948_v44 }
 0x1b2   : > { %v10552_v25 = vld [vmem:[%s11004_s30 + $0x1704] sm:$0xf]  ;;  %v9662_v22 = vld [vmem:[%s11004_s30 + $0x1710] sm:$0xf0]  ;;  %5684 = vmatpush.bf16.msrb.mxu0 %v9297_v4  ;;  %v9537_v11 = vor.u32 %v10520_v23, %v9534_v52  ;;  %v9907_v12 = vld [vmem:[%s11004_s30 + $0x2d4] sm:$0xf0] }
 0x1b3   : > { %5698 = vmatpush.bf16.msrb.mxu1 %v9425_v37  ;;  %v9665_v43 = vor.u32 %v10552_v25, %v9662_v22  ;;  %v7204_v57 = vld [vmem:[%s11004_s30 + $0x3c8] sm:$0xf]  ;;  %v9939_v59 = vld [vmem:[%s11004_s30 + $0x3d4] sm:$0xf0]  ;;  %v7077_v5 = vor.u32 %v9907_v12, %v7076_v33 }
 0x1b4   : > { %5712 = vmatpush.bf16.msrb.mxu2 %v9553_v2  ;;  %v6804_v13 = vld [vmem:[%s11004_s30 + $0xa8] sm:$0xf]  ;;  %v9839_v16 = vld [vmem:[%s11004_s30 + $0xb4] sm:$0xf0]  ;;  %v7205_v42 = vor.u32 %v9939_v59, %v7204_v57 }
 0x1b5   : > { %5726 = vmatpush.bf16.msrb.mxu3 %v9681_v24  ;;  %v6932_v63 = vld [vmem:[%s11004_s30 + $0x1a8] sm:$0xf]  ;;  %v9871_v4 = vld [vmem:[%s11004_s30 + $0x1b4] sm:$0xf0]  ;;  %v6805_v50 = vor.u32 %v9839_v16, %v6804_v13 }
 0x1b6   : > { %5685 = vmatpush.bf16.msrb.mxu0 %v9281_v45  ;;  %v7060_v18 = vld [vmem:[%s11004_s30 + $0x2a8] sm:$0xf]  ;;  %v9903_v0 = vld [vmem:[%s11004_s30 + $0x2b4] sm:$0xf0]  ;;  %v6933_v20 = vor.u32 %v9871_v4, %v6932_v63 }
 0x1b7   : > { %5699 = vmatpush.bf16.msrb.mxu1 %v9409_v54  ;;  %v7188_v37 = vld [vmem:[%s11004_s30 + $0x3a8] sm:$0xf]  ;;  %v9935_v2 = vld [vmem:[%s11004_s30 + $0x3b4] sm:$0xf0]  ;;  %v7061_v23 = vor.u32 %v9903_v0, %v7060_v18 }
 0x1b8   : > { %5713 = vmatpush.bf16.msrb.mxu2 %v9537_v11  ;;  %v6788_v24 = vld [vmem:[%s11004_s30 + $0x88] sm:$0xf]  ;;  %v9835_v52 = vld [vmem:[%s11004_s30 + $0x94] sm:$0xf0]  ;;  %v7189_v22 = vor.u32 %v9935_v2, %v7188_v37 }
 0x1b9   : > { %5727 = vmatpush.bf16.msrb.mxu3 %v9665_v43  ;;  %5686 = vmatmul.bf16.vlgmr.msrb.gmra.mxu0 %v11465_v9  ;;  %v6916_v25 = vld [vmem:[%s11004_s30 + $0x188] sm:$0xf]  ;;  %v9867_v7 = vld [vmem:[%s11004_s30 + $0x194] sm:$0xf0]  ;;  %v6789_v3 = vor.u32 %v9835_v52, %v6788_v24 }
 0x1ba   : > { %5734 = vmatpush.bf16.msra.mxu0 %v6837_v8  ;;  %5700 = vmatmul.bf16.vlgmr.msrb.gmra.mxu1 %v11472_v15  ;;  %v7044_v53 = vld [vmem:[%s11004_s30 + $0x288] sm:$0xf]  ;;  %v9899_v30 = vld [vmem:[%s11004_s30 + $0x294] sm:$0xf0]  ;;  %v6917_v34 = vor.u32 %v9867_v7, %v6916_v25 }
 0x1bb   : > { %5748 = vmatpush.bf16.msra.mxu1 %v6965_v62  ;;  %5714 = vmatmul.bf16.vlgmr.msrb.gmra.mxu2 %v11470_v14  ;;  %v7172_v45 = vld [vmem:[%s11004_s30 + $0x388] sm:$0xf]  ;;  %v9931_v49 = vld [vmem:[%s11004_s30 + $0x394] sm:$0xf0]  ;;  %v7045_v54 = vor.u32 %v9899_v30, %v7044_v53 }
 0x1bc   : > { %5762 = vmatpush.bf16.msra.mxu2 %v7093_v47  ;;  %5728 = vmatmul.bf16.vlgmr.msrb.gmra.mxu3 %v11476_v19  ;;  %v6772_v11 = vld [vmem:[%s11004_s30 + $0x68] sm:$0xf]  ;;  %v9831_v26 = vld [vmem:[%s11004_s30 + $0x74] sm:$0xf0]  ;;  %v7173_v43 = vor.u32 %v9931_v49, %v7172_v45 }
 0x1bd   : > { %5776 = vmatpush.bf16.msra.mxu3 %v7221_v21  ;;  %v6900_v48 = vld [vmem:[%s11004_s30 + $0x168] sm:$0xf]  ;;  %v9863_v8 = vld [vmem:[%s11004_s30 + $0x174] sm:$0xf0]  ;;  %v6773_v44 = vor.u32 %v9831_v26, %v6772_v11 }
 0x1be   : > { %5735 = vmatpush.bf16.msra.mxu0 %v6821_v27  ;;  %v7028_v62 = vld [vmem:[%s11004_s30 + $0x268] sm:$0xf]  ;;  %v9895_v47 = vld [vmem:[%s11004_s30 + $0x274] sm:$0xf0]  ;;  %v6901_v21 = vor.u32 %v9863_v8, %v6900_v48 }
 0x1bf   : > { %5749 = vmatpush.bf16.msra.mxu1 %v6949_v61  ;;  %v7156_v6 = vld [vmem:[%s11004_s30 + $0x368] sm:$0xf]  ;;  %v9927_v28 = vld [vmem:[%s11004_s30 + $0x374] sm:$0xf0]  ;;  %v7029_v29 = vor.u32 %v9895_v47, %v7028_v62 }
 0x1c0   : > { %5763 = vmatpush.bf16.msra.mxu2 %v7077_v5  ;;  %v6756_v33 = vld [vmem:[%s11004_s30 + $0x48] sm:$0xf]  ;;  %v9827_v12 = vld [vmem:[%s11004_s30 + $0x54] sm:$0xf0]  ;;  %v7157_v59 = vor.u32 %v9927_v28, %v7156_v6 }
 0x1c1   : > { %5777 = vmatpush.bf16.msra.mxu3 %v7205_v42  ;;  %v6884_v57 = vld [vmem:[%s11004_s30 + $0x148] sm:$0xf]  ;;  %v9859_v27 = vld [vmem:[%s11004_s30 + $0x154] sm:$0xf0]  ;;  %v6757_v63 = vor.u32 %v9827_v12, %v6756_v33 }
 0x1c2   : > { %5736 = vmatpush.bf16.msra.mxu0 %v6805_v50  ;;  %v7012_v61 = vld [vmem:[%s11004_s30 + $0x248] sm:$0xf]  ;;  %v9891_v5 = vld [vmem:[%s11004_s30 + $0x254] sm:$0xf0]  ;;  %v6885_v42 = vor.u32 %v9859_v27, %v6884_v57 }
 0x1c3   : > { %5750 = vmatpush.bf16.msra.mxu1 %v6933_v20  ;;  %v7140_v13 = vld [vmem:[%s11004_s30 + $0x348] sm:$0xf]  ;;  %v9923_v16 = vld [vmem:[%s11004_s30 + $0x354] sm:$0xf0]  ;;  %v7013_v4 = vor.u32 %v9891_v5, %v7012_v61 }
 0x1c4   : > { %5764 = vmatpush.bf16.msra.mxu2 %v7061_v23  ;;  %v6740_v18 = vld [vmem:[%s11004_s30 + $0x28] sm:$0xf]  ;;  %v9823_v0 = vld [vmem:[%s11004_s30 + $0x34] sm:$0xf0]  ;;  %v7141_v2 = vor.u32 %v9923_v16, %v7140_v13 }
 0x1c5   : > { %5778 = vmatpush.bf16.msra.mxu3 %v7189_v22  ;;  %v6868_v37 = vld [vmem:[%s11004_s30 + $0x128] sm:$0xf]  ;;  %v9855_v50 = vld [vmem:[%s11004_s30 + $0x134] sm:$0xf0]  ;;  %v6741_v25 = vor.u32 %v9823_v0, %v6740_v18 }
 0x1c6   : > { %5737 = vmatpush.bf16.msra.mxu0 %v6789_v3  ;;  %v6996_v20 = vld [vmem:[%s11004_s30 + $0x228] sm:$0xf]  ;;  %v9887_v23 = vld [vmem:[%s11004_s30 + $0x234] sm:$0xf0]  ;;  %v6869_v53 = vor.u32 %v9855_v50, %v6868_v37 }
 0x1c7   : > { %5751 = vmatpush.bf16.msra.mxu1 %v6917_v34  ;;  %v7124_v24 = vld [vmem:[%s11004_s30 + $0x328] sm:$0xf]  ;;  %v9919_v52 = vld [vmem:[%s11004_s30 + $0x334] sm:$0xf0]  ;;  %v6997_v30 = vor.u32 %v9887_v23, %v6996_v20 }
 0x1c8   : > { %5765 = vmatpush.bf16.msra.mxu2 %v7045_v54  ;;  %v6724_v22 = vld [vmem:[%s11004_s30 + $0x8] sm:$0xf]  ;;  %v9819_v7 = vld [vmem:[%s11004_s30 + $0x14] sm:$0xf0]  ;;  %v7125_v34 = vor.u32 %v9919_v52, %v7124_v24 }
 0x1c9   : > { %5779 = vmatpush.bf16.msra.mxu3 %v7173_v43  ;;  %v6852_v45 = vld [vmem:[%s11004_s30 + $0x108] sm:$0xf]  ;;  %v9851_v49 = vld [vmem:[%s11004_s30 + $0x114] sm:$0xf0]  ;;  %v6725_v62 = vor.u32 %v9819_v7, %v6724_v22 }
 0x1ca   : > { %5738 = vmatpush.bf16.msra.mxu0 %v6773_v44  ;;  %v6980_v3 = vld [vmem:[%s11004_s30 + $0x208] sm:$0xf]  ;;  %v9883_v54 = vld [vmem:[%s11004_s30 + $0x214] sm:$0xf0]  ;;  %v6853_v44 = vor.u32 %v9851_v49, %v6852_v45  ;;  %v12082_v49 = vpop.f32.mrf.mxu0 }
 0x1cb   : > { %5752 = vmatpush.bf16.msra.mxu1 %v6901_v21  ;;  %v7108_v11 = vld [vmem:[%s11004_s30 + $0x308] sm:$0xf]  ;;  %v9915_v26 = vld [vmem:[%s11004_s30 + $0x314] sm:$0xf0]  ;;  %v6981_v21 = vor.u32 %v9883_v54, %v6980_v3 }
 0x1cc   : > { %5766 = vmatpush.bf16.msra.mxu2 %v7029_v29  ;;  %v7348_v48 = vld [vmem:[%s11004_s30 + $0x4e8] sm:$0xf]  ;;  %v9975_v43 = vld [vmem:[%s11004_s30 + $0x4f4] sm:$0xf0]  ;;  %v7109_v12 = vor.u32 %v9915_v26, %v7108_v11 }
 0x1cd   : > { %5780 = vmatpush.bf16.msra.mxu3 %v7157_v59  ;;  %v7476_v8 = vld [vmem:[%s11004_s30 + $0x5e8] sm:$0xf]  ;;  %v10007_v47 = vld [vmem:[%s11004_s30 + $0x5f4] sm:$0xf0]  ;;  %v7349_v57 = vor.u32 %v9975_v43, %v7348_v48  ;;  %v12087_v48 = vpop.f32.mrf.mxu1 }
 0x1ce   : > { %5739 = vmatpush.bf16.msra.mxu0 %v6757_v63  ;;  %v7604_v6 = vld [vmem:[%s11004_s30 + $0x6e8] sm:$0xf]  ;;  %v10039_v28 = vld [vmem:[%s11004_s30 + $0x6f4] sm:$0xf0]  ;;  %v7477_v59 = vor.u32 %v10007_v47, %v7476_v8 }
 0x1cf   : > { %5753 = vmatpush.bf16.msra.mxu1 %v6885_v42  ;;  %v7732_v29 = vld [vmem:[%s11004_s30 + $0x7e8] sm:$0xf]  ;;  %v10071_v33 = vld [vmem:[%s11004_s30 + $0x7f4] sm:$0xf0]  ;;  %v7605_v27 = vor.u32 %v10039_v28, %v7604_v6 }
 0x1d0   : > { %5767 = vmatpush.bf16.msra.mxu2 %v7013_v4  ;;  %v7332_v61 = vld [vmem:[%s11004_s30 + $0x4c8] sm:$0xf]  ;;  %v9971_v5 = vld [vmem:[%s11004_s30 + $0x4d4] sm:$0xf0]  ;;  %v7733_v16 = vor.u32 %v10071_v33, %v7732_v29 }
 0x1d1   : > { %5781 = vmatpush.bf16.msra.mxu3 %v7141_v2  ;;  %v7460_v13 = vld [vmem:[%s11004_s30 + $0x5c8] sm:$0xf]  ;;  %v10003_v63 = vld [vmem:[%s11004_s30 + $0x5d4] sm:$0xf0]  ;;  %v7333_v37 = vor.u32 %v9971_v5, %v7332_v61 }
 0x1d2   : > { %5740 = vmatpush.bf16.msra.mxu0 %v6741_v25  ;;  %v7588_v42 = vld [vmem:[%s11004_s30 + $0x6c8] sm:$0xf]  ;;  %v10035_v4 = vld [vmem:[%s11004_s30 + $0x6d4] sm:$0xf0]  ;;  %v7461_v2 = vor.u32 %v10003_v63, %v7460_v13  ;;  %v12102_v63 = vpop.f32.mrf.mxu2 }
 0x1d3   : > { %5754 = vmatpush.bf16.msra.mxu1 %v6869_v53  ;;  %v7716_v18 = vld [vmem:[%s11004_s30 + $0x7c8] sm:$0xf]  ;;  %v10067_v0 = vld [vmem:[%s11004_s30 + $0x7d4] sm:$0xf0]  ;;  %v7589_v50 = vor.u32 %v10035_v4, %v7588_v42  ;;  %v12104_v4 = vpop.f32.mrf.mxu3 }
 0x1d4   : > { %5768 = vmatpush.bf16.msra.mxu2 %v6997_v30  ;;  %v7316_v20 = vld [vmem:[%s11004_s30 + $0x4a8] sm:$0xf]  ;;  %v9967_v23 = vld [vmem:[%s11004_s30 + $0x4b4] sm:$0xf0]  ;;  %v7717_v52 = vor.u32 %v10067_v0, %v7716_v18 }
 0x1d5   : > { %5782 = vmatpush.bf16.msra.mxu3 %v7125_v34  ;;  %v7444_v24 = vld [vmem:[%s11004_s30 + $0x5a8] sm:$0xf]  ;;  %v9999_v25 = vld [vmem:[%s11004_s30 + $0x5b4] sm:$0xf0]  ;;  %v7317_v45 = vor.u32 %v9967_v23, %v7316_v20 }
 0x1d6   : > { %5741 = vmatpush.bf16.msra.mxu0 %v6725_v62  ;;  %v7572_v22 = vld [vmem:[%s11004_s30 + $0x6a8] sm:$0xf]  ;;  %v10031_v7 = vld [vmem:[%s11004_s30 + $0x6b4] sm:$0xf0]  ;;  %v7445_v3 = vor.u32 %v9999_v25, %v7444_v24  ;;  %v12112_v25 = vpop.f32.mrf.mxu0 }
 0x1d7   : > { %5755 = vmatpush.bf16.msra.mxu1 %v6853_v44  ;;  %v7700_v53 = vld [vmem:[%s11004_s30 + $0x7a8] sm:$0xf]  ;;  %v10063_v30 = vld [vmem:[%s11004_s30 + $0x7b4] sm:$0xf0]  ;;  %v7573_v34 = vor.u32 %v10031_v7, %v7572_v22 }
 0x1d8   : > { %5769 = vmatpush.bf16.msra.mxu2 %v6981_v21  ;;  %v7300_v54 = vld [vmem:[%s11004_s30 + $0x488] sm:$0xf]  ;;  %v9963_v11 = vld [vmem:[%s11004_s30 + $0x494] sm:$0xf0]  ;;  %v7701_v43 = vor.u32 %v10063_v30, %v7700_v53  ;;  %v12116_v53 = vpop.f32.mrf.mxu1 }
 0x1d9   : > { %5783 = vmatpush.bf16.msra.mxu3 %v7109_v12  ;;  %5742 = vmatmul.bf16.vlgmr.msra.gmra.mxu0 %v11092_v58  ;;  %v7428_v26 = vld [vmem:[%s11004_s30 + $0x588] sm:$0xf]  ;;  %v9995_v8 = vld [vmem:[%s11004_s30 + $0x594] sm:$0xf0]  ;;  %v7301_v44 = vor.u32 %v9963_v11, %v7300_v54 }
 0x1da   : > { %5790 = vmatpush.bf16.msrb.mxu0 %v7349_v57  ;;  %5756 = vmatmul.bf16.vlgmr.msra.gmra.mxu1 %v11104_v10  ;;  %v7556_v62 = vld [vmem:[%s11004_s30 + $0x688] sm:$0xf]  ;;  %v10027_v47 = vld [vmem:[%s11004_s30 + $0x694] sm:$0xf0]  ;;  %v7429_v21 = vor.u32 %v9995_v8, %v7428_v26 }
 0x1db   : > { %5804 = vmatpush.bf16.msrb.mxu1 %v7477_v59  ;;  %5770 = vmatmul.bf16.vlgmr.msra.gmra.mxu2 %v11097_v1  ;;  %v7684_v6 = vld [vmem:[%s11004_s30 + $0x788] sm:$0xf]  ;;  %v10059_v28 = vld [vmem:[%s11004_s30 + $0x794] sm:$0xf0]  ;;  %v7557_v29 = vor.u32 %v10027_v47, %v7556_v62 }
 0x1dc   : > { %5818 = vmatpush.bf16.msrb.mxu2 %v7605_v27  ;;  %5784 = vmatmul.bf16.vlgmr.msra.gmra.mxu3 %v11109_v17  ;;  %v7284_v33 = vld [vmem:[%s11004_s30 + $0x468] sm:$0xf]  ;;  %v9959_v12 = vld [vmem:[%s11004_s30 + $0x474] sm:$0xf0]  ;;  %v7685_v59 = vor.u32 %v10059_v28, %v7684_v6 }
 0x1dd   : > { %5832 = vmatpush.bf16.msrb.mxu3 %v7733_v16  ;;  %v7412_v57 = vld [vmem:[%s11004_s30 + $0x568] sm:$0xf]  ;;  %v9991_v27 = vld [vmem:[%s11004_s30 + $0x574] sm:$0xf0]  ;;  %v7285_v42 = vor.u32 %v9959_v12, %v7284_v33 }
 0x1de   : > { %5791 = vmatpush.bf16.msrb.mxu0 %v7333_v37  ;;  %v7540_v61 = vld [vmem:[%s11004_s30 + $0x668] sm:$0xf]  ;;  %v10023_v5 = vld [vmem:[%s11004_s30 + $0x674] sm:$0xf0]  ;;  %v7413_v18 = vor.u32 %v9991_v27, %v7412_v57  ;;  %v12131_v27 = vpop.f32.mrf.mxu2 }
 0x1df   : > { %5805 = vmatpush.bf16.msrb.mxu1 %v7461_v2  ;;  %v7668_v13 = vld [vmem:[%s11004_s30 + $0x768] sm:$0xf]  ;;  %v10055_v16 = vld [vmem:[%s11004_s30 + $0x774] sm:$0xf0]  ;;  %v7541_v0 = vor.u32 %v10023_v5, %v7540_v61 }
 0x1e0   : > { %5819 = vmatpush.bf16.msrb.mxu2 %v7589_v50  ;;  %v7268_v37 = vld [vmem:[%s11004_s30 + $0x448] sm:$0xf]  ;;  %v9955_v2 = vld [vmem:[%s11004_s30 + $0x454] sm:$0xf0]  ;;  %v7669_v20 = vor.u32 %v10055_v16, %v7668_v13 }
 0x1e1   : > { %5833 = vmatpush.bf16.msrb.mxu3 %v7717_v52  ;;  %v7396_v50 = vld [vmem:[%s11004_s30 + $0x548] sm:$0xf]  ;;  %v9987_v23 = vld [vmem:[%s11004_s30 + $0x554] sm:$0xf0]  ;;  %v7269_v30 = vor.u32 %v9955_v2, %v7268_v37 }
 0x1e2   : > { %5792 = vmatpush.bf16.msrb.mxu0 %v7317_v45  ;;  %v7524_v24 = vld [vmem:[%s11004_s30 + $0x648] sm:$0xf]  ;;  %v10019_v52 = vld [vmem:[%s11004_s30 + $0x654] sm:$0xf0]  ;;  %v7397_v45 = vor.u32 %v9987_v23, %v7396_v50 }
 0x1e3   : > { %5806 = vmatpush.bf16.msrb.mxu1 %v7445_v3  ;;  %v7652_v22 = vld [vmem:[%s11004_s30 + $0x748] sm:$0xf]  ;;  %v10051_v7 = vld [vmem:[%s11004_s30 + $0x754] sm:$0xf0]  ;;  %v7525_v3 = vor.u32 %v10019_v52, %v7524_v24  ;;  %v12144_v24 = vpop.f32.mrf.mxu0 }
 0x1e4   : > { %5820 = vmatpush.bf16.msrb.mxu2 %v7573_v34  ;;  %v7252_v34 = vld [vmem:[%s11004_s30 + $0x428] sm:$0xf]  ;;  %v9951_v54 = vld [vmem:[%s11004_s30 + $0x434] sm:$0xf0]  ;;  %v7653_v26 = vor.u32 %v10051_v7, %v7652_v22 }
 0x1e5   : > { %5834 = vmatpush.bf16.msrb.mxu3 %v7701_v43  ;;  %v7380_v11 = vld [vmem:[%s11004_s30 + $0x528] sm:$0xf]  ;;  %v9983_v43 = vld [vmem:[%s11004_s30 + $0x534] sm:$0xf0]  ;;  %v7253_v28 = vor.u32 %v9951_v54, %v7252_v34 }
 0x1e6   : > { %5793 = vmatpush.bf16.msrb.mxu0 %v7301_v44  ;;  %v7508_v8 = vld [vmem:[%s11004_s30 + $0x628] sm:$0xf]  ;;  %v10015_v62 = vld [vmem:[%s11004_s30 + $0x634] sm:$0xf0] }
 0x1e7   : > { %5807 = vmatpush.bf16.msrb.mxu1 %v7429_v21  ;;  %v7636_v47 = vld [vmem:[%s11004_s30 + $0x728] sm:$0xf]  ;;  %v10047_v6 = vld [vmem:[%s11004_s30 + $0x734] sm:$0xf0]  ;;  %v7509_v33 = vor.u32 %v10015_v62, %v7508_v8 }
 0x1e8   : > { %5821 = vmatpush.bf16.msrb.mxu2 %v7557_v29  ;;  %v7236_v44 = vld [vmem:[%s11004_s30 + $0x408] sm:$0xf]  ;;  %v9947_v21 = vld [vmem:[%s11004_s30 + $0x414] sm:$0xf0]  ;;  %v7381_v29 = vor.u32 %v9983_v43, %v7380_v11  ;;  %v7637_v61 = vor.u32 %v10047_v6, %v7636_v47 }
 0x1e9   : > { %5835 = vmatpush.bf16.msrb.mxu3 %v7685_v59  ;;  %v7364_v12 = vld [vmem:[%s11004_s30 + $0x508] sm:$0xf]  ;;  %v9979_v57 = vld [vmem:[%s11004_s30 + $0x514] sm:$0xf0]  ;;  %v7237_v2 = vor.u32 %v9947_v21, %v7236_v44 }
 0x1ea   : > { %5794 = vmatpush.bf16.msrb.mxu0 %v7285_v42  ;;  %v7492_v59 = vld [vmem:[%s11004_s30 + $0x608] sm:$0xf]  ;;  %v10011_v5 = vld [vmem:[%s11004_s30 + $0x614] sm:$0xf0]  ;;  %v12136_v42 = vpop.f32.mrf.mxu3  ;;  %v7365_v52 = vor.u32 %v9979_v57, %v7364_v12 }
 0x1eb   : > { %5808 = vmatpush.bf16.msrb.mxu1 %v7413_v18  ;;  %v7620_v13 = vld [vmem:[%s11004_s30 + $0x708] sm:$0xf]  ;;  %v10043_v16 = vld [vmem:[%s11004_s30 + $0x714] sm:$0xf0]  ;;  %v7493_v22 = vor.u32 %v10011_v5, %v7492_v59  ;;  %v12161_v5 = vpop.f32.mrf.mxu2 }
 0x1ec   : > { %5822 = vmatpush.bf16.msrb.mxu2 %v7541_v0  ;;  %v7860_v18 = vld [vmem:[%s11004_s30 + $0x8e8] sm:$0xf]  ;;  %v10103_v0 = vld [vmem:[%s11004_s30 + $0x8f4] sm:$0xf0] }
 0x1ed   : > { %5836 = vmatpush.bf16.msrb.mxu3 %v7669_v20  ;;  %v7988_v37 = vld [vmem:[%s11004_s30 + $0x9e8] sm:$0xf]  ;;  %v10135_v50 = vld [vmem:[%s11004_s30 + $0x9f4] sm:$0xf0]  ;;  %v7861_v34 = vor.u32 %v10103_v0, %v7860_v18 }
 0x1ee   : > { %5795 = vmatpush.bf16.msrb.mxu0 %v7269_v30  ;;  %v8116_v20 = vld [vmem:[%s11004_s30 + $0xae8] sm:$0xf]  ;;  %v10167_v23 = vld [vmem:[%s11004_s30 + $0xaf4] sm:$0xf0]  ;;  %v7989_v54 = vor.u32 %v10135_v50, %v7988_v37  ;;  %v13075_v50 = vld [vmem:[#allocation14_spill] sm:$0xff] }
 0x1ef   : > { %5809 = vmatpush.bf16.msrb.mxu1 %v7397_v45  ;;  %v8244_v7 = vld [vmem:[%s11004_s30 + $0xbe8] sm:$0xf]  ;;  %v10199_v30 = vld [vmem:[%s11004_s30 + $0xbf4] sm:$0xf0]  ;;  %v12148_v45 = vpop.f32.mrf.mxu1  ;;  %v8117_v11 = vor.u32 %v10167_v23, %v8116_v20 }
 0x1f0   : > { %5823 = vmatpush.bf16.msrb.mxu2 %v7525_v3  ;;  %v7621_v3 = vor.u32 %v10043_v16, %v7620_v13  ;;  %v10099_v43 = vld [vmem:[%s11004_s30 + $0x8d4] sm:$0xf0]  ;;  %v7972_v8 = vld [vmem:[%s11004_s30 + $0x9c8] sm:$0xf]  ;;  %v8245_v62 = vor.u32 %v10199_v30, %v8244_v7  ;;  %v12174_v7 = vpop.f32.mrf.mxu0 }
 0x1f1   : > { %5837 = vmatpush.bf16.msrb.mxu3 %v7653_v26  ;;  %v7844_v26 = vld [vmem:[%s11004_s30 + $0x8c8] sm:$0xf]  ;;  %v10131_v47 = vld [vmem:[%s11004_s30 + $0x9d4] sm:$0xf0] }
 0x1f2   : > { %5796 = vmatpush.bf16.msrb.mxu0 %v7253_v28  ;;  %v8100_v6 = vld [vmem:[%s11004_s30 + $0xac8] sm:$0xf]  ;;  %v10163_v28 = vld [vmem:[%s11004_s30 + $0xad4] sm:$0xf0]  ;;  %v12167_v37 = vpop.f32.mrf.mxu3 }
 0x1f3   : > { %5810 = vmatpush.bf16.msrb.mxu1 %v7381_v29  ;;  %v8228_v44 = vld [vmem:[%s11004_s30 + $0xbc8] sm:$0xf]  ;;  %v10195_v21 = vld [vmem:[%s11004_s30 + $0xbd4] sm:$0xf0]  ;;  %v7845_v29 = vor.u32 %v10099_v43, %v7844_v26  ;;  %v8101_v12 = vor.u32 %v10163_v28, %v8100_v6  ;;  %v5422_v6 = vadd.f32 %v12087_v48, %v12082_v49 }
 0x1f4   : > { %5824 = vmatpush.bf16.msrb.mxu2 %v7509_v33  ;;  %v7973_v33 = vor.u32 %v10131_v47, %v7972_v8  ;;  %v7828_v57 = vld [vmem:[%s11004_s30 + $0x8a8] sm:$0xf]  ;;  %v10095_v59 = vld [vmem:[%s11004_s30 + $0x8b4] sm:$0xf0]  ;;  %v8229_v13 = vor.u32 %v10195_v21, %v8228_v44 }
 0x1f5   : > { %5838 = vmatpush.bf16.msrb.mxu3 %v7637_v61  ;;  %v7956_v61 = vld [vmem:[%s11004_s30 + $0x9a8] sm:$0xf]  ;;  %v10127_v16 = vld [vmem:[%s11004_s30 + $0x9b4] sm:$0xf0] }
 0x1f6   : > { %5797 = vmatpush.bf16.msrb.mxu0 %v7237_v2  ;;  %v8084_v18 = vld [vmem:[%s11004_s30 + $0xaa8] sm:$0xf]  ;;  %v10159_v0 = vld [vmem:[%s11004_s30 + $0xab4] sm:$0xf0]  ;;  %v7957_v30 = vor.u32 %v10127_v16, %v7956_v61  ;;  %v5436_v16 = vadd.f32 %v12102_v63, %v5422_v6 }
 0x1f7   : > { %5811 = vmatpush.bf16.msrb.mxu1 %v7365_v52  ;;  %v13074_v2 = vld [vmem:[#allocation13_spill] sm:$0xff]  ;;  %v10191_v23 = vld [vmem:[%s11004_s30 + $0xbb4] sm:$0xf0]  ;;  %v12179_v26 = vpop.f32.mrf.mxu1 }
 0x1f8   : > { %5825 = vmatpush.bf16.msrb.mxu2 %v7493_v22  ;;  %v8212_v20 = vld [vmem:[%s11004_s30 + $0xba8] sm:$0xf]  ;;  %v13076_v52 = vld [vmem:[#allocation15_spill] sm:$0xff]  ;;  %v7829_v22 = vor.u32 %v10095_v59, %v7828_v57 }
 0x1f9   : > { %5839 = vmatpush.bf16.msrb.mxu3 %v7621_v3  ;;  %5798 = vmatmul.bf16.vlgmr.msrb.gmra.mxu0 %v11161_v39  ;;  %v8085_v3 = vor.u32 %v10159_v0, %v8084_v18  ;;  %v8213_v43 = vor.u32 %v10191_v23, %v8212_v20  ;;  %v10123_v8 = vld [vmem:[%s11004_s30 + $0x994] sm:$0xf0]  ;;  %v8196_v28 = vld [vmem:[%s11004_s30 + $0xb88] sm:$0xf]  ;;  %v12197_v20 = vpop.f32.mrf.mxu2 }
 0x1fa   : > { %5846 = vmatpush.bf16.msra.mxu0 %v7861_v34  ;;  %5812 = vmatmul.bf16.vlgmr.msrb.gmra.mxu1 %v13075_v50  ;;  %v7812_v34 = vld [vmem:[%s11004_s30 + $0x888] sm:$0xf]  ;;  %v10155_v47 = vld [vmem:[%s11004_s30 + $0xa94] sm:$0xf0] }
 0x1fb   : > { %5860 = vmatpush.bf16.msra.mxu1 %v7989_v54  ;;  %5826 = vmatmul.bf16.vlgmr.msrb.gmra.mxu2 %v13074_v2  ;;  %v10091_v54 = vld [vmem:[%s11004_s30 + $0x894] sm:$0xf0]  ;;  %v7924_v59 = vld [vmem:[%s11004_s30 + $0x968] sm:$0xf] }
 0x1fc   : > { %5874 = vmatpush.bf16.msra.mxu2 %v8117_v11  ;;  %5840 = vmatmul.bf16.vlgmr.msrb.gmra.mxu3 %v13076_v52  ;;  %v7940_v11 = vld [vmem:[%s11004_s30 + $0x988] sm:$0xf]  ;;  %v10187_v44 = vld [vmem:[%s11004_s30 + $0xb94] sm:$0xf0]  ;;  %v7813_v21 = vor.u32 %v10091_v54, %v7812_v34 }
 0x1fd   : > { %5888 = vmatpush.bf16.msra.mxu3 %v8245_v62  ;;  %v8068_v62 = vld [vmem:[%s11004_s30 + $0xa88] sm:$0xf]  ;;  %v10087_v57 = vld [vmem:[%s11004_s30 + $0x874] sm:$0xf0]  ;;  %v8197_v61 = vor.u32 %v10187_v44, %v8196_v28  ;;  %v5450_v28 = vadd.f32 %v12104_v4, %v5436_v16  ;;  %v5424_v4 = vadd.f32 %v12116_v53, %v12112_v25 }
 0x1fe   : > { %5847 = vmatpush.bf16.msra.mxu0 %v7845_v29  ;;  %v7941_v29 = vor.u32 %v10123_v8, %v7940_v11  ;;  %v8052_v49 = vld [vmem:[%s11004_s30 + $0xa68] sm:$0xf]  ;;  %v10151_v48 = vld [vmem:[%s11004_s30 + $0xa74] sm:$0xf0] }
 0x1ff   : > { %5861 = vmatpush.bf16.msra.mxu1 %v7973_v33  ;;  %v8069_v33 = vor.u32 %v10155_v47, %v8068_v62  ;;  %v8180_v18 = vld [vmem:[%s11004_s30 + $0xb68] sm:$0xf]  ;;  %v10183_v0 = vld [vmem:[%s11004_s30 + $0xb74] sm:$0xf0]  ;;  %v8053_v34 = vor.u32 %v10151_v48, %v8052_v49 }
 0x200   : > { %5875 = vmatpush.bf16.msra.mxu2 %v8101_v12  ;;  %v7796_v12 = vld [vmem:[%s11004_s30 + $0x868] sm:$0xf]  ;;  %v10083_v54 = vld [vmem:[%s11004_s30 + $0x854] sm:$0xf0]  ;;  %v8181_v8 = vor.u32 %v10183_v0, %v8180_v18  ;;  %v5464_v18 = vadd.f32 %v12144_v24, %v5450_v28 }
 0x201   : > { %5889 = vmatpush.bf16.msra.mxu3 %v8229_v13  ;;  %v10119_v13 = vld [vmem:[%s11004_s30 + $0x974] sm:$0xf0]  ;;  %v7797_v23 = vor.u32 %v10087_v57, %v7796_v12  ;;  %v7780_v63 = vld [vmem:[%s11004_s30 + $0x848] sm:$0xf] }
 0x202   : > { %5848 = vmatpush.bf16.msra.mxu0 %v7829_v22  ;;  %v12199_v22 = vpop.f32.mrf.mxu3  ;;  %v7908_v11 = vld [vmem:[%s11004_s30 + $0x948] sm:$0xf]  ;;  %v10115_v62 = vld [vmem:[%s11004_s30 + $0x954] sm:$0xf0] }
 0x203   : > { %5862 = vmatpush.bf16.msra.mxu1 %v7957_v30  ;;  %v12201_v30 = vpop.f32.mrf.mxu0  ;;  %v8036_v47 = vld [vmem:[%s11004_s30 + $0xa48] sm:$0xf]  ;;  %v10147_v6 = vld [vmem:[%s11004_s30 + $0xa54] sm:$0xf0] }
 0x204   : > { %5876 = vmatpush.bf16.msra.mxu2 %v8085_v3  ;;  %v7925_v3 = vor.u32 %v10119_v13, %v7924_v59  ;;  %v8164_v44 = vld [vmem:[%s11004_s30 + $0xb48] sm:$0xf]  ;;  %v8037_v12 = vor.u32 %v10147_v6, %v8036_v47  ;;  %v10079_v59 = vld [vmem:[%s11004_s30 + $0x834] sm:$0xf0]  ;;  %v5438_v47 = vadd.f32 %v12131_v27, %v5424_v4 }
 0x205   : > { %5890 = vmatpush.bf16.msra.mxu3 %v8213_v43  ;;  %v12206_v43 = vpop.f32.mrf.mxu1  ;;  %v7764_v57 = vld [vmem:[%s11004_s30 + $0x828] sm:$0xf]  ;;  %v10111_v49 = vld [vmem:[%s11004_s30 + $0x934] sm:$0xf0] }
 0x206   : > { %5849 = vmatpush.bf16.msra.mxu0 %v7813_v21  ;;  %v10179_v21 = vld [vmem:[%s11004_s30 + $0xb54] sm:$0xf0]  ;;  %v8020_v48 = vld [vmem:[%s11004_s30 + $0xa28] sm:$0xf] }
 0x207   : > { %5863 = vmatpush.bf16.msra.mxu1 %v7941_v29  ;;  %v7781_v29 = vor.u32 %v10083_v54, %v7780_v63  ;;  %v8165_v13 = vor.u32 %v10179_v21, %v8164_v44  ;;  %v10143_v16 = vld [vmem:[%s11004_s30 + $0xa34] sm:$0xf0]  ;;  %v8148_v0 = vld [vmem:[%s11004_s30 + $0xb28] sm:$0xf] }
 0x208   : > { %5877 = vmatpush.bf16.msra.mxu2 %v8069_v33  ;;  %v7909_v33 = vor.u32 %v10115_v62, %v7908_v11  ;;  %v7748_v25 = vld [vmem:[%s11004_s30 + $0x808] sm:$0xf]  ;;  %v10075_v53 = vld [vmem:[%s11004_s30 + $0x814] sm:$0xf0]  ;;  %v8021_v24 = vor.u32 %v10143_v16, %v8020_v48 }
 0x209   : > { %5891 = vmatpush.bf16.msra.mxu3 %v8197_v61  ;;  %v7892_v61 = vld [vmem:[%s11004_s30 + $0x928] sm:$0xf]  ;;  %v10139_v28 = vld [vmem:[%s11004_s30 + $0xa14] sm:$0xf0] }
 0x20a   : > { %5850 = vmatpush.bf16.msra.mxu0 %v7797_v23  ;;  %v10175_v23 = vld [vmem:[%s11004_s30 + $0xb34] sm:$0xf0]  ;;  %v12229_v63 = vpop.f32.mrf.mxu3  ;;  %v7893_v54 = vor.u32 %v10111_v49, %v7892_v61  ;;  %v7876_v11 = vld [vmem:[%s11004_s30 + $0x908] sm:$0xf]  ;;  %v7749_v49 = vor.u32 %v10075_v53, %v7748_v25 }
 0x20b   : > { %5864 = vmatpush.bf16.msra.mxu1 %v7925_v3  ;;  %v12225_v3 = vpop.f32.mrf.mxu2  ;;  %v8004_v62 = vld [vmem:[%s11004_s30 + $0xa08] sm:$0xf]  ;;  %v8149_v6 = vor.u32 %v10175_v23, %v8148_v0  ;;  %v10171_v21 = vld [vmem:[%s11004_s30 + $0xb14] sm:$0xf0]  ;;  %v5452_v0 = vadd.f32 %v12136_v42, %v5438_v47 }
 0x20c   : > { %5878 = vmatpush.bf16.msra.mxu2 %v8053_v34  ;;  %v7765_v34 = vor.u32 %v10079_v59, %v7764_v57  ;;  %v8132_v44 = vld [vmem:[%s11004_s30 + $0xb08] sm:$0xf]  ;;  %v10231_v57 = vld [vmem:[%s11004_s30 + $0xcf4] sm:$0xf0] }
 0x20d   : > { %5892 = vmatpush.bf16.msra.mxu3 %v8181_v8  ;;  %v10107_v8 = vld [vmem:[%s11004_s30 + $0x914] sm:$0xf0]  ;;  %v8500_v59 = vld [vmem:[%s11004_s30 + $0xde8] sm:$0xf]  ;;  %v12244_v61 = vpop.f32.mrf.mxu1  ;;  %v8133_v23 = vor.u32 %v10171_v21, %v8132_v44 }
 0x20e   : > { %5851 = vmatpush.bf16.msra.mxu0 %v7781_v29  ;;  %v5478_v29 = vadd.f32 %v12148_v45, %v5464_v18  ;;  %v10263_v27 = vld [vmem:[%s11004_s30 + $0xdf4] sm:$0xf0]  ;;  %v8628_v4 = vld [vmem:[%s11004_s30 + $0xee8] sm:$0xf]  ;;  %v7877_v48 = vor.u32 %v10107_v8, %v7876_v11  ;;  %v8005_v45 = vor.u32 %v10139_v28, %v8004_v62  ;;  %v5466_v8 = vadd.f32 %v12174_v7, %v5452_v0 }
 0x20f   : > { %5865 = vmatpush.bf16.msra.mxu1 %v7909_v33  ;;  %v12239_v33 = vpop.f32.mrf.mxu0  ;;  %v8756_v16 = vld [vmem:[%s11004_s30 + $0xfe8] sm:$0xf]  ;;  %v10327_v18 = vld [vmem:[%s11004_s30 + $0xff4] sm:$0xf0]  ;;  %v8501_v53 = vor.u32 %v10263_v27, %v8500_v59 }
 0x210   : > { %5879 = vmatpush.bf16.msra.mxu2 %v8037_v12  ;;  %v8372_v12 = vld [vmem:[%s11004_s30 + $0xce8] sm:$0xf]  ;;  %v5492_v25 = vadd.f32 %v12161_v5, %v5478_v29  ;;  %v8757_v62 = vor.u32 %v10327_v18, %v8756_v16  ;;  %v10259_v28 = vld [vmem:[%s11004_s30 + $0xdd4] sm:$0xf0]  ;;  %v5480_v27 = vadd.f32 %v12179_v26, %v5466_v8 }
 0x211   : > { %5893 = vmatpush.bf16.msra.mxu3 %v8165_v13  ;;  %v10295_v13 = vld [vmem:[%s11004_s30 + $0xef4] sm:$0xf0]  ;;  %v8484_v11 = vld [vmem:[%s11004_s30 + $0xdc8] sm:$0xf] }
 0x212   : > { %5852 = vmatpush.bf16.msra.mxu0 %v7765_v34  ;;  %v8373_v34 = vor.u32 %v10231_v57, %v8372_v12  ;;  %v8629_v52 = vor.u32 %v10295_v13, %v8628_v4  ;;  %v8612_v50 = vld [vmem:[%s11004_s30 + $0xec8] sm:$0xf]  ;;  %v10291_v2 = vld [vmem:[%s11004_s30 + $0xed4] sm:$0xf0]  ;;  %v5506_v7 = vadd.f32 %v12167_v37, %v5492_v25  ;;  %v12265_v44 = vpop.f32.mrf.mxu3  ;;  %v8485_v29 = vor.u32 %v10259_v28, %v8484_v11 }
 0x213   : > { %5866 = vmatpush.bf16.msra.mxu1 %v7893_v54  ;;  %v8356_v54 = vld [vmem:[%s11004_s30 + $0xcc8] sm:$0xf]  ;;  %v10323_v47 = vld [vmem:[%s11004_s30 + $0xfd4] sm:$0xf0]  ;;  %v12262_v5 = vpop.f32.mrf.mxu2  ;;  %v8613_v12 = vor.u32 %v10291_v2, %v8612_v50 }
 0x214   : > { %5880 = vmatpush.bf16.msra.mxu2 %v8021_v24  ;;  %v10227_v24 = vld [vmem:[%s11004_s30 + $0xcd4] sm:$0xf0]  ;;  %v8740_v42 = vld [vmem:[%s11004_s30 + $0xfc8] sm:$0xf]  ;;  %v5520_v2 = vadd.f32 %v12201_v30, %v5506_v7 }
 0x215   : > { %5894 = vmatpush.bf16.msra.mxu3 %v8149_v6  ;;  %v8357_v6 = vor.u32 %v10227_v24, %v8356_v54  ;;  %v8340_v57 = vld [vmem:[%s11004_s30 + $0xca8] sm:$0xf]  ;;  %v10223_v59 = vld [vmem:[%s11004_s30 + $0xcb4] sm:$0xf0]  ;;  %v12273_v4 = vpop.f32.mrf.mxu1  ;;  %v8741_v37 = vor.u32 %v10323_v47, %v8740_v42 }
 0x216   : > { %5853 = vmatpush.bf16.msra.mxu0 %v7749_v49  ;;  %v8468_v49 = vld [vmem:[%s11004_s30 + $0xda8] sm:$0xf]  ;;  %v10255_v13 = vld [vmem:[%s11004_s30 + $0xdb4] sm:$0xf0]  ;;  %v8341_v16 = vor.u32 %v10223_v59, %v8340_v57  ;;  %v5534_v24 = vadd.f32 %v12206_v43, %v5520_v2 }
 0x217   : > { %5867 = vmatpush.bf16.msra.mxu1 %v7877_v48  ;;  %v12267_v21 = vpop.f32.mrf.mxu0  ;;  %v8596_v48 = vld [vmem:[%s11004_s30 + $0xea8] sm:$0xf]  ;;  %v10319_v26 = vld [vmem:[%s11004_s30 + $0xfb4] sm:$0xf0]  ;;  %v8469_v30 = vor.u32 %v10255_v13, %v8468_v49 }
 0x218   : > { %5881 = vmatpush.bf16.msra.mxu2 %v8005_v45  ;;  %v8724_v50 = vld [vmem:[%s11004_s30 + $0xfa8] sm:$0xf]  ;;  %v5494_v45 = vadd.f32 %v12197_v20, %v5480_v27  ;;  %v10283_v20 = vld [vmem:[%s11004_s30 + $0xe94] sm:$0xf0]  ;;  %v5548_v47 = vadd.f32 %v12225_v3, %v5534_v24 }
 0x219   : > { %5895 = vmatpush.bf16.msra.mxu3 %v8133_v23  ;;  %5854 = vmatmul.bf16.vlgmr.msra.gmra.mxu0 %v11237_v31  ;;  %v8324_v0 = vld [vmem:[%s11004_s30 + $0xc88] sm:$0xf]  ;;  %v10219_v23 = vld [vmem:[%s11004_s30 + $0xc94] sm:$0xf0]  ;;  %v8725_v25 = vor.u32 %v10319_v26, %v8724_v50 }
 0x21a   : > { %5902 = vmatpush.bf16.msrb.mxu0 %v8373_v34  ;;  %5868 = vmatmul.bf16.vlgmr.msra.gmra.mxu1 %v11244_v36  ;;  %v8452_v34 = vld [vmem:[%s11004_s30 + $0xd88] sm:$0xf]  ;;  %v10315_v8 = vld [vmem:[%s11004_s30 + $0xf94] sm:$0xf0]  ;;  %v8325_v42 = vor.u32 %v10219_v23, %v8324_v0 }
 0x21b   : > { %5916 = vmatpush.bf16.msrb.mxu1 %v8501_v53  ;;  %5882 = vmatmul.bf16.vlgmr.msra.gmra.mxu2 %v11242_v35  ;;  %v10251_v53 = vld [vmem:[%s11004_s30 + $0xd94] sm:$0xf0]  ;;  %v8580_v54 = vld [vmem:[%s11004_s30 + $0xe88] sm:$0xf]  ;;  %v12296_v28 = vpop.f32.mrf.mxu2 }
 0x21c   : > { %5930 = vmatpush.bf16.msrb.mxu2 %v8629_v52  ;;  %v10287_v52 = vld [vmem:[%s11004_s30 + $0xeb4] sm:$0xf0]  ;;  %5896 = vmatmul.bf16.vlgmr.msra.gmra.mxu3 %v11248_v40  ;;  %v8708_v11 = vld [vmem:[%s11004_s30 + $0xf88] sm:$0xf]  ;;  %v8453_v43 = vor.u32 %v10251_v53, %v8452_v34  ;;  %v8581_v7 = vor.u32 %v10283_v20, %v8580_v54 }
 0x21d   : > { %5944 = vmatpush.bf16.msrb.mxu3 %v8757_v62  ;;  %v8597_v18 = vor.u32 %v10287_v52, %v8596_v48  ;;  %v5508_v62 = vadd.f32 %v12199_v22, %v5494_v45  ;;  %v8436_v22 = vld [vmem:[%s11004_s30 + $0xd68] sm:$0xf]  ;;  %v8709_v59 = vor.u32 %v10315_v8, %v8708_v11  ;;  %v10247_v49 = vld [vmem:[%s11004_s30 + $0xd74] sm:$0xf0]  ;;  %v12312_v52 = vpop.f32.mrf.mxu1 }
 0x21e   : > { %5903 = vmatpush.bf16.msrb.mxu0 %v8357_v6  ;;  %v12299_v6 = vpop.f32.mrf.mxu3  ;;  %v8564_v3 = vld [vmem:[%s11004_s30 + $0xe68] sm:$0xf]  ;;  %v10279_v27 = vld [vmem:[%s11004_s30 + $0xe74] sm:$0xf0]  ;;  %v8437_v50 = vor.u32 %v10247_v49, %v8436_v22 }
 0x21f   : > { %5917 = vmatpush.bf16.msrb.mxu1 %v8485_v29  ;;  %v8308_v29 = vld [vmem:[%s11004_s30 + $0xc68] sm:$0xf]  ;;  %v5522_v57 = vadd.f32 %v12239_v33, %v5508_v62  ;;  %v10311_v48 = vld [vmem:[%s11004_s30 + $0xf74] sm:$0xf0]  ;;  %v5562_v33 = vadd.f32 %v12229_v63, %v5548_v47  ;;  %v8565_v26 = vor.u32 %v10279_v27, %v8564_v3 }
 0x220   : > { %5931 = vmatpush.bf16.msrb.mxu2 %v8613_v12  ;;  %v10215_v12 = vld [vmem:[%s11004_s30 + $0xc74] sm:$0xf0]  ;;  %v8692_v13 = vld [vmem:[%s11004_s30 + $0xf68] sm:$0xf] }
 0x221   : > { %5945 = vmatpush.bf16.msrb.mxu3 %v8741_v37  ;;  %v12308_v37 = vpop.f32.mrf.mxu0  ;;  %v8309_v2 = vor.u32 %v10215_v12, %v8308_v29  ;;  %v8292_v45 = vld [vmem:[%s11004_s30 + $0xc48] sm:$0xf]  ;;  %v8693_v0 = vor.u32 %v10311_v48, %v8692_v13  ;;  %v10243_v23 = vld [vmem:[%s11004_s30 + $0xd54] sm:$0xf0]  ;;  %v5576_v63 = vadd.f32 %v12267_v21, %v5562_v33 }
 0x222   : > { %5904 = vmatpush.bf16.msrb.mxu0 %v8341_v16  ;;  %v10211_v16 = vld [vmem:[%s11004_s30 + $0xc54] sm:$0xf0]  ;;  %v8548_v34 = vld [vmem:[%s11004_s30 + $0xe48] sm:$0xf] }
 0x223   : > { %5918 = vmatpush.bf16.msrb.mxu1 %v8469_v30  ;;  %v8420_v30 = vld [vmem:[%s11004_s30 + $0xd48] sm:$0xf]  ;;  %v10307_v54 = vld [vmem:[%s11004_s30 + $0xf54] sm:$0xf0]  ;;  %v8293_v24 = vor.u32 %v10211_v16, %v8292_v45  ;;  %v12329_v21 = vpop.f32.mrf.mxu2  ;;  %v5590_v29 = vadd.f32 %v12273_v4, %v5576_v63 }
 0x224   : > { %5932 = vmatpush.bf16.msrb.mxu2 %v8597_v18  ;;  %v5536_v18 = vadd.f32 %v12244_v61, %v5522_v57  ;;  %v8676_v53 = vld [vmem:[%s11004_s30 + $0xf48] sm:$0xf]  ;;  %v8421_v61 = vor.u32 %v10243_v23, %v8420_v30  ;;  %v10207_v62 = vld [vmem:[%s11004_s30 + $0xc34] sm:$0xf0] }
 0x225   : > { %5946 = vmatpush.bf16.msrb.mxu3 %v8725_v25  ;;  %v10275_v25 = vld [vmem:[%s11004_s30 + $0xe54] sm:$0xf0]  ;;  %v8276_v8 = vld [vmem:[%s11004_s30 + $0xc28] sm:$0xf]  ;;  %v8677_v47 = vor.u32 %v10307_v54, %v8676_v53  ;;  %v5645_v3 = vpop.f32.mrf.mxu1  ;;  %v5604_v4 = vadd.f32 %v12296_v28, %v5590_v29 }
 0x226   : > { %5905 = vmatpush.bf16.msrb.mxu0 %v8325_v42  ;;  %v5550_v20 = vadd.f32 %v12262_v5, %v5536_v18  ;;  %v8549_v11 = vor.u32 %v10275_v25, %v8548_v34  ;;  %v8404_v42 = vld [vmem:[%s11004_s30 + $0xd28] sm:$0xf]  ;;  %v10271_v5 = vld [vmem:[%s11004_s30 + $0xe34] sm:$0xf0]  ;;  %v12335_v12 = vpop.f32.mrf.mxu3  ;;  %v8277_v27 = vor.u32 %v10207_v62, %v8276_v8 }
 0x227   : > { %5919 = vmatpush.bf16.msrb.mxu1 %v8453_v43  ;;  %v10239_v43 = vld [vmem:[%s11004_s30 + $0xd34] sm:$0xf0]  ;;  %v8660_v57 = vld [vmem:[%s11004_s30 + $0xf28] sm:$0xf] }
 0x228   : > { %5933 = vmatpush.bf16.msrb.mxu2 %v8581_v7  ;;  %v8532_v7 = vld [vmem:[%s11004_s30 + $0xe28] sm:$0xf]  ;;  %v5564_v49 = vadd.f32 %v12265_v44, %v5550_v20  ;;  %v10203_v48 = vld [vmem:[%s11004_s30 + $0xc14] sm:$0xf0]  ;;  %v5618_v20 = vadd.f32 %v12299_v6, %v5604_v4 }
 0x229   : > { %5947 = vmatpush.bf16.msrb.mxu3 %v8709_v59  ;;  %v5631_v22 = vpop.f32.mrf.mxu0  ;;  %v10303_v59 = vld [vmem:[%s11004_s30 + $0xf34] sm:$0xf0]  ;;  %v8260_v13 = vld [vmem:[%s11004_s30 + $0xc08] sm:$0xf]  ;;  %v8533_v33 = vor.u32 %v10271_v5, %v8532_v7 }
 0x22a   : > { %5906 = vmatpush.bf16.msrb.mxu0 %v8309_v2  ;;  %v8405_v2 = vor.u32 %v10239_v43, %v8404_v42  ;;  %v8388_v44 = vld [vmem:[%s11004_s30 + $0xd08] sm:$0xf]  ;;  %v8661_v45 = vor.u32 %v10303_v59, %v8660_v57  ;;  %v10267_v16 = vld [vmem:[%s11004_s30 + $0xe14] sm:$0xf0]  ;;  %v5578_v28 = vadd.f32 %v12308_v37, %v5564_v49  ;;  %v8261_v25 = vor.u32 %v10203_v48, %v8260_v13 }
 0x22b   : > { %5920 = vmatpush.bf16.msrb.mxu1 %v8437_v50  ;;  %v10235_v50 = vld [vmem:[%s11004_s30 + $0xd14] sm:$0xf0]  ;;  %v8644_v30 = vld [vmem:[%s11004_s30 + $0xf08] sm:$0xf]  ;;  %v5659_v8 = vpop.f32.mrf.mxu2  ;;  %v5632_v43 = vadd.f32 %v5631_v22, %v5618_v20 }
 0x22c   : > { %5934 = vmatpush.bf16.msrb.mxu2 %v8565_v26  ;;  %v8516_v26 = vld [vmem:[%s11004_s30 + $0xe08] sm:$0xf]  ;;  %v10299_v18 = vld [vmem:[%s11004_s30 + $0xf14] sm:$0xf0] }
 0x22d   : > { %5948 = vmatpush.bf16.msrb.mxu3 %v8693_v0  ;;  %v8884_v0 = vld [vmem:[%s11004_s30 + $0x10e8] sm:$0xf]  ;;  %v10359_v23 = vld [vmem:[%s11004_s30 + $0x10f4] sm:$0xf0]  ;;  %v8645_v62 = vor.u32 %v10299_v18, %v8644_v30 }
 0x22e   : > { %5907 = vmatpush.bf16.msrb.mxu0 %v8293_v24  ;;  %v9012_v34 = vld [vmem:[%s11004_s30 + $0x11e8] sm:$0xf]  ;;  %v10391_v63 = vld [vmem:[%s11004_s30 + $0x11f4] sm:$0xf0]  ;;  %v8389_v24 = vor.u32 %v10235_v50, %v8388_v44  ;;  %v8885_v42 = vor.u32 %v10359_v23, %v8884_v0  ;;  %v5673_v6 = vpop.f32.mrf.mxu3  ;;  %v5646_v50 = vadd.f32 %v5645_v3, %v5632_v43 }
 0x22f   : > { %5921 = vmatpush.bf16.msrb.mxu1 %v8421_v61  ;;  %v9140_v53 = vld [vmem:[%s11004_s30 + $0x12e8] sm:$0xf]  ;;  %v10423_v54 = vld [vmem:[%s11004_s30 + $0x12f4] sm:$0xf0]  ;;  %v8517_v61 = vor.u32 %v10267_v16, %v8516_v26  ;;  %v9013_v7 = vor.u32 %v10391_v63, %v9012_v34 }
 0x230   : > { %5935 = vmatpush.bf16.msrb.mxu2 %v8549_v11  ;;  %v9268_v11 = vld [vmem:[%s11004_s30 + $0x13e8] sm:$0xf]  ;;  %v10455_v37 = vld [vmem:[%s11004_s30 + $0x13f4] sm:$0xf0]  ;;  %v9141_v5 = vor.u32 %v10423_v54, %v9140_v53  ;;  %v5660_v34 = vadd.f32 %v5659_v8, %v5646_v50 }
 0x231   : > { %5949 = vmatpush.bf16.msrb.mxu3 %v8677_v47  ;;  %v5592_v47 = vadd.f32 %v12312_v52, %v5578_v28  ;;  %v8868_v29 = vld [vmem:[%s11004_s30 + $0x10c8] sm:$0xf]  ;;  %v10355_v57 = vld [vmem:[%s11004_s30 + $0x10d4] sm:$0xf0]  ;;  %v9269_v49 = vor.u32 %v10455_v37, %v9268_v11 }
 0x232   : > { %5908 = vmatpush.bf16.msrb.mxu0 %v8277_v27  ;;  %v8996_v59 = vld [vmem:[%s11004_s30 + $0x11c8] sm:$0xf]  ;;  %v10387_v27 = vld [vmem:[%s11004_s30 + $0x11d4] sm:$0xf0]  ;;  %v8869_v44 = vor.u32 %v10355_v57, %v8868_v29  ;;  %v5674_v43 = vadd.f32 %v5673_v6, %v5660_v34 }
 0x233   : > { %5922 = vmatpush.bf16.msrb.mxu1 %v8405_v2  ;;  %v9124_v13 = vld [vmem:[%s11004_s30 + $0x12c8] sm:$0xf]  ;;  %v10419_v48 = vld [vmem:[%s11004_s30 + $0x12d4] sm:$0xf0]  ;;  %v5606_v4 = vadd.f32 %v12329_v21, %v5592_v47  ;;  %v5633_v2 = vpop.f32.mrf.mxu0  ;;  %v8997_v26 = vor.u32 %v10387_v27, %v8996_v59  ;;  %v5661_v8 = vpop.f32.mrf.mxu2 }
 0x234   : > { %5936 = vmatpush.bf16.msrb.mxu2 %v8533_v33  ;;  %v9252_v52 = vld [vmem:[%s11004_s30 + $0x13c8] sm:$0xf]  ;;  %v10451_v22 = vld [vmem:[%s11004_s30 + $0x13d4] sm:$0xf0]  ;;  %v5647_v33 = vpop.f32.mrf.mxu1  ;;  %v9125_v21 = vor.u32 %v10419_v48, %v9124_v13 }
 0x235   : > { %5950 = vmatpush.bf16.msrb.mxu3 %v8661_v45  ;;  %v8852_v45 = vld [vmem:[%s11004_s30 + $0x10a8] sm:$0xf]  ;;  %v10351_v16 = vld [vmem:[%s11004_s30 + $0x10b4] sm:$0xf0]  ;;  %v9253_v18 = vor.u32 %v10451_v22, %v9252_v52  ;;  %v5620_v3 = vadd.f32 %v12335_v12, %v5606_v4 }
 0x236   : > { %5909 = vmatpush.bf16.msrb.mxu0 %v8261_v25  ;;  %v8980_v30 = vld [vmem:[%s11004_s30 + $0x11a8] sm:$0xf]  ;;  %v10383_v28 = vld [vmem:[%s11004_s30 + $0x11b4] sm:$0xf0]  ;;  %v8853_v53 = vor.u32 %v10351_v16, %v8852_v45 }
 0x237   : > { %5923 = vmatpush.bf16.msrb.mxu1 %v8389_v24  ;;  %v9108_v0 = vld [vmem:[%s11004_s30 + $0x12a8] sm:$0xf]  ;;  %v10415_v23 = vld [vmem:[%s11004_s30 + $0x12b4] sm:$0xf0]  ;;  %v5634_v20 = vadd.f32 %v5633_v2, %v5620_v3  ;;  %v8981_v12 = vor.u32 %v10383_v28, %v8980_v30 }
 0x238   : > { %5937 = vmatpush.bf16.msrb.mxu2 %v8517_v61  ;;  %v9236_v25 = vld [vmem:[%s11004_s30 + $0x13a8] sm:$0xf]  ;;  %v10447_v63 = vld [vmem:[%s11004_s30 + $0x13b4] sm:$0xf0]  ;;  %v9109_v24 = vor.u32 %v10415_v23, %v9108_v0 }
 0x239   : > { %5951 = vmatpush.bf16.msrb.mxu3 %v8645_v62  ;;  %5910 = vmatmul.bf16.vlgmr.msrb.gmra.mxu0 %v11313_v32  ;;  %v8836_v54 = vld [vmem:[%s11004_s30 + $0x1088] sm:$0xf]  ;;  %v10347_v61 = vld [vmem:[%s11004_s30 + $0x1094] sm:$0xf0]  ;;  %v9237_v62 = vor.u32 %v10447_v63, %v9236_v25  ;;  %v5648_v13 = vadd.f32 %v5647_v33, %v5634_v20 }
 0x23a   : > { %5958 = vmatpush.bf16.msra.mxu0 %v8885_v42  ;;  %5924 = vmatmul.bf16.vlgmr.msrb.gmra.mxu1 %v11320_v41  ;;  %v8964_v11 = vld [vmem:[%s11004_s30 + $0x1188] sm:$0xf]  ;;  %v10379_v37 = vld [vmem:[%s11004_s30 + $0x1194] sm:$0xf0]  ;;  %v8837_v59 = vor.u32 %v10347_v61, %v8836_v54 }
 0x23b   : > { %5972 = vmatpush.bf16.msra.mxu1 %v9013_v7  ;;  %5938 = vmatmul.bf16.vlgmr.msrb.gmra.mxu2 %v11318_v38  ;;  %v9092_v42 = vld [vmem:[%s11004_s30 + $0x1288] sm:$0xf]  ;;  %v10411_v47 = vld [vmem:[%s11004_s30 + $0x1294] sm:$0xf0]  ;;  %v5675_v7 = vpop.f32.mrf.mxu3 }
 0x23c   : > { %5986 = vmatpush.bf16.msra.mxu2 %v9141_v5  ;;  %5952 = vmatmul.bf16.vlgmr.msrb.gmra.mxu3 %v11324_v46  ;;  %v5687_v5 = vpop.f32.mrf.mxu0  ;;  %v9220_v29 = vld [vmem:[%s11004_s30 + $0x1388] sm:$0xf]  ;;  %v10443_v57 = vld [vmem:[%s11004_s30 + $0x1394] sm:$0xf0]  ;;  %v5701_v27 = vpop.f32.mrf.mxu1  ;;  %v9093_v6 = vor.u32 %v10411_v47, %v9092_v42 }
 0x23d   : > { %6000 = vmatpush.bf16.msra.mxu3 %v9269_v49  ;;  %v8965_v49 = vor.u32 %v10379_v37, %v8964_v11  ;;  %v5688_v48 = vadd.f32 %v5687_v5, %v5674_v43  ;;  %v8820_v4 = vld [vmem:[%s11004_s30 + $0x1068] sm:$0xf]  ;;  %v10343_v2 = vld [vmem:[%s11004_s30 + $0x1074] sm:$0xf0]  ;;  %v9221_v22 = vor.u32 %v10443_v57, %v9220_v29  ;;  %v12405_v11 = vld [vmem:[%s11878_s10] sm:$0xf] }
 0x23e   : > { %5959 = vmatpush.bf16.msra.mxu0 %v8869_v44  ;;  %v8948_v52 = vld [vmem:[%s11004_s30 + $0x1168] sm:$0xf]  ;;  %v10375_v44 = vld [vmem:[%s11004_s30 + $0x1174] sm:$0xf0]  ;;  %v8821_v16 = vor.u32 %v10343_v2, %v8820_v4  ;;  %v5715_v63 = vpop.f32.mrf.mxu2  ;;  %v6436_v37 = vperm.slane %v12405_v11, 1 }
 0x23f   : > { %5973 = vmatpush.bf16.msra.mxu1 %v8997_v26  ;;  %v9076_v50 = vld [vmem:[%s11004_s30 + $0x1268] sm:$0xf]  ;;  %v10407_v26 = vld [vmem:[%s11004_s30 + $0x1274] sm:$0xf0]  ;;  %v8949_v28 = vor.u32 %v10375_v44, %v8948_v52 }
 0x240   : > { %5987 = vmatpush.bf16.msra.mxu2 %v9125_v21  ;;  %v5662_v21 = vadd.f32 %v5661_v8, %v5648_v13  ;;  %v9204_v45 = vld [vmem:[%s11004_s30 + $0x1368] sm:$0xf]  ;;  %v10439_v33 = vld [vmem:[%s11004_s30 + $0x1374] sm:$0xf0]  ;;  %v9077_v0 = vor.u32 %v10407_v26, %v9076_v50 }
 0x241   : > { %6001 = vmatpush.bf16.msra.mxu3 %v9253_v18  ;;  %v8804_v30 = vld [vmem:[%s11004_s30 + $0x1048] sm:$0xf]  ;;  %v5702_v18 = vadd.f32 %v5701_v27, %v5688_v48  ;;  %v10339_v23 = vld [vmem:[%s11004_s30 + $0x1054] sm:$0xf0]  ;;  %v9205_v25 = vor.u32 %v10439_v33, %v9204_v45 }
 0x242   : > { %5960 = vmatpush.bf16.msra.mxu0 %v8853_v53  ;;  %v8932_v3 = vld [vmem:[%s11004_s30 + $0x1148] sm:$0xf]  ;;  %v10371_v34 = vld [vmem:[%s11004_s30 + $0x1154] sm:$0xf0]  ;;  %v5676_v20 = vadd.f32 %v5675_v7, %v5662_v21  ;;  %v8805_v42 = vor.u32 %v10339_v23, %v8804_v30 }
 0x243   : > { %5974 = vmatpush.bf16.msra.mxu1 %v8981_v12  ;;  %v9060_v53 = vld [vmem:[%s11004_s30 + $0x1248] sm:$0xf]  ;;  %v10403_v54 = vld [vmem:[%s11004_s30 + $0x1254] sm:$0xf0]  ;;  %v5716_v12 = vadd.f32 %v5715_v63, %v5702_v18  ;;  %v5729_v61 = vpop.f32.mrf.mxu3  ;;  %v8933_v47 = vor.u32 %v10371_v34, %v8932_v3 }
 0x244   : > { %5988 = vmatpush.bf16.msra.mxu2 %v9109_v24  ;;  %v5689_v24 = vpop.f32.mrf.mxu0  ;;  %v9188_v8 = vld [vmem:[%s11004_s30 + $0x1348] sm:$0xf]  ;;  %v9061_v5 = vor.u32 %v10403_v54, %v9060_v53  ;;  %v10335_v57 = vld [vmem:[%s11004_s30 + $0x1034] sm:$0xf0]  ;;  %v5703_v27 = vpop.f32.mrf.mxu1 }
 0x245   : > { %6002 = vmatpush.bf16.msra.mxu3 %v9237_v62  ;;  %v10435_v62 = vld [vmem:[%s11004_s30 + $0x1354] sm:$0xf0]  ;;  %v5690_v43 = vadd.f32 %v5689_v24, %v5676_v20  ;;  %v5730_v7 = vadd.f32 %v5729_v61, %v5716_v12  ;;  %v8788_v29 = vld [vmem:[%s11004_s30 + $0x1028] sm:$0xf] }
 0x246   : > { %5961 = vmatpush.bf16.msra.mxu0 %v8837_v59  ;;  %v8916_v59 = vld [vmem:[%s11004_s30 + $0x1128] sm:$0xf]  ;;  %v10367_v13 = vld [vmem:[%s11004_s30 + $0x1134] sm:$0xf0] }
 0x247   : > { %5975 = vmatpush.bf16.msra.mxu1 %v8965_v49  ;;  %v9189_v49 = vor.u32 %v10435_v62, %v9188_v8  ;;  %v9044_v48 = vld [vmem:[%s11004_s30 + $0x1228] sm:$0xf]  ;;  %v6444_v4 = vadd.f32 %v6436_v37, %v5730_v7  ;;  %v10431_v52 = vld [vmem:[%s11004_s30 + $0x1334] sm:$0xf0]  ;;  %v5704_v21 = vadd.f32 %v5703_v27, %v5690_v43  ;;  %v8917_v45 = vor.u32 %v10367_v13, %v8916_v59 }
 0x248   : > { %5989 = vmatpush.bf16.msra.mxu2 %v9093_v6  ;;  %v10399_v6 = vld [vmem:[%s11004_s30 + $0x1234] sm:$0xf0]  ;;  %v9172_v2 = vld [vmem:[%s11004_s30 + $0x1328] sm:$0xf] }
 0x249   : > { %6003 = vmatpush.bf16.msra.mxu3 %v9221_v22  ;;  %v8789_v22 = vor.u32 %v10335_v57, %v8788_v29  ;;  %v8772_v44 = vld [vmem:[%s11004_s30 + $0x1008] sm:$0xf]  ;;  %v10331_v50 = vld [vmem:[%s11004_s30 + $0x1014] sm:$0xf0]  ;;  %6452 = vst [vmem:[%s11906_s19 + $0x8] sm:$0xff] %v6444_v4  ;;  %v9045_v33 = vor.u32 %v10399_v6, %v9044_v48  ;;  %v9173_v18 = vor.u32 %v10431_v52, %v9172_v2 }
 0x24a   : > { %5962 = vmatpush.bf16.msra.mxu0 %v8821_v16  ;;  %v8900_v26 = vld [vmem:[%s11004_s30 + $0x1108] sm:$0xf]  ;;  %v10363_v16 = vld [vmem:[%s11004_s30 + $0x1114] sm:$0xf0]  ;;  %v8773_v20 = vor.u32 %v10331_v50, %v8772_v44 }
 0x24b   : > { %5976 = vmatpush.bf16.msra.mxu1 %v8949_v28  ;;  %v9028_v30 = vld [vmem:[%s11004_s30 + $0x1208] sm:$0xf]  ;;  %v5717_v28 = vpop.f32.mrf.mxu2  ;;  %v10427_v3 = vld [vmem:[%s11004_s30 + $0x1314] sm:$0xf0]  ;;  %v8901_v8 = vor.u32 %v10363_v16, %v8900_v26 }
 0x24c   : > { %5990 = vmatpush.bf16.msra.mxu2 %v9077_v0  ;;  %v10395_v0 = vld [vmem:[%s11004_s30 + $0x1214] sm:$0xf0]  ;;  %v9156_v23 = vld [vmem:[%s11004_s30 + $0x1308] sm:$0xf]  ;;  %v5718_v34 = vadd.f32 %v5717_v28, %v5704_v21 }
 0x24d   : > { %6004 = vmatpush.bf16.msra.mxu3 %v9205_v25  ;;  %v5731_v25 = vpop.f32.mrf.mxu3  ;;  %v9396_v63 = vld [vmem:[%s11004_s30 + $0x14e8] sm:$0xf]  ;;  %v10487_v53 = vld [vmem:[%s11004_s30 + $0x14f4] sm:$0xf0]  ;;  %v9029_v62 = vor.u32 %v10395_v0, %v9028_v30  ;;  %v9157_v43 = vor.u32 %v10427_v3, %v9156_v23 }
 0x24e   : > { %5963 = vmatpush.bf16.msra.mxu0 %v8805_v42  ;;  %v9524_v54 = vld [vmem:[%s11004_s30 + $0x15e8] sm:$0xf]  ;;  %v10519_v12 = vld [vmem:[%s11004_s30 + $0x15f4] sm:$0xf0]  ;;  %v5732_v11 = vadd.f32 %v5731_v25, %v5718_v34  ;;  %v9397_v7 = vor.u32 %v10487_v53, %v9396_v63 }
 0x24f   : > { %5977 = vmatpush.bf16.msra.mxu1 %v8933_v47  ;;  %v9652_v24 = vld [vmem:[%s11004_s30 + $0x16e8] sm:$0xf]  ;;  %v10551_v61 = vld [vmem:[%s11004_s30 + $0x16f4] sm:$0xf0]  ;;  %v9525_v29 = vor.u32 %v10519_v12, %v9524_v54 }
 0x250   : > { %5991 = vmatpush.bf16.msra.mxu2 %v9061_v5  ;;  %v9780_v42 = vld [vmem:[%s11004_s30 + $0x17e8] sm:$0xf]  ;;  %v10583_v47 = vld [vmem:[%s11004_s30 + $0x17f4] sm:$0xf0]  ;;  %v6448_v5 = vadd.f32 %v6436_v37, %v5732_v11  ;;  %v9653_v57 = vor.u32 %v10551_v61, %v9652_v24 }
 0x251   : > { %6005 = vmatpush.bf16.msra.mxu3 %v9189_v49  ;;  %v9380_v59 = vld [vmem:[%s11004_s30 + $0x14c8] sm:$0xf]  ;;  %v10483_v49 = vld [vmem:[%s11004_s30 + $0x14d4] sm:$0xf0]  ;;  %v9781_v13 = vor.u32 %v10583_v47, %v9780_v42 }
 0x252   : > { %5964 = vmatpush.bf16.msra.mxu0 %v8789_v22  ;;  %v9508_v27 = vld [vmem:[%s11004_s30 + $0x15c8] sm:$0xf]  ;;  %v10515_v48 = vld [vmem:[%s11004_s30 + $0x15d4] sm:$0xf0]  ;;  %6456 = vst [vmem:[%s11906_s19 + $0x28] sm:$0xff] %v6448_v5  ;;  %v9381_v52 = vor.u32 %v10483_v49, %v9380_v59 }
 0x253   : > { %5978 = vmatpush.bf16.msra.mxu1 %v8917_v45  ;;  %v9636_v6 = vld [vmem:[%s11004_s30 + $0x16c8] sm:$0xf]  ;;  %v10547_v4 = vld [vmem:[%s11004_s30 + $0x16d4] sm:$0xf0]  ;;  %v9509_v22 = vor.u32 %v10515_v48, %v9508_v27 }
 0x254   : > { %5992 = vmatpush.bf16.msra.mxu2 %v9045_v33  ;;  %v9764_v2 = vld [vmem:[%s11004_s30 + $0x17c8] sm:$0xf]  ;;  %v10579_v37 = vld [vmem:[%s11004_s30 + $0x17d4] sm:$0xf0]  ;;  %v9637_v44 = vor.u32 %v10547_v4, %v9636_v6 }
 0x255   : > { %6006 = vmatpush.bf16.msra.mxu3 %v9173_v18  ;;  %v9364_v50 = vld [vmem:[%s11004_s30 + $0x14a8] sm:$0xf]  ;;  %v10479_v26 = vld [vmem:[%s11004_s30 + $0x14b4] sm:$0xf0]  ;;  %v9765_v45 = vor.u32 %v10579_v37, %v9764_v2 }
 0x256   : > { %5965 = vmatpush.bf16.msra.mxu0 %v8773_v20  ;;  %v9492_v21 = vld [vmem:[%s11004_s30 + $0x15a8] sm:$0xf]  ;;  %v10511_v33 = vld [vmem:[%s11004_s30 + $0x15b4] sm:$0xf0]  ;;  %v9365_v0 = vor.u32 %v10479_v26, %v9364_v50 }
 0x257   : > { %5979 = vmatpush.bf16.msra.mxu1 %v8901_v8  ;;  %v9620_v16 = vld [vmem:[%s11004_s30 + $0x16a8] sm:$0xf]  ;;  %v10543_v30 = vld [vmem:[%s11004_s30 + $0x16b4] sm:$0xf0]  ;;  %v9493_v23 = vor.u32 %v10511_v33, %v9492_v21 }
 0x258   : > { %5993 = vmatpush.bf16.msra.mxu2 %v9029_v62  ;;  %v9748_v18 = vld [vmem:[%s11004_s30 + $0x17a8] sm:$0xf]  ;;  %v10575_v28 = vld [vmem:[%s11004_s30 + $0x17b4] sm:$0xf0]  ;;  %v9621_v3 = vor.u32 %v10543_v30, %v9620_v16 }
 0x259   : > { %6007 = vmatpush.bf16.msra.mxu3 %v9157_v43  ;;  %5966 = vmatmul.bf16.vlgmr.msra.gmra.mxu0 %v11389_v51  ;;  %v9348_v34 = vld [vmem:[%s11004_s30 + $0x1488] sm:$0xf]  ;;  %v10475_v25 = vld [vmem:[%s11004_s30 + $0x1494] sm:$0xf0]  ;;  %v9749_v53 = vor.u32 %v10575_v28, %v9748_v18 }
 0x25a   : > { %6014 = vmatpush.bf16.msrb.mxu0 %v9397_v7  ;;  %5980 = vmatmul.bf16.vlgmr.msra.gmra.mxu1 %v11396_v56  ;;  %v9476_v63 = vld [vmem:[%s11004_s30 + $0x1588] sm:$0xf]  ;;  %v10507_v54 = vld [vmem:[%s11004_s30 + $0x1594] sm:$0xf0]  ;;  %v9349_v11 = vor.u32 %v10475_v25, %v9348_v34 }
 0x25b   : > { %6028 = vmatpush.bf16.msrb.mxu1 %v9525_v29  ;;  %5994 = vmatmul.bf16.vlgmr.msra.gmra.mxu2 %v11394_v55  ;;  %v9604_v20 = vld [vmem:[%s11004_s30 + $0x1688] sm:$0xf]  ;;  %v10539_v12 = vld [vmem:[%s11004_s30 + $0x1694] sm:$0xf0]  ;;  %v9477_v8 = vor.u32 %v10507_v54, %v9476_v63 }
 0x25c   : > { %6042 = vmatpush.bf16.msrb.mxu2 %v9653_v57  ;;  %6008 = vmatmul.bf16.vlgmr.msra.gmra.mxu3 %v11400_v60  ;;  %v9732_v24 = vld [vmem:[%s11004_s30 + $0x1788] sm:$0xf]  ;;  %v10571_v61 = vld [vmem:[%s11004_s30 + $0x1794] sm:$0xf0]  ;;  %v9605_v62 = vor.u32 %v10539_v12, %v9604_v20 }
 0x25d   : > { %6056 = vmatpush.bf16.msrb.mxu3 %v9781_v13  ;;  %v9332_v42 = vld [vmem:[%s11004_s30 + $0x1468] sm:$0xf]  ;;  %v10471_v47 = vld [vmem:[%s11004_s30 + $0x1474] sm:$0xf0]  ;;  %v9733_v7 = vor.u32 %v10571_v61, %v9732_v24 }
 0x25e   : > { %6015 = vmatpush.bf16.msrb.mxu0 %v9381_v52  ;;  %v9460_v43 = vld [vmem:[%s11004_s30 + $0x1568] sm:$0xf]  ;;  %v10503_v5 = vld [vmem:[%s11004_s30 + $0x1574] sm:$0xf0]  ;;  %v9333_v27 = vor.u32 %v10471_v47, %v9332_v42 }
 0x25f   : > { %6029 = vmatpush.bf16.msrb.mxu1 %v9509_v22  ;;  %v9588_v29 = vld [vmem:[%s11004_s30 + $0x1668] sm:$0xf]  ;;  %v10535_v57 = vld [vmem:[%s11004_s30 + $0x1674] sm:$0xf0]  ;;  %v9461_v13 = vor.u32 %v10503_v5, %v9460_v43  ;;  %v9845_v43 = vld [vmem:[%s11004_s30 + $0xec] sm:$0xf] }
 0x260   : > { %6043 = vmatpush.bf16.msrb.mxu2 %v9637_v44  ;;  %v9716_v59 = vld [vmem:[%s11004_s30 + $0x1768] sm:$0xf]  ;;  %v10567_v49 = vld [vmem:[%s11004_s30 + $0x1774] sm:$0xf0]  ;;  %v9589_v48 = vor.u32 %v10535_v57, %v9588_v29  ;;  %v9877_v5 = vld [vmem:[%s11004_s30 + $0x1ec] sm:$0xf] }
 0x261   : > { %6057 = vmatpush.bf16.msrb.mxu3 %v9765_v45  ;;  %v9316_v6 = vld [vmem:[%s11004_s30 + $0x1448] sm:$0xf]  ;;  %v10467_v4 = vld [vmem:[%s11004_s30 + $0x1454] sm:$0xf0]  ;;  %v9717_v37 = vor.u32 %v10567_v49, %v9716_v59  ;;  %v6966_v57 = vld [vmem:[%s11004_s30 + $0x1f8] sm:$0xf0] }
 0x262   : > { %6016 = vmatpush.bf16.msrb.mxu0 %v9365_v0  ;;  %v9444_v2 = vld [vmem:[%s11004_s30 + $0x1548] sm:$0xf]  ;;  %v10499_v52 = vld [vmem:[%s11004_s30 + $0x1554] sm:$0xf0]  ;;  %v9317_v21 = vor.u32 %v10467_v4, %v9316_v6  ;;  %v9909_v59 = vld [vmem:[%s11004_s30 + $0x2ec] sm:$0xf] }
 0x263   : > { %6030 = vmatpush.bf16.msrb.mxu1 %v9493_v23  ;;  %v9572_v22 = vld [vmem:[%s11004_s30 + $0x1648] sm:$0xf]  ;;  %v10531_v44 = vld [vmem:[%s11004_s30 + $0x1654] sm:$0xf0]  ;;  %v9445_v45 = vor.u32 %v10499_v52, %v9444_v2  ;;  %v7094_v49 = vld [vmem:[%s11004_s30 + $0x2f8] sm:$0xf0] }
 0x264   : > { %6044 = vmatpush.bf16.msrb.mxu2 %v9621_v3  ;;  %v9700_v50 = vld [vmem:[%s11004_s30 + $0x1748] sm:$0xf]  ;;  %v10563_v26 = vld [vmem:[%s11004_s30 + $0x1754] sm:$0xf0]  ;;  %v9573_v33 = vor.u32 %v10531_v44, %v9572_v22  ;;  %v7222_v6 = vld [vmem:[%s11004_s30 + $0x3f8] sm:$0xf0]  ;;  %v7097_v52 = vor.u32 %v9909_v59, %v7094_v49 }
 0x265   : > { %6058 = vmatpush.bf16.msrb.mxu3 %v9749_v53  ;;  %v9300_v16 = vld [vmem:[%s11004_s30 + $0x1428] sm:$0xf]  ;;  %v10463_v30 = vld [vmem:[%s11004_s30 + $0x1434] sm:$0xf0]  ;;  %v9701_v28 = vor.u32 %v10563_v26, %v9700_v50  ;;  %v9841_v22 = vld [vmem:[%s11004_s30 + $0xcc] sm:$0xf] }
 0x266   : > { %6017 = vmatpush.bf16.msrb.mxu0 %v9349_v11  ;;  %v9428_v18 = vld [vmem:[%s11004_s30 + $0x1528] sm:$0xf]  ;;  %v10495_v0 = vld [vmem:[%s11004_s30 + $0x1534] sm:$0xf0]  ;;  %v9301_v63 = vor.u32 %v10463_v30, %v9300_v16  ;;  %v6822_v44 = vld [vmem:[%s11004_s30 + $0xd8] sm:$0xf0] }
 0x267   : > { %6031 = vmatpush.bf16.msrb.mxu1 %v9477_v8  ;;  %v9556_v23 = vld [vmem:[%s11004_s30 + $0x1628] sm:$0xf]  ;;  %v10527_v3 = vld [vmem:[%s11004_s30 + $0x1634] sm:$0xf0]  ;;  %v9429_v20 = vor.u32 %v10495_v0, %v9428_v18  ;;  %v9873_v50 = vld [vmem:[%s11004_s30 + $0x1cc] sm:$0xf]  ;;  %v6825_v18 = vor.u32 %v9841_v22, %v6822_v44 }
 0x268   : > { %6045 = vmatpush.bf16.msrb.mxu2 %v9605_v62  ;;  %v9684_v34 = vld [vmem:[%s11004_s30 + $0x1728] sm:$0xf]  ;;  %v10559_v25 = vld [vmem:[%s11004_s30 + $0x1734] sm:$0xf0]  ;;  %v9557_v12 = vor.u32 %v10527_v3, %v9556_v23  ;;  %v9937_v16 = vld [vmem:[%s11004_s30 + $0x3cc] sm:$0xf] }
 0x269   : > { %6059 = vmatpush.bf16.msrb.mxu3 %v9733_v7  ;;  %v9284_v53 = vld [vmem:[%s11004_s30 + $0x1408] sm:$0xf]  ;;  %v10459_v54 = vld [vmem:[%s11004_s30 + $0x1414] sm:$0xf0]  ;;  %v9685_v8 = vor.u32 %v10559_v25, %v9684_v34  ;;  %v6838_v7 = vld [vmem:[%s11004_s30 + $0xf8] sm:$0xf0] }
 0x26a   : > { %6018 = vmatpush.bf16.msrb.mxu0 %v9333_v27  ;;  %v9412_v24 = vld [vmem:[%s11004_s30 + $0x1508] sm:$0xf]  ;;  %v10491_v61 = vld [vmem:[%s11004_s30 + $0x1514] sm:$0xf0]  ;;  %v9285_v29 = vor.u32 %v10459_v54, %v9284_v53  ;;  %v6841_v2 = vor.u32 %v9845_v43, %v6838_v7  ;;  %v7206_v30 = vld [vmem:[%s11004_s30 + $0x3d8] sm:$0xf0] }
 0x26b   : > { %6032 = vmatpush.bf16.msrb.mxu1 %v9461_v13  ;;  %v9540_v11 = vld [vmem:[%s11004_s30 + $0x1608] sm:$0xf]  ;;  %v10523_v62 = vld [vmem:[%s11004_s30 + $0x1614] sm:$0xf0]  ;;  %v9413_v27 = vor.u32 %v10491_v61, %v9412_v24  ;;  %v9837_v23 = vld [vmem:[%s11004_s30 + $0xac] sm:$0xf]  ;;  %v7209_v25 = vor.u32 %v9937_v16, %v7206_v30 }
 0x26c   : > { %6046 = vmatpush.bf16.msrb.mxu2 %v9589_v48  ;;  %v9668_v42 = vld [vmem:[%s11004_s30 + $0x1708] sm:$0xf]  ;;  %v10555_v47 = vld [vmem:[%s11004_s30 + $0x1714] sm:$0xf0]  ;;  %v9541_v13 = vor.u32 %v10523_v62, %v9540_v11  ;;  %v9941_v48 = vld [vmem:[%s11004_s30 + $0x3ec] sm:$0xf] }
 0x26d   : > { %6060 = vmatpush.bf16.msrb.mxu3 %v9717_v37  ;;  %v9669_v4 = vor.u32 %v10555_v47, %v9668_v42  ;;  %v6969_v37 = vor.u32 %v9877_v5, %v6966_v57  ;;  %v7225_v26 = vor.u32 %v9941_v48, %v7222_v6  ;;  %v6806_v3 = vld [vmem:[%s11004_s30 + $0xb8] sm:$0xf0]  ;;  %v9869_v34 = vld [vmem:[%s11004_s30 + $0x1ac] sm:$0xf] }
 0x26e   : > { %6019 = vmatpush.bf16.msrb.mxu0 %v9317_v21  ;;  %v6950_v21 = vld [vmem:[%s11004_s30 + $0x1d8] sm:$0xf0]  ;;  %v9901_v53 = vld [vmem:[%s11004_s30 + $0x2ac] sm:$0xf]  ;;  %v6809_v24 = vor.u32 %v9837_v23, %v6806_v3 }
 0x26f   : > { %6033 = vmatpush.bf16.msrb.mxu1 %v9445_v45  ;;  %v9905_v45 = vld [vmem:[%s11004_s30 + $0x2cc] sm:$0xf]  ;;  %v7062_v54 = vld [vmem:[%s11004_s30 + $0x2b8] sm:$0xf0] }
 0x270   : > { %6047 = vmatpush.bf16.msrb.mxu2 %v9573_v33  ;;  %v7078_v33 = vld [vmem:[%s11004_s30 + $0x2d8] sm:$0xf0]  ;;  %v7065_v11 = vor.u32 %v9901_v53, %v7062_v54  ;;  %v9865_v42 = vld [vmem:[%s11004_s30 + $0x18c] sm:$0xf] }
 0x271   : > { %6061 = vmatpush.bf16.msrb.mxu3 %v9701_v28  ;;  %v6953_v28 = vor.u32 %v9873_v50, %v6950_v21  ;;  %v7081_v0 = vor.u32 %v9905_v45, %v7078_v33  ;;  %v6790_v62 = vld [vmem:[%s11004_s30 + $0x98] sm:$0xf0]  ;;  %v9897_v7 = vld [vmem:[%s11004_s30 + $0x28c] sm:$0xf] }
 0x272   : > { %6020 = vmatpush.bf16.msrb.mxu0 %v9301_v63  ;;  %v6934_v63 = vld [vmem:[%s11004_s30 + $0x1b8] sm:$0xf0]  ;;  %v9861_v6 = vld [vmem:[%s11004_s30 + $0x16c] sm:$0xf] }
 0x273   : > { %6034 = vmatpush.bf16.msrb.mxu1 %v9429_v20  ;;  %v9933_v20 = vld [vmem:[%s11004_s30 + $0x3ac] sm:$0xf]  ;;  %v6937_v61 = vor.u32 %v9869_v34, %v6934_v63  ;;  %v6918_v43 = vld [vmem:[%s11004_s30 + $0x198] sm:$0xf0] }
 0x274   : > { %6048 = vmatpush.bf16.msrb.mxu2 %v9557_v12  ;;  %v7190_v12 = vld [vmem:[%s11004_s30 + $0x3b8] sm:$0xf0]  ;;  %v6921_v49 = vor.u32 %v9865_v42, %v6918_v43  ;;  %v9925_v22 = vld [vmem:[%s11004_s30 + $0x36c] sm:$0xf] }
 0x275   : > { %6062 = vmatpush.bf16.msrb.mxu3 %v9685_v8  ;;  %v9833_v8 = vld [vmem:[%s11004_s30 + $0x8c] sm:$0xf]  ;;  %v7193_v47 = vor.u32 %v9933_v20, %v7190_v12  ;;  %v7046_v5 = vld [vmem:[%s11004_s30 + $0x298] sm:$0xf0] }
 0x276   : > { %6021 = vmatpush.bf16.msrb.mxu0 %v9285_v29  ;;  %v9929_v29 = vld [vmem:[%s11004_s30 + $0x38c] sm:$0xf]  ;;  %v7174_v57 = vld [vmem:[%s11004_s30 + $0x398] sm:$0xf0]  ;;  %v6793_v59 = vor.u32 %v9833_v8, %v6790_v62 }
 0x277   : > { %6035 = vmatpush.bf16.msrb.mxu1 %v9413_v27  ;;  %v7049_v27 = vor.u32 %v9897_v7, %v7046_v5  ;;  %v6774_v48 = vld [vmem:[%s11004_s30 + $0x78] sm:$0xf0]  ;;  %v9825_v45 = vld [vmem:[%s11004_s30 + $0x4c] sm:$0xf] }
 0x278   : > { %6049 = vmatpush.bf16.msrb.mxu2 %v9541_v13  ;;  %v9829_v13 = vld [vmem:[%s11004_s30 + $0x6c] sm:$0xf]  ;;  %v7158_v44 = vld [vmem:[%s11004_s30 + $0x378] sm:$0xf0] }
 0x279   : > { %6063 = vmatpush.bf16.msrb.mxu3 %v9669_v4  ;;  %6022 = vmatmul.bf16.vlgmr.msrb.gmra.mxu0 %v11465_v9  ;;  %v7177_v4 = vor.u32 %v9929_v29, %v7174_v57  ;;  %v6777_v50 = vor.u32 %v9829_v13, %v6774_v48  ;;  %v6758_v33 = vld [vmem:[%s11004_s30 + $0x58] sm:$0xf0]  ;;  %v9857_v16 = vld [vmem:[%s11004_s30 + $0x14c] sm:$0xf]  ;;  %v7161_v30 = vor.u32 %v9925_v22, %v7158_v44 }
 0x27a   : > { %6070 = vmatpush.bf16.msra.mxu0 %v6841_v2  ;;  %6036 = vmatmul.bf16.vlgmr.msrb.gmra.mxu1 %v11472_v15  ;;  %v6902_v2 = vld [vmem:[%s11004_s30 + $0x178] sm:$0xf0]  ;;  %v9921_v23 = vld [vmem:[%s11004_s30 + $0x34c] sm:$0xf]  ;;  %v6761_v34 = vor.u32 %v9825_v45, %v6758_v33 }
 0x27b   : > { %6084 = vmatpush.bf16.msra.mxu1 %v6969_v37  ;;  %6050 = vmatmul.bf16.vlgmr.msrb.gmra.mxu2 %v11470_v14  ;;  %v9893_v37 = vld [vmem:[%s11004_s30 + $0x26c] sm:$0xf]  ;;  %v7142_v3 = vld [vmem:[%s11004_s30 + $0x358] sm:$0xf0] }
 0x27c   : > { %6098 = vmatpush.bf16.msra.mxu2 %v7097_v52  ;;  %6064 = vmatmul.bf16.vlgmr.msrb.gmra.mxu3 %v11476_v19  ;;  %v7030_v52 = vld [vmem:[%s11004_s30 + $0x278] sm:$0xf0]  ;;  %v9821_v53 = vld [vmem:[%s11004_s30 + $0x2c] sm:$0xf]  ;;  %v7145_v12 = vor.u32 %v9921_v23, %v7142_v3 }
 0x27d   : > { %6112 = vmatpush.bf16.msra.mxu3 %v7225_v26  ;;  %v6905_v26 = vor.u32 %v9861_v6, %v6902_v2  ;;  %v7033_v21 = vor.u32 %v9893_v37, %v7030_v52  ;;  %v6742_v54 = vld [vmem:[%s11004_s30 + $0x38] sm:$0xf0]  ;;  %v9853_v20 = vld [vmem:[%s11004_s30 + $0x12c] sm:$0xf] }
 0x27e   : > { %6071 = vmatpush.bf16.msra.mxu0 %v6825_v18  ;;  %v6886_v18 = vld [vmem:[%s11004_s30 + $0x158] sm:$0xf0]  ;;  %v9917_v8 = vld [vmem:[%s11004_s30 + $0x32c] sm:$0xf]  ;;  %v6745_v42 = vor.u32 %v9821_v53, %v6742_v54 }
 0x27f   : > { %6085 = vmatpush.bf16.msra.mxu1 %v6953_v28  ;;  %v9889_v28 = vld [vmem:[%s11004_s30 + $0x24c] sm:$0xf]  ;;  %v7126_v62 = vld [vmem:[%s11004_s30 + $0x338] sm:$0xf0] }
 0x280   : > { %6099 = vmatpush.bf16.msra.mxu2 %v7081_v0  ;;  %v7014_v0 = vld [vmem:[%s11004_s30 + $0x258] sm:$0xf0]  ;;  %v9849_v29 = vld [vmem:[%s11004_s30 + $0x10c] sm:$0xf] }
 0x281   : > { %6113 = vmatpush.bf16.msra.mxu3 %v7209_v25  ;;  %v6889_v25 = vor.u32 %v9857_v16, %v6886_v18  ;;  %v7017_v63 = vor.u32 %v9889_v28, %v7014_v0  ;;  %v6726_v43 = vld [vmem:[%s11004_s30 + $0x18] sm:$0xf0]  ;;  %v9913_v13 = vld [vmem:[%s11004_s30 + $0x30c] sm:$0xf] }
 0x282   : > { %6072 = vmatpush.bf16.msra.mxu0 %v6809_v24  ;;  %v6870_v24 = vld [vmem:[%s11004_s30 + $0x138] sm:$0xf0]  ;;  %v9973_v6 = vld [vmem:[%s11004_s30 + $0x4ec] sm:$0xf] }
 0x283   : > { %6086 = vmatpush.bf16.msra.mxu1 %v6937_v61  ;;  %v9885_v61 = vld [vmem:[%s11004_s30 + $0x22c] sm:$0xf]  ;;  %v6873_v7 = vor.u32 %v9853_v20, %v6870_v24  ;;  %v6854_v57 = vld [vmem:[%s11004_s30 + $0x118] sm:$0xf0] }
 0x284   : > { %6100 = vmatpush.bf16.msra.mxu2 %v7065_v11  ;;  %v6998_v11 = vld [vmem:[%s11004_s30 + $0x238] sm:$0xf0]  ;;  %v10005_v2 = vld [vmem:[%s11004_s30 + $0x5ec] sm:$0xf] }
 0x285   : > { %6114 = vmatpush.bf16.msra.mxu3 %v7193_v47  ;;  %v9817_v47 = vld [vmem:[%s11004_s30 + $0xc] sm:$0xf]  ;;  %v7001_v5 = vor.u32 %v9885_v61, %v6998_v11  ;;  %v7110_v48 = vld [vmem:[%s11004_s30 + $0x318] sm:$0xf0] }
 0x286   : > { %6073 = vmatpush.bf16.msra.mxu0 %v6793_v59  ;;  %v9881_v59 = vld [vmem:[%s11004_s30 + $0x20c] sm:$0xf]  ;;  %v6729_v37 = vor.u32 %v9817_v47, %v6726_v43  ;;  %v7478_v52 = vld [vmem:[%s11004_s30 + $0x5f8] sm:$0xf0]  ;;  %v7113_v33 = vor.u32 %v9913_v13, %v7110_v48 }
 0x287   : > { %6087 = vmatpush.bf16.msra.mxu1 %v6921_v49  ;;  %v7129_v49 = vor.u32 %v9917_v8, %v7126_v62  ;;  %v10037_v22 = vld [vmem:[%s11004_s30 + $0x6ec] sm:$0xf]  ;;  %v7606_v44 = vld [vmem:[%s11004_s30 + $0x6f8] sm:$0xf0] }
 0x288   : > { %6101 = vmatpush.bf16.msra.mxu2 %v7049_v27  ;;  %v6982_v27 = vld [vmem:[%s11004_s30 + $0x218] sm:$0xf0]  ;;  %v7609_v18 = vor.u32 %v10037_v22, %v7606_v44  ;;  %v9969_v28 = vld [vmem:[%s11004_s30 + $0x4cc] sm:$0xf] }
 0x289   : > { %6115 = vmatpush.bf16.msra.mxu3 %v7177_v4  ;;  %v7350_v4 = vld [vmem:[%s11004_s30 + $0x4f8] sm:$0xf0]  ;;  %v10001_v23 = vld [vmem:[%s11004_s30 + $0x5cc] sm:$0xf] }
 0x28a   : > { %6074 = vmatpush.bf16.msra.mxu0 %v6777_v50  ;;  %v6857_v50 = vor.u32 %v9849_v29, %v6854_v57  ;;  %v7734_v45 = vld [vmem:[%s11004_s30 + $0x7f8] sm:$0xf0]  ;;  %v7353_v16 = vor.u32 %v9973_v6, %v7350_v4  ;;  %v10065_v53 = vld [vmem:[%s11004_s30 + $0x7cc] sm:$0xf]  ;;  %v12592_v57 = vpop.f32.mrf.mxu0 }
 0x28b   : > { %6088 = vmatpush.bf16.msra.mxu1 %v6905_v26  ;;  %v6985_v26 = vor.u32 %v9881_v59, %v6982_v27  ;;  %v7334_v0 = vld [vmem:[%s11004_s30 + $0x4d8] sm:$0xf0]  ;;  %v9965_v61 = vld [vmem:[%s11004_s30 + $0x4ac] sm:$0xf] }
 0x28c   : > { %6102 = vmatpush.bf16.msra.mxu2 %v7033_v21  ;;  %v10069_v21 = vld [vmem:[%s11004_s30 + $0x7ec] sm:$0xf]  ;;  %v7718_v54 = vld [vmem:[%s11004_s30 + $0x7d8] sm:$0xf0]  ;;  %v7337_v20 = vor.u32 %v9969_v28, %v7334_v0  ;;  %v12612_v28 = vpop.f32.mrf.mxu2 }
 0x28d   : > { %6116 = vmatpush.bf16.msra.mxu3 %v7161_v30  ;;  %v7481_v30 = vor.u32 %v10005_v2, %v7478_v52  ;;  %v7737_v3 = vor.u32 %v10069_v21, %v7734_v45  ;;  %v7318_v11 = vld [vmem:[%s11004_s30 + $0x4b8] sm:$0xf0]  ;;  %v9997_v8 = vld [vmem:[%s11004_s30 + $0x5ac] sm:$0xf]  ;;  %v7721_v62 = vor.u32 %v10065_v53, %v7718_v54 }
 0x28e   : > { %6075 = vmatpush.bf16.msra.mxu0 %v6761_v34  ;;  %v7462_v34 = vld [vmem:[%s11004_s30 + $0x5d8] sm:$0xf0]  ;;  %v10029_v47 = vld [vmem:[%s11004_s30 + $0x6ac] sm:$0xf]  ;;  %v7321_v29 = vor.u32 %v9965_v61, %v7318_v11 }
 0x28f   : > { %6089 = vmatpush.bf16.msra.mxu1 %v6889_v25  ;;  %v10033_v25 = vld [vmem:[%s11004_s30 + $0x6cc] sm:$0xf]  ;;  %v7574_v43 = vld [vmem:[%s11004_s30 + $0x6b8] sm:$0xf0] }
 0x290   : > { %6103 = vmatpush.bf16.msra.mxu2 %v7017_v63  ;;  %v7590_v63 = vld [vmem:[%s11004_s30 + $0x6d8] sm:$0xf0]  ;;  %v7577_v59 = vor.u32 %v10029_v47, %v7574_v43  ;;  %v10057_v4 = vld [vmem:[%s11004_s30 + $0x78c] sm:$0xf] }
 0x291   : > { %6117 = vmatpush.bf16.msra.mxu3 %v7145_v12  ;;  %v7465_v12 = vor.u32 %v10001_v23, %v7462_v34  ;;  %v7593_v24 = vor.u32 %v10033_v25, %v7590_v63  ;;  %v7302_v27 = vld [vmem:[%s11004_s30 + $0x498] sm:$0xf0]  ;;  %v9957_v44 = vld [vmem:[%s11004_s30 + $0x46c] sm:$0xf]  ;;  %v12614_v23 = vpop.f32.mrf.mxu3 }
 0x292   : > { %6076 = vmatpush.bf16.msra.mxu0 %v6745_v42  ;;  %v7446_v42 = vld [vmem:[%s11004_s30 + $0x5b8] sm:$0xf0]  ;;  %v9953_v25 = vld [vmem:[%s11004_s30 + $0x44c] sm:$0xf]  ;;  %v12622_v61 = vpop.f32.mrf.mxu0 }
 0x293   : > { %6090 = vmatpush.bf16.msra.mxu1 %v6873_v7  ;;  %v10061_v7 = vld [vmem:[%s11004_s30 + $0x7ac] sm:$0xf]  ;;  %v7430_v48 = vld [vmem:[%s11004_s30 + $0x598] sm:$0xf0] }
 0x294   : > { %6104 = vmatpush.bf16.msra.mxu2 %v7001_v5  ;;  %v7702_v5 = vld [vmem:[%s11004_s30 + $0x7b8] sm:$0xf0]  ;;  %v9985_v53 = vld [vmem:[%s11004_s30 + $0x54c] sm:$0xf] }
 0x295   : > { %6118 = vmatpush.bf16.msra.mxu3 %v7129_v49  ;;  %v9961_v49 = vld [vmem:[%s11004_s30 + $0x48c] sm:$0xf]  ;;  %v7705_v13 = vor.u32 %v10061_v7, %v7702_v5  ;;  %v7558_v6 = vld [vmem:[%s11004_s30 + $0x698] sm:$0xf0] }
 0x296   : > { %6077 = vmatpush.bf16.msra.mxu0 %v6729_v37  ;;  %v7686_v2 = vld [vmem:[%s11004_s30 + $0x798] sm:$0xf0]  ;;  %v7305_v37 = vor.u32 %v9961_v49, %v7302_v27  ;;  %v10049_v11 = vld [vmem:[%s11004_s30 + $0x74c] sm:$0xf] }
 0x297   : > { %6091 = vmatpush.bf16.msra.mxu1 %v6857_v50  ;;  %v7286_v50 = vld [vmem:[%s11004_s30 + $0x478] sm:$0xf0]  ;;  %v7689_v21 = vor.u32 %v10057_v4, %v7686_v2  ;;  %v9949_v7 = vld [vmem:[%s11004_s30 + $0x42c] sm:$0xf] }
 0x298   : > { %6105 = vmatpush.bf16.msra.mxu2 %v6985_v26  ;;  %v9989_v26 = vld [vmem:[%s11004_s30 + $0x56c] sm:$0xf]  ;;  %v7414_v45 = vld [vmem:[%s11004_s30 + $0x578] sm:$0xf0]  ;;  %v7289_v0 = vor.u32 %v9957_v44, %v7286_v50  ;;  %v12641_v44 = vpop.f32.mrf.mxu2 }
 0x299   : > { %6119 = vmatpush.bf16.msra.mxu3 %v7113_v33  ;;  %6078 = vmatmul.bf16.vlgmr.msra.gmra.mxu0 %v11092_v58  ;;  %v7449_v58 = vor.u32 %v9997_v8, %v7446_v42  ;;  %v10021_v33 = vld [vmem:[%s11004_s30 + $0x66c] sm:$0xf]  ;;  %v7270_v63 = vld [vmem:[%s11004_s30 + $0x458] sm:$0xf0] }
 0x29a   : > { %6126 = vmatpush.bf16.msrb.mxu0 %v7353_v16  ;;  %6092 = vmatmul.bf16.vlgmr.msra.gmra.mxu1 %v11104_v10  ;;  %v12597_v10 = vpop.f32.mrf.mxu1  ;;  %v7542_v16 = vld [vmem:[%s11004_s30 + $0x678] sm:$0xf0]  ;;  %v7273_v42 = vor.u32 %v9953_v25, %v7270_v63  ;;  %v10013_v49 = vld [vmem:[%s11004_s30 + $0x62c] sm:$0xf]  ;;  %v12654_v63 = vpop.f32.mrf.mxu0 }
 0x29b   : > { %6140 = vmatpush.bf16.msrb.mxu1 %v7481_v30  ;;  %6106 = vmatmul.bf16.vlgmr.msra.gmra.mxu2 %v11097_v1  ;;  %v9993_v1 = vld [vmem:[%s11004_s30 + $0x58c] sm:$0xf]  ;;  %v7545_v34 = vor.u32 %v10021_v33, %v7542_v16  ;;  %v7654_v8 = vld [vmem:[%s11004_s30 + $0x758] sm:$0xf0]  ;;  %v12646_v33 = vpop.f32.mrf.mxu3 }
 0x29c   : > { %6154 = vmatpush.bf16.msrb.mxu2 %v7609_v18  ;;  %6120 = vmatmul.bf16.vlgmr.msra.gmra.mxu3 %v11109_v17  ;;  %v10025_v17 = vld [vmem:[%s11004_s30 + $0x68c] sm:$0xf]  ;;  %v7433_v52 = vor.u32 %v9993_v1, %v7430_v48  ;;  %v7670_v18 = vld [vmem:[%s11004_s30 + $0x778] sm:$0xf0] }
 0x29d   : > { %6168 = vmatpush.bf16.msrb.mxu3 %v7737_v3  ;;  %v7561_v22 = vor.u32 %v10025_v17, %v7558_v6  ;;  %v10053_v30 = vld [vmem:[%s11004_s30 + $0x76c] sm:$0xf]  ;;  %v7417_v3 = vor.u32 %v9989_v26, %v7414_v45  ;;  %v7254_v5 = vld [vmem:[%s11004_s30 + $0x438] sm:$0xf0] }
 0x29e   : > { %6127 = vmatpush.bf16.msrb.mxu0 %v7337_v20  ;;  %v7673_v54 = vor.u32 %v10053_v30, %v7670_v18  ;;  %v7398_v20 = vld [vmem:[%s11004_s30 + $0x558] sm:$0xf0]  ;;  %v10045_v1 = vld [vmem:[%s11004_s30 + $0x72c] sm:$0xf]  ;;  %v7257_v48 = vor.u32 %v9949_v7, %v7254_v5 }
 0x29f   : > { %6141 = vmatpush.bf16.msrb.mxu1 %v7465_v12  ;;  %v10017_v12 = vld [vmem:[%s11004_s30 + $0x64c] sm:$0xf]  ;;  %v7401_v47 = vor.u32 %v9985_v53, %v7398_v20  ;;  %v7510_v27 = vld [vmem:[%s11004_s30 + $0x638] sm:$0xf0] }
 0x2a0   : > { %6155 = vmatpush.bf16.msrb.mxu2 %v7593_v24  ;;  %v7526_v24 = vld [vmem:[%s11004_s30 + $0x658] sm:$0xf0]  ;;  %v9945_v17 = vld [vmem:[%s11004_s30 + $0x40c] sm:$0xf]  ;;  %v7513_v2 = vor.u32 %v10013_v49, %v7510_v27 }
 0x2a1   : > { %6169 = vmatpush.bf16.msrb.mxu3 %v7721_v62  ;;  %v7529_v43 = vor.u32 %v10017_v12, %v7526_v24  ;;  %v7238_v6 = vld [vmem:[%s11004_s30 + $0x418] sm:$0xf0]  ;;  %v10101_v16 = vld [vmem:[%s11004_s30 + $0x8ec] sm:$0xf] }
 0x2a2   : > { %6128 = vmatpush.bf16.msrb.mxu0 %v7321_v29  ;;  %v12626_v62 = vpop.f32.mrf.mxu1  ;;  %v9981_v29 = vld [vmem:[%s11004_s30 + $0x52c] sm:$0xf]  ;;  %v7494_v26 = vld [vmem:[%s11004_s30 + $0x618] sm:$0xf0] }
 0x2a3   : > { %6142 = vmatpush.bf16.msrb.mxu1 %v7449_v58  ;;  %v7657_v58 = vor.u32 %v10049_v11, %v7654_v8  ;;  %v7622_v45 = vld [vmem:[%s11004_s30 + $0x718] sm:$0xf0]  ;;  %v10133_v18 = vld [vmem:[%s11004_s30 + $0x9ec] sm:$0xf] }
 0x2a4   : > { %6156 = vmatpush.bf16.msrb.mxu2 %v7577_v59  ;;  %v7382_v59 = vld [vmem:[%s11004_s30 + $0x538] sm:$0xf0]  ;;  %v10197_v20 = vld [vmem:[%s11004_s30 + $0xbec] sm:$0xf] }
 0x2a5   : > { %6170 = vmatpush.bf16.msrb.mxu3 %v7705_v13  ;;  %v7638_v13 = vld [vmem:[%s11004_s30 + $0x738] sm:$0xf0]  ;;  %v7385_v4 = vor.u32 %v9981_v29, %v7382_v59  ;;  %v10129_v5 = vld [vmem:[%s11004_s30 + $0x9cc] sm:$0xf] }
 0x2a6   : > { %6129 = vmatpush.bf16.msrb.mxu0 %v7305_v37  ;;  %v9977_v37 = vld [vmem:[%s11004_s30 + $0x50c] sm:$0xf]  ;;  %v7641_v50 = vor.u32 %v10045_v1, %v7638_v13  ;;  %v7862_v30 = vld [vmem:[%s11004_s30 + $0x8f8] sm:$0xf0] }
 0x2a7   : > { %6143 = vmatpush.bf16.msrb.mxu1 %v7433_v52  ;;  %v7366_v52 = vld [vmem:[%s11004_s30 + $0x518] sm:$0xf0]  ;;  %v7865_v8 = vor.u32 %v10101_v16, %v7862_v30  ;;  %v10161_v59 = vld [vmem:[%s11004_s30 + $0xacc] sm:$0xf]  ;;  %v13078_v16 = vld [vmem:[#allocation14_spill] sm:$0xff] }
 0x2a8   : > { %6157 = vmatpush.bf16.msrb.mxu2 %v7561_v22  ;;  %v10009_v22 = vld [vmem:[%s11004_s30 + $0x60c] sm:$0xf]  ;;  %v8118_v25 = vld [vmem:[%s11004_s30 + $0xaf8] sm:$0xf0]  ;;  %v7369_v53 = vor.u32 %v9977_v37, %v7366_v52  ;;  %v12671_v37 = vpop.f32.mrf.mxu2 }
 0x2a9   : > { %6171 = vmatpush.bf16.msrb.mxu3 %v7689_v21  ;;  %v10041_v21 = vld [vmem:[%s11004_s30 + $0x70c] sm:$0xf]  ;;  %v8246_v12 = vld [vmem:[%s11004_s30 + $0xbf8] sm:$0xf0] }
 0x2aa   : > { %6130 = vmatpush.bf16.msrb.mxu0 %v7289_v0  ;;  %v7241_v0 = vor.u32 %v9945_v17, %v7238_v6  ;;  %v12658_v24 = vpop.f32.mrf.mxu1  ;;  %v7625_v11 = vor.u32 %v10041_v21, %v7622_v45  ;;  %v7846_v7 = vld [vmem:[%s11004_s30 + $0x8d8] sm:$0xf0]  ;;  %v8249_v29 = vor.u32 %v10197_v20, %v8246_v12  ;;  %v10193_v27 = vld [vmem:[%s11004_s30 + $0xbcc] sm:$0xf]  ;;  %v12677_v21 = vpop.f32.mrf.mxu3 }
 0x2ab   : > { %6144 = vmatpush.bf16.msrb.mxu1 %v7417_v3  ;;  %v7990_v3 = vld [vmem:[%s11004_s30 + $0x9f8] sm:$0xf0]  ;;  %v10093_v6 = vld [vmem:[%s11004_s30 + $0x8ac] sm:$0xf] }
 0x2ac   : > { %6158 = vmatpush.bf16.msrb.mxu2 %v7545_v34  ;;  %v10165_v34 = vld [vmem:[%s11004_s30 + $0xaec] sm:$0xf]  ;;  %v8102_v49 = vld [vmem:[%s11004_s30 + $0xad8] sm:$0xf0] }
 0x2ad   : > { %6172 = vmatpush.bf16.msrb.mxu3 %v7673_v54  ;;  %v7497_v54 = vor.u32 %v10009_v22, %v7494_v26  ;;  %v8230_v1 = vld [vmem:[%s11004_s30 + $0xbd8] sm:$0xf0]  ;;  %v8105_v17 = vor.u32 %v10161_v59, %v8102_v49  ;;  %v13077_v45 = vld [vmem:[#allocation13_spill] sm:$0xff] }
 0x2ae   : > { %6131 = vmatpush.bf16.msrb.mxu0 %v7273_v42  ;;  %v7993_v42 = vor.u32 %v10133_v18, %v7990_v3  ;;  %v8233_v52 = vor.u32 %v10193_v27, %v8230_v1  ;;  %v7958_v22 = vld [vmem:[%s11004_s30 + $0x9b8] sm:$0xf0]  ;;  %v10189_v30 = vld [vmem:[%s11004_s30 + $0xbac] sm:$0xf]  ;;  %v12684_v3 = vpop.f32.mrf.mxu0 }
 0x2af   : > { %6145 = vmatpush.bf16.msrb.mxu1 %v7401_v47  ;;  %v8121_v47 = vor.u32 %v10165_v34, %v8118_v25  ;;  %v8086_v26 = vld [vmem:[%s11004_s30 + $0xab8] sm:$0xf0]  ;;  %v10121_v20 = vld [vmem:[%s11004_s30 + $0x98c] sm:$0xf] }
 0x2b0   : > { %6159 = vmatpush.bf16.msrb.mxu2 %v7529_v43  ;;  %v10097_v43 = vld [vmem:[%s11004_s30 + $0x8cc] sm:$0xf]  ;;  %v8214_v18 = vld [vmem:[%s11004_s30 + $0xbb8] sm:$0xf0] }
 0x2b1   : > { %6173 = vmatpush.bf16.msrb.mxu3 %v7657_v58  ;;  %v7974_v58 = vld [vmem:[%s11004_s30 + $0x9d8] sm:$0xf0]  ;;  %v7849_v13 = vor.u32 %v10097_v43, %v7846_v7  ;;  %v5758_v43 = vadd.f32 %v12597_v10, %v12592_v57  ;;  %v10185_v7 = vld [vmem:[%s11004_s30 + $0xb8c] sm:$0xf] }
 0x2b2   : > { %6132 = vmatpush.bf16.msrb.mxu0 %v7257_v48  ;;  %v7977_v48 = vor.u32 %v10129_v5, %v7974_v58  ;;  %v12689_v12 = vpop.f32.mrf.mxu1  ;;  %v8198_v5 = vld [vmem:[%s11004_s30 + $0xb98] sm:$0xf0]  ;;  %v10085_v49 = vld [vmem:[%s11004_s30 + $0x86c] sm:$0xf] }
 0x2b3   : > { %6146 = vmatpush.bf16.msrb.mxu1 %v7385_v4  ;;  %v7830_v4 = vld [vmem:[%s11004_s30 + $0x8b8] sm:$0xf0]  ;;  %v10117_v1 = vld [vmem:[%s11004_s30 + $0x96c] sm:$0xf] }
 0x2b4   : > { %6160 = vmatpush.bf16.msrb.mxu2 %v7513_v2  ;;  %v10125_v2 = vld [vmem:[%s11004_s30 + $0x9ac] sm:$0xf]  ;;  %v7798_v27 = vld [vmem:[%s11004_s30 + $0x878] sm:$0xf0] }
 0x2b5   : > { %6174 = vmatpush.bf16.msrb.mxu3 %v7641_v50  ;;  %v10157_v50 = vld [vmem:[%s11004_s30 + $0xaac] sm:$0xf]  ;;  %v7961_v34 = vor.u32 %v10125_v2, %v7958_v22  ;;  %v8054_v10 = vld [vmem:[%s11004_s30 + $0xa78] sm:$0xf0]  ;;  %v12707_v2 = vpop.f32.mrf.mxu2  ;;  %v12709_v22 = vpop.f32.mrf.mxu3 }
 0x2b6   : > { %6133 = vmatpush.bf16.msrb.mxu0 %v7241_v0  ;;  %v13079_v0 = vld [vmem:[#allocation15_spill] sm:$0xff]  ;;  %v8089_v25 = vor.u32 %v10157_v50, %v8086_v26  ;;  %v10149_v57 = vld [vmem:[%s11004_s30 + $0xa6c] sm:$0xf]  ;;  %v12711_v50 = vpop.f32.mrf.mxu0 }
 0x2b7   : > { %6147 = vmatpush.bf16.msrb.mxu1 %v7369_v53  ;;  %v10089_v53 = vld [vmem:[%s11004_s30 + $0x88c] sm:$0xf] }
 0x2b8   : > { %6161 = vmatpush.bf16.msrb.mxu2 %v7497_v54  ;;  %v7814_v54 = vld [vmem:[%s11004_s30 + $0x898] sm:$0xf0] }
 0x2b9   : > { %6175 = vmatpush.bf16.msrb.mxu3 %v7625_v11  ;;  %6134 = vmatmul.bf16.vlgmr.msrb.gmra.mxu0 %v11161_v39  ;;  %v7833_v39 = vor.u32 %v10093_v6, %v7830_v4  ;;  %v8217_v11 = vor.u32 %v10189_v30, %v8214_v18  ;;  %v10181_v6 = vld [vmem:[%s11004_s30 + $0xb6c] sm:$0xf]  ;;  %v8182_v4 = vld [vmem:[%s11004_s30 + $0xb78] sm:$0xf0] }
 0x2ba   : > { %6182 = vmatpush.bf16.msra.mxu0 %v7865_v8  ;;  %6148 = vmatmul.bf16.vlgmr.msrb.gmra.mxu1 %v13078_v16  ;;  %v7942_v8 = vld [vmem:[%s11004_s30 + $0x998] sm:$0xf0]  ;;  %v10113_v30 = vld [vmem:[%s11004_s30 + $0x94c] sm:$0xf]  ;;  %v12716_v18 = vpop.f32.mrf.mxu1 }
 0x2bb   : > { %6196 = vmatpush.bf16.msra.mxu1 %v7993_v42  ;;  %6162 = vmatmul.bf16.vlgmr.msrb.gmra.mxu2 %v13077_v45  ;;  %v10153_v42 = vld [vmem:[%s11004_s30 + $0xa8c] sm:$0xf]  ;;  %v7945_v58 = vor.u32 %v10121_v20, %v7942_v8  ;;  %v8057_v45 = vor.u32 %v10149_v57, %v8054_v10  ;;  %v7782_v16 = vld [vmem:[%s11004_s30 + $0x858] sm:$0xf0] }
 0x2bc   : > { %6210 = vmatpush.bf16.msra.mxu2 %v8121_v47  ;;  %6176 = vmatmul.bf16.vlgmr.msrb.gmra.mxu3 %v13079_v0  ;;  %v8070_v47 = vld [vmem:[%s11004_s30 + $0xa98] sm:$0xf0]  ;;  %v8185_v0 = vor.u32 %v10181_v6, %v8182_v4  ;;  %v10137_v4 = vld [vmem:[%s11004_s30 + $0xa0c] sm:$0xf] }
 0x2bd   : > { %6224 = vmatpush.bf16.msra.mxu3 %v8249_v29  ;;  %v7817_v29 = vor.u32 %v10089_v53, %v7814_v54  ;;  %v8073_v59 = vor.u32 %v10153_v42, %v8070_v47  ;;  %v10177_v54 = vld [vmem:[%s11004_s30 + $0xb4c] sm:$0xf]  ;;  %v8166_v20 = vld [vmem:[%s11004_s30 + $0xb58] sm:$0xf0]  ;;  %v12739_v57 = vpop.f32.mrf.mxu3 }
 0x2be   : > { %6183 = vmatpush.bf16.msra.mxu0 %v7849_v13  ;;  %v8201_v13 = vor.u32 %v10185_v7, %v8198_v5  ;;  %v10077_v47 = vld [vmem:[%s11004_s30 + $0x82c] sm:$0xf]  ;;  %v8169_v5 = vor.u32 %v10177_v54, %v8166_v20  ;;  %v7878_v6 = vld [vmem:[%s11004_s30 + $0x918] sm:$0xf0] }
 0x2bf   : > { %6197 = vmatpush.bf16.msra.mxu1 %v7977_v48  ;;  %v7926_v48 = vld [vmem:[%s11004_s30 + $0x978] sm:$0xf0]  ;;  %v10109_v7 = vld [vmem:[%s11004_s30 + $0x92c] sm:$0xf] }
 0x2c0   : > { %6211 = vmatpush.bf16.msra.mxu2 %v8105_v17  ;;  %v5772_v17 = vadd.f32 %v12612_v28, %v5758_v43  ;;  %v7929_v26 = vor.u32 %v10117_v1, %v7926_v48  ;;  %v10081_v28 = vld [vmem:[%s11004_s30 + $0x84c] sm:$0xf]  ;;  %v7766_v43 = vld [vmem:[%s11004_s30 + $0x838] sm:$0xf0] }
 0x2c1   : > { %6225 = vmatpush.bf16.msra.mxu3 %v8233_v52  ;;  %v7801_v52 = vor.u32 %v10085_v49, %v7798_v27  ;;  %v10173_v27 = vld [vmem:[%s11004_s30 + $0xb2c] sm:$0xf]  ;;  %v8150_v1 = vld [vmem:[%s11004_s30 + $0xb38] sm:$0xf0]  ;;  %v7769_v48 = vor.u32 %v10077_v47, %v7766_v43 }
 0x2c2   : > { %6184 = vmatpush.bf16.msra.mxu0 %v7833_v39  ;;  %v7910_v39 = vld [vmem:[%s11004_s30 + $0x958] sm:$0xf0]  ;;  %v5786_v53 = vadd.f32 %v12614_v23, %v5772_v17  ;;  %v5760_v23 = vadd.f32 %v12626_v62, %v12622_v61  ;;  %v10073_v61 = vld [vmem:[%s11004_s30 + $0x80c] sm:$0xf] }
 0x2c3   : > { %6198 = vmatpush.bf16.msra.mxu1 %v7961_v34  ;;  %v10145_v34 = vld [vmem:[%s11004_s30 + $0xa4c] sm:$0xf]  ;;  %v7913_v8 = vor.u32 %v10113_v30, %v7910_v39  ;;  %v7750_v62 = vld [vmem:[%s11004_s30 + $0x818] sm:$0xf0] }
 0x2c4   : > { %6212 = vmatpush.bf16.msra.mxu2 %v8089_v25  ;;  %v8038_v25 = vld [vmem:[%s11004_s30 + $0xa58] sm:$0xf0]  ;;  %v5800_v49 = vadd.f32 %v12654_v63, %v5786_v53  ;;  %v10105_v17 = vld [vmem:[%s11004_s30 + $0x90c] sm:$0xf]  ;;  %v12754_v53 = vpop.f32.mrf.mxu1  ;;  %v7753_v54 = vor.u32 %v10073_v61, %v7750_v62 }
 0x2c5   : > { %6226 = vmatpush.bf16.msra.mxu3 %v8217_v11  ;;  %v7785_v11 = vor.u32 %v10081_v28, %v7782_v16  ;;  %v8041_v42 = vor.u32 %v10145_v34, %v8038_v25  ;;  %v10169_v28 = vld [vmem:[%s11004_s30 + $0xb0c] sm:$0xf]  ;;  %v8134_v16 = vld [vmem:[%s11004_s30 + $0xb18] sm:$0xf0] }
 0x2c6   : > { %6185 = vmatpush.bf16.msra.mxu0 %v7817_v29  ;;  %v7894_v29 = vld [vmem:[%s11004_s30 + $0x938] sm:$0xf0]  ;;  %v5814_v30 = vadd.f32 %v12658_v24, %v5800_v49  ;;  %v10229_v39 = vld [vmem:[%s11004_s30 + $0xcec] sm:$0xf] }
 0x2c7   : > { %6199 = vmatpush.bf16.msra.mxu1 %v7945_v58  ;;  %v10141_v58 = vld [vmem:[%s11004_s30 + $0xa2c] sm:$0xf]  ;;  %v7897_v10 = vor.u32 %v10109_v7, %v7894_v29  ;;  %v8374_v34 = vld [vmem:[%s11004_s30 + $0xcf8] sm:$0xf0]  ;;  %v8137_v7 = vor.u32 %v10169_v28, %v8134_v16 }
 0x2c8   : > { %6213 = vmatpush.bf16.msra.mxu2 %v8073_v59  ;;  %v8022_v59 = vld [vmem:[%s11004_s30 + $0xa38] sm:$0xf0]  ;;  %v10261_v25 = vld [vmem:[%s11004_s30 + $0xdec] sm:$0xf] }
 0x2c9   : > { %6227 = vmatpush.bf16.msra.mxu3 %v8201_v13  ;;  %v12735_v13 = vpop.f32.mrf.mxu2  ;;  %v8025_v63 = vor.u32 %v10141_v58, %v8022_v59  ;;  %v10293_v20 = vld [vmem:[%s11004_s30 + $0xeec] sm:$0xf]  ;;  %v8758_v47 = vld [vmem:[%s11004_s30 + $0xff8] sm:$0xf0] }
 0x2ca   : > { %6186 = vmatpush.bf16.msra.mxu0 %v7801_v52  ;;  %v5774_v52 = vadd.f32 %v12641_v44, %v5760_v23  ;;  %v8502_v44 = vld [vmem:[%s11004_s30 + $0xdf8] sm:$0xf0]  ;;  %v8377_v23 = vor.u32 %v10229_v39, %v8374_v34  ;;  %v10225_v59 = vld [vmem:[%s11004_s30 + $0xccc] sm:$0xf] }
 0x2cb   : > { %6200 = vmatpush.bf16.msra.mxu1 %v7929_v26  ;;  %v8153_v26 = vor.u32 %v10173_v27, %v8150_v1  ;;  %v8505_v29 = vor.u32 %v10261_v25, %v8502_v44  ;;  %v8358_v49 = vld [vmem:[%s11004_s30 + $0xcd8] sm:$0xf0]  ;;  %v10257_v27 = vld [vmem:[%s11004_s30 + $0xdcc] sm:$0xf] }
 0x2cc   : > { %6214 = vmatpush.bf16.msra.mxu2 %v8057_v45  ;;  %v8006_v45 = vld [vmem:[%s11004_s30 + $0xa18] sm:$0xf0]  ;;  %v5788_v43 = vadd.f32 %v12646_v33, %v5774_v52  ;;  %v10289_v62 = vld [vmem:[%s11004_s30 + $0xecc] sm:$0xf]  ;;  %v12783_v39 = vpop.f32.mrf.mxu1 }
 0x2cd   : > { %6228 = vmatpush.bf16.msra.mxu3 %v8185_v0  ;;  %v12749_v0 = vpop.f32.mrf.mxu0  ;;  %v8009_v24 = vor.u32 %v10137_v4, %v8006_v45  ;;  %v8486_v61 = vld [vmem:[%s11004_s30 + $0xdd8] sm:$0xf0]  ;;  %v10321_v33 = vld [vmem:[%s11004_s30 + $0xfcc] sm:$0xf] }
 0x2ce   : > { %6187 = vmatpush.bf16.msra.mxu0 %v7785_v11  ;;  %v8630_v11 = vld [vmem:[%s11004_s30 + $0xef8] sm:$0xf0]  ;;  %v5802_v1 = vadd.f32 %v12684_v3, %v5788_v43  ;;  %v8489_v52 = vor.u32 %v10257_v27, %v8486_v61  ;;  %v10221_v45 = vld [vmem:[%s11004_s30 + $0xcac] sm:$0xf] }
 0x2cf   : > { %6201 = vmatpush.bf16.msra.mxu1 %v7913_v8  ;;  %v7881_v8 = vor.u32 %v10105_v17, %v7878_v6  ;;  %v8633_v58 = vor.u32 %v10293_v20, %v8630_v11  ;;  %v8361_v17 = vor.u32 %v10225_v59, %v8358_v49  ;;  %v12775_v6 = vpop.f32.mrf.mxu3  ;;  %v8342_v28 = vld [vmem:[%s11004_s30 + $0xcb8] sm:$0xf0]  ;;  %v10253_v16 = vld [vmem:[%s11004_s30 + $0xdac] sm:$0xf] }
 0x2d0   : > { %6215 = vmatpush.bf16.msra.mxu2 %v8041_v42  ;;  %v10325_v42 = vld [vmem:[%s11004_s30 + $0xfec] sm:$0xf]  ;;  %v8470_v34 = vld [vmem:[%s11004_s30 + $0xdb8] sm:$0xf0]  ;;  %v8345_v11 = vor.u32 %v10221_v45, %v8342_v28 }
 0x2d1   : > { %6229 = vmatpush.bf16.msra.mxu3 %v8169_v5  ;;  %v5828_v5 = vadd.f32 %v12671_v37, %v5814_v30  ;;  %v12772_v37 = vpop.f32.mrf.mxu2  ;;  %v5816_v30 = vadd.f32 %v12689_v12, %v5802_v1  ;;  %v10285_v25 = vld [vmem:[%s11004_s30 + $0xeac] sm:$0xf]  ;;  %v8726_v20 = vld [vmem:[%s11004_s30 + $0xfb8] sm:$0xf0] }
 0x2d2   : > { %6188 = vmatpush.bf16.msra.mxu0 %v7769_v48  ;;  %v8761_v48 = vor.u32 %v10325_v42, %v8758_v47  ;;  %v10317_v12 = vld [vmem:[%s11004_s30 + $0xfac] sm:$0xf]  ;;  %v8454_v47 = vld [vmem:[%s11004_s30 + $0xd98] sm:$0xf0] }
 0x2d3   : > { %6202 = vmatpush.bf16.msra.mxu1 %v7897_v10  ;;  %v8614_v10 = vld [vmem:[%s11004_s30 + $0xed8] sm:$0xf0]  ;;  %v5842_v3 = vadd.f32 %v12677_v21, %v5828_v5  ;;  %v8729_v42 = vor.u32 %v10317_v12, %v8726_v20  ;;  %v10281_v43 = vld [vmem:[%s11004_s30 + $0xe8c] sm:$0xf] }
 0x2d4   : > { %6216 = vmatpush.bf16.msra.mxu2 %v8025_v63  ;;  %v8742_v63 = vld [vmem:[%s11004_s30 + $0xfd8] sm:$0xf0]  ;;  %v10213_v1 = vld [vmem:[%s11004_s30 + $0xc6c] sm:$0xf] }
 0x2d5   : > { %6230 = vmatpush.bf16.msra.mxu3 %v8153_v26  ;;  %v12777_v4 = vpop.f32.mrf.mxu0  ;;  %v8617_v26 = vor.u32 %v10289_v62, %v8614_v10  ;;  %v8745_v21 = vor.u32 %v10321_v33, %v8742_v63  ;;  %v5856_v44 = vadd.f32 %v12711_v50, %v5842_v3  ;;  %v8473_v50 = vor.u32 %v10253_v16, %v8470_v34  ;;  %v8438_v10 = vld [vmem:[%s11004_s30 + $0xd78] sm:$0xf0]  ;;  %v10209_v16 = vld [vmem:[%s11004_s30 + $0xc4c] sm:$0xf] }
 0x2d6   : > { %6189 = vmatpush.bf16.msra.mxu0 %v7753_v54  ;;  %v8598_v54 = vld [vmem:[%s11004_s30 + $0xeb8] sm:$0xf0]  ;;  %v10305_v20 = vld [vmem:[%s11004_s30 + $0xf4c] sm:$0xf] }
 0x2d7   : > { %6203 = vmatpush.bf16.msra.mxu1 %v7881_v8  ;;  %v8601_v8 = vor.u32 %v10285_v25, %v8598_v54  ;;  %v12809_v49 = vpop.f32.mrf.mxu3  ;;  %v8566_v33 = vld [vmem:[%s11004_s30 + $0xe78] sm:$0xf0] }
 0x2d8   : > { %6217 = vmatpush.bf16.msra.mxu2 %v8009_v24  ;;  %v8326_v24 = vld [vmem:[%s11004_s30 + $0xc98] sm:$0xf0] }
 0x2d9   : > { %6231 = vmatpush.bf16.msra.mxu3 %v8137_v7  ;;  %6190 = vmatmul.bf16.vlgmr.msra.gmra.mxu0 %v11237_v31  ;;  %v5830_v31 = vadd.f32 %v12707_v2, %v5816_v30  ;;  %v8582_v2 = vld [vmem:[%s11004_s30 + $0xe98] sm:$0xf0]  ;;  %v10313_v7 = vld [vmem:[%s11004_s30 + $0xf8c] sm:$0xf] }
 0x2da   : > { %6238 = vmatpush.bf16.msrb.mxu0 %v8377_v23  ;;  %6204 = vmatmul.bf16.vlgmr.msra.gmra.mxu1 %v11244_v36  ;;  %v10249_v36 = vld [vmem:[%s11004_s30 + $0xd8c] sm:$0xf]  ;;  %v8710_v23 = vld [vmem:[%s11004_s30 + $0xf98] sm:$0xf0]  ;;  %v8585_v27 = vor.u32 %v10281_v43, %v8582_v2 }
 0x2db   : > { %6252 = vmatpush.bf16.msrb.mxu1 %v8505_v29  ;;  %6218 = vmatmul.bf16.vlgmr.msra.gmra.mxu2 %v11242_v35  ;;  %v10217_v35 = vld [vmem:[%s11004_s30 + $0xc8c] sm:$0xf]  ;;  %v5844_v5 = vadd.f32 %v12709_v22, %v5830_v31  ;;  %v12806_v29 = vpop.f32.mrf.mxu2  ;;  %v8713_v62 = vor.u32 %v10313_v7, %v8710_v23  ;;  %v8694_v3 = vld [vmem:[%s11004_s30 + $0xf78] sm:$0xf0] }
 0x2dc   : > { %6266 = vmatpush.bf16.msrb.mxu2 %v8633_v58  ;;  %6232 = vmatmul.bf16.vlgmr.msra.gmra.mxu3 %v11248_v40  ;;  %v5870_v40 = vadd.f32 %v12716_v18, %v5856_v44  ;;  %v8329_v58 = vor.u32 %v10217_v35, %v8326_v24  ;;  %v8457_v18 = vor.u32 %v10249_v36, %v8454_v47  ;;  %v10245_v22 = vld [vmem:[%s11004_s30 + $0xd6c] sm:$0xf]  ;;  %v8294_v30 = vld [vmem:[%s11004_s30 + $0xc58] sm:$0xf0] }
 0x2dd   : > { %6280 = vmatpush.bf16.msrb.mxu3 %v8761_v48  ;;  %v8310_v48 = vld [vmem:[%s11004_s30 + $0xc78] sm:$0xf0]  ;;  %v5858_v61 = vadd.f32 %v12749_v0, %v5844_v5  ;;  %v12818_v63 = vpop.f32.mrf.mxu0  ;;  %v8441_v45 = vor.u32 %v10245_v22, %v8438_v10  ;;  %v10273_v44 = vld [vmem:[%s11004_s30 + $0xe4c] sm:$0xf] }
 0x2de   : > { %6239 = vmatpush.bf16.msrb.mxu0 %v8361_v17  ;;  %v5884_v59 = vadd.f32 %v12735_v13, %v5870_v40  ;;  %v10277_v13 = vld [vmem:[%s11004_s30 + $0xe6c] sm:$0xf]  ;;  %v8422_v54 = vld [vmem:[%s11004_s30 + $0xd58] sm:$0xf0] }
 0x2df   : > { %6253 = vmatpush.bf16.msrb.mxu1 %v8489_v52  ;;  %v10309_v17 = vld [vmem:[%s11004_s30 + $0xf6c] sm:$0xf]  ;;  %v12822_v52 = vpop.f32.mrf.mxu1  ;;  %v8569_v28 = vor.u32 %v10277_v13, %v8566_v33  ;;  %v5872_v34 = vadd.f32 %v12754_v53, %v5858_v61  ;;  %v8550_v12 = vld [vmem:[%s11004_s30 + $0xe58] sm:$0xf0]  ;;  %v12845_v40 = vpop.f32.mrf.mxu3 }
 0x2e0   : > { %6267 = vmatpush.bf16.msrb.mxu2 %v8617_v26  ;;  %v8313_v26 = vor.u32 %v10213_v1, %v8310_v48  ;;  %v5898_v0 = vadd.f32 %v12739_v57, %v5884_v59  ;;  %v8697_v25 = vor.u32 %v10309_v17, %v8694_v3  ;;  %v8678_v31 = vld [vmem:[%s11004_s30 + $0xf58] sm:$0xf0]  ;;  %v10205_v35 = vld [vmem:[%s11004_s30 + $0xc2c] sm:$0xf] }
 0x2e1   : > { %6281 = vmatpush.bf16.msrb.mxu3 %v8745_v21  ;;  %v10241_v21 = vld [vmem:[%s11004_s30 + $0xd4c] sm:$0xf]  ;;  %v8278_v24 = vld [vmem:[%s11004_s30 + $0xc38] sm:$0xf0] }
 0x2e2   : > { %6240 = vmatpush.bf16.msrb.mxu0 %v8345_v11  ;;  %v5912_v57 = vadd.f32 %v12777_v4, %v5898_v0  ;;  %v5886_v11 = vadd.f32 %v12772_v37, %v5872_v34  ;;  %v8425_v53 = vor.u32 %v10241_v21, %v8422_v54  ;;  %v10237_v36 = vld [vmem:[%s11004_s30 + $0xd2c] sm:$0xf]  ;;  %v8406_v47 = vld [vmem:[%s11004_s30 + $0xd38] sm:$0xf0] }
 0x2e3   : > { %6254 = vmatpush.bf16.msrb.mxu1 %v8473_v50  ;;  %v8297_v50 = vor.u32 %v10209_v16, %v8294_v30  ;;  %v12839_v4 = vpop.f32.mrf.mxu2  ;;  %v10269_v43 = vld [vmem:[%s11004_s30 + $0xe2c] sm:$0xf]  ;;  %v8534_v37 = vld [vmem:[%s11004_s30 + $0xe38] sm:$0xf0]  ;;  %v8409_v48 = vor.u32 %v10237_v36, %v8406_v47 }
 0x2e4   : > { %6268 = vmatpush.bf16.msrb.mxu2 %v8601_v8  ;;  %v8553_v8 = vor.u32 %v10273_v44, %v8550_v12  ;;  %v5926_v2 = vadd.f32 %v12783_v39, %v5912_v57  ;;  %v10301_v23 = vld [vmem:[%s11004_s30 + $0xf2c] sm:$0xf]  ;;  %v8662_v5 = vld [vmem:[%s11004_s30 + $0xf38] sm:$0xf0]  ;;  %v8537_v22 = vor.u32 %v10269_v43, %v8534_v37 }
 0x2e5   : > { %6282 = vmatpush.bf16.msrb.mxu3 %v8729_v42  ;;  %v8681_v42 = vor.u32 %v10305_v20, %v8678_v31  ;;  %v5967_v7 = vpop.f32.mrf.mxu0  ;;  %v8262_v1 = vld [vmem:[%s11004_s30 + $0xc18] sm:$0xf0]  ;;  %v8665_v10 = vor.u32 %v10301_v23, %v8662_v5  ;;  %v10297_v33 = vld [vmem:[%s11004_s30 + $0xf0c] sm:$0xf] }
 0x2e6   : > { %6241 = vmatpush.bf16.msrb.mxu0 %v8329_v58  ;;  %v5900_v58 = vadd.f32 %v12775_v6, %v5886_v11  ;;  %v5940_v39 = vadd.f32 %v12806_v29, %v5926_v2  ;;  %v10233_v6 = vld [vmem:[%s11004_s30 + $0xd0c] sm:$0xf]  ;;  %v8390_v61 = vld [vmem:[%s11004_s30 + $0xd18] sm:$0xf0] }
 0x2e7   : > { %6255 = vmatpush.bf16.msrb.mxu1 %v8457_v18  ;;  %v5981_v59 = vpop.f32.mrf.mxu1  ;;  %v8281_v18 = vor.u32 %v10205_v35, %v8278_v24  ;;  %v8518_v13 = vld [vmem:[%s11004_s30 + $0xe18] sm:$0xf0]  ;;  %v10357_v3 = vld [vmem:[%s11004_s30 + $0x10ec] sm:$0xf]  ;;  %v8393_v34 = vor.u32 %v10233_v6, %v8390_v61 }
 0x2e8   : > { %6269 = vmatpush.bf16.msrb.mxu2 %v8585_v27  ;;  %v10201_v27 = vld [vmem:[%s11004_s30 + $0xc0c] sm:$0xf]  ;;  %v8646_v17 = vld [vmem:[%s11004_s30 + $0xf18] sm:$0xf0]  ;;  %v5914_v29 = vadd.f32 %v12818_v63, %v5900_v58  ;;  %v5954_v21 = vadd.f32 %v12809_v49, %v5940_v39  ;;  %v6009_v49 = vpop.f32.mrf.mxu3 }
 0x2e9   : > { %6283 = vmatpush.bf16.msrb.mxu3 %v8713_v62  ;;  %v10265_v62 = vld [vmem:[%s11004_s30 + $0xe0c] sm:$0xf]  ;;  %v9142_v30 = vld [vmem:[%s11004_s30 + $0x12f8] sm:$0xf0]  ;;  %v8649_v12 = vor.u32 %v10297_v33, %v8646_v17 }
 0x2ea   : > { %6242 = vmatpush.bf16.msrb.mxu0 %v8313_v26  ;;  %v8886_v26 = vld [vmem:[%s11004_s30 + $0x10f8] sm:$0xf0]  ;;  %v10389_v0 = vld [vmem:[%s11004_s30 + $0x11ec] sm:$0xf]  ;;  %v5928_v20 = vadd.f32 %v12822_v52, %v5914_v29  ;;  %v5968_v31 = vadd.f32 %v5967_v7, %v5954_v21 }
 0x2eb   : > { %6256 = vmatpush.bf16.msrb.mxu1 %v8441_v45  ;;  %v8265_v45 = vor.u32 %v10201_v27, %v8262_v1  ;;  %v10421_v16 = vld [vmem:[%s11004_s30 + $0x12ec] sm:$0xf]  ;;  %v9270_v63 = vld [vmem:[%s11004_s30 + $0x13f8] sm:$0xf0]  ;;  %v5995_v44 = vpop.f32.mrf.mxu2  ;;  %v8889_v57 = vor.u32 %v10357_v3, %v8886_v26 }
 0x2ec   : > { %6270 = vmatpush.bf16.msrb.mxu2 %v8569_v28  ;;  %v9014_v28 = vld [vmem:[%s11004_s30 + $0x11f8] sm:$0xf0]  ;;  %v10453_v54 = vld [vmem:[%s11004_s30 + $0x13ec] sm:$0xf]  ;;  %v5942_v43 = vadd.f32 %v12839_v4, %v5928_v20  ;;  %v5982_v5 = vadd.f32 %v5981_v59, %v5968_v31 }
 0x2ed   : > { %6284 = vmatpush.bf16.msrb.mxu3 %v8697_v25  ;;  %v8521_v25 = vor.u32 %v10265_v62, %v8518_v13  ;;  %v9017_v11 = vor.u32 %v10389_v0, %v9014_v28  ;;  %v10385_v35 = vld [vmem:[%s11004_s30 + $0x11cc] sm:$0xf]  ;;  %v9273_v24 = vor.u32 %v10453_v54, %v9270_v63  ;;  %v8998_v36 = vld [vmem:[%s11004_s30 + $0x11d8] sm:$0xf0]  ;;  %v5969_v37 = vpop.f32.mrf.mxu0 }
 0x2ee   : > { %6243 = vmatpush.bf16.msrb.mxu0 %v8297_v50  ;;  %v9145_v50 = vor.u32 %v10421_v16, %v9142_v30  ;;  %v9126_v47 = vld [vmem:[%s11004_s30 + $0x12d8] sm:$0xf0]  ;;  %v10449_v52 = vld [vmem:[%s11004_s30 + $0x13cc] sm:$0xf]  ;;  %v9001_v58 = vor.u32 %v10385_v35, %v8998_v36  ;;  %v5956_v59 = vadd.f32 %v12845_v40, %v5942_v43  ;;  %v5996_v61 = vadd.f32 %v5995_v44, %v5982_v5 }
 0x2ef   : > { %6257 = vmatpush.bf16.msrb.mxu1 %v8425_v53  ;;  %v10353_v53 = vld [vmem:[%s11004_s30 + $0x10cc] sm:$0xf]  ;;  %v9254_v2 = vld [vmem:[%s11004_s30 + $0x13d8] sm:$0xf0]  ;;  %v5983_v7 = vpop.f32.mrf.mxu1 }
 0x2f0   : > { %6271 = vmatpush.bf16.msrb.mxu2 %v8553_v8  ;;  %v8870_v8 = vld [vmem:[%s11004_s30 + $0x10d8] sm:$0xf0]  ;;  %v10381_v1 = vld [vmem:[%s11004_s30 + $0x11ac] sm:$0xf]  ;;  %v9257_v39 = vor.u32 %v10449_v52, %v9254_v2  ;;  %v5970_v33 = vadd.f32 %v5969_v37, %v5956_v59  ;;  %v6011_v28 = vpop.f32.mrf.mxu3 }
 0x2f1   : > { %6285 = vmatpush.bf16.msrb.mxu3 %v8681_v42  ;;  %v10417_v42 = vld [vmem:[%s11004_s30 + $0x12cc] sm:$0xf]  ;;  %v8873_v23 = vor.u32 %v10353_v53, %v8870_v8  ;;  %v8854_v27 = vld [vmem:[%s11004_s30 + $0x10b8] sm:$0xf0] }
 0x2f2   : > { %6244 = vmatpush.bf16.msrb.mxu0 %v8281_v18  ;;  %v9129_v4 = vor.u32 %v10417_v42, %v9126_v47  ;;  %v10349_v18 = vld [vmem:[%s11004_s30 + $0x10ac] sm:$0xf]  ;;  %v9110_v6 = vld [vmem:[%s11004_s30 + $0x12b8] sm:$0xf0]  ;;  %v5984_v63 = vadd.f32 %v5983_v7, %v5970_v33 }
 0x2f3   : > { %6258 = vmatpush.bf16.msrb.mxu1 %v8409_v48  ;;  %v8982_v48 = vld [vmem:[%s11004_s30 + $0x11b8] sm:$0xf0]  ;;  %v10445_v62 = vld [vmem:[%s11004_s30 + $0x13ac] sm:$0xf] }
 0x2f4   : > { %6272 = vmatpush.bf16.msrb.mxu2 %v8537_v22  ;;  %v10413_v22 = vld [vmem:[%s11004_s30 + $0x12ac] sm:$0xf]  ;;  %v8985_v40 = vor.u32 %v10381_v1, %v8982_v48  ;;  %v8838_v29 = vld [vmem:[%s11004_s30 + $0x1098] sm:$0xf0]  ;;  %v12915_v48 = vld [vmem:[%s11878_s10] sm:$0xf] }
 0x2f5   : > { %6286 = vmatpush.bf16.msrb.mxu3 %v8665_v10  ;;  %v9238_v10 = vld [vmem:[%s11004_s30 + $0x13b8] sm:$0xf0]  ;;  %v10345_v13 = vld [vmem:[%s11004_s30 + $0x108c] sm:$0xf]  ;;  %v9113_v17 = vor.u32 %v10413_v22, %v9110_v6  ;;  %v6437_v22 = vperm.slane %v12915_v48, 2 }
 0x2f6   : > { %6245 = vmatpush.bf16.msrb.mxu0 %v8265_v45  ;;  %v8966_v3 = vld [vmem:[%s11004_s30 + $0x1198] sm:$0xf0]  ;;  %v9241_v26 = vor.u32 %v10445_v62, %v9238_v10  ;;  %v10409_v0 = vld [vmem:[%s11004_s30 + $0x128c] sm:$0xf]  ;;  %v6010_v45 = vadd.f32 %v6009_v49, %v5996_v61  ;;  %v6023_v16 = vpop.f32.mrf.mxu0 }
 0x2f7   : > { %6259 = vmatpush.bf16.msrb.mxu1 %v8393_v34  ;;  %v10441_v30 = vld [vmem:[%s11004_s30 + $0x138c] sm:$0xf]  ;;  %v9222_v21 = vld [vmem:[%s11004_s30 + $0x1398] sm:$0xf0]  ;;  %v8841_v34 = vor.u32 %v10345_v13, %v8838_v29  ;;  %v6037_v54 = vpop.f32.mrf.mxu1 }
 0x2f8   : > { %6273 = vmatpush.bf16.msrb.mxu2 %v8521_v25  ;;  %v6024_v44 = vadd.f32 %v6023_v16, %v6010_v45  ;;  %v8822_v20 = vld [vmem:[%s11004_s30 + $0x1078] sm:$0xf0]  ;;  %v10373_v31 = vld [vmem:[%s11004_s30 + $0x116c] sm:$0xf]  ;;  %v9225_v49 = vor.u32 %v10441_v30, %v9222_v21 }
 0x2f9   : > { %6287 = vmatpush.bf16.msrb.mxu3 %v8649_v12  ;;  %6246 = vmatmul.bf16.vlgmr.msrb.gmra.mxu0 %v11313_v32  ;;  %v8857_v32 = vor.u32 %v10349_v18, %v8854_v27  ;;  %v9078_v53 = vld [vmem:[%s11004_s30 + $0x1278] sm:$0xf0]  ;;  %v10437_v35 = vld [vmem:[%s11004_s30 + $0x136c] sm:$0xf] }
 0x2fa   : > { %6294 = vmatpush.bf16.msra.mxu0 %v8889_v57  ;;  %6260 = vmatmul.bf16.vlgmr.msrb.gmra.mxu1 %v11320_v41  ;;  %v5997_v41 = vpop.f32.mrf.mxu2  ;;  %v10341_v57 = vld [vmem:[%s11004_s30 + $0x106c] sm:$0xf]  ;;  %v6038_v47 = vadd.f32 %v6037_v54, %v6024_v44  ;;  %v8806_v52 = vld [vmem:[%s11004_s30 + $0x1058] sm:$0xf0] }
 0x2fb   : > { %6308 = vmatpush.bf16.msra.mxu1 %v9017_v11  ;;  %6274 = vmatmul.bf16.vlgmr.msrb.gmra.mxu2 %v11318_v38  ;;  %v10377_v38 = vld [vmem:[%s11004_s30 + $0x118c] sm:$0xf]  ;;  %v8950_v11 = vld [vmem:[%s11004_s30 + $0x1178] sm:$0xf0]  ;;  %v5998_v8 = vadd.f32 %v5997_v41, %v5984_v63  ;;  %v8825_v36 = vor.u32 %v10341_v57, %v8822_v20 }
 0x2fc   : > { %6322 = vmatpush.bf16.msra.mxu2 %v9145_v50  ;;  %6288 = vmatmul.bf16.vlgmr.msrb.gmra.mxu3 %v11324_v46  ;;  %v9094_v46 = vld [vmem:[%s11004_s30 + $0x1298] sm:$0xf0]  ;;  %v8969_v25 = vor.u32 %v10377_v38, %v8966_v3  ;;  %v10405_v50 = vld [vmem:[%s11004_s30 + $0x126c] sm:$0xf]  ;;  %v8953_v43 = vor.u32 %v10373_v31, %v8950_v11 }
 0x2fd   : > { %6336 = vmatpush.bf16.msra.mxu3 %v9273_v24  ;;  %v9097_v12 = vor.u32 %v10409_v0, %v9094_v46  ;;  %v9206_v24 = vld [vmem:[%s11004_s30 + $0x1378] sm:$0xf0]  ;;  %v10337_v42 = vld [vmem:[%s11004_s30 + $0x104c] sm:$0xf]  ;;  %v9081_v37 = vor.u32 %v10405_v50, %v9078_v53  ;;  %v6012_v18 = vadd.f32 %v6011_v28, %v5998_v8 }
 0x2fe   : > { %6295 = vmatpush.bf16.msra.mxu0 %v8873_v23  ;;  %v10369_v2 = vld [vmem:[%s11004_s30 + $0x114c] sm:$0xf]  ;;  %v8934_v7 = vld [vmem:[%s11004_s30 + $0x1158] sm:$0xf0]  ;;  %v9209_v23 = vor.u32 %v10437_v35, %v9206_v24  ;;  %v6025_v1 = vpop.f32.mrf.mxu0  ;;  %v8809_v61 = vor.u32 %v10337_v42, %v8806_v52 }
 0x2ff   : > { %6309 = vmatpush.bf16.msra.mxu1 %v9001_v58  ;;  %v10401_v58 = vld [vmem:[%s11004_s30 + $0x124c] sm:$0xf]  ;;  %v9190_v59 = vld [vmem:[%s11004_s30 + $0x1358] sm:$0xf0]  ;;  %v8937_v62 = vor.u32 %v10369_v2, %v8934_v7  ;;  %v6026_v10 = vadd.f32 %v6025_v1, %v6012_v18  ;;  %v6039_v38 = vpop.f32.mrf.mxu1 }
 0x300   : > { %6323 = vmatpush.bf16.msra.mxu2 %v9129_v4  ;;  %v9062_v4 = vld [vmem:[%s11004_s30 + $0x1258] sm:$0xf0]  ;;  %v10433_v6 = vld [vmem:[%s11004_s30 + $0x134c] sm:$0xf] }
 0x301   : > { %6337 = vmatpush.bf16.msra.mxu3 %v9257_v39  ;;  %v6065_v39 = vpop.f32.mrf.mxu3  ;;  %v9065_v13 = vor.u32 %v10401_v58, %v9062_v4  ;;  %v10333_v33 = vld [vmem:[%s11004_s30 + $0x102c] sm:$0xf]  ;;  %v9193_v29 = vor.u32 %v10433_v6, %v9190_v59  ;;  %v8918_v3 = vld [vmem:[%s11004_s30 + $0x1138] sm:$0xf0] }
 0x302   : > { %6296 = vmatpush.bf16.msra.mxu0 %v8857_v32  ;;  %v6051_v5 = vpop.f32.mrf.mxu2  ;;  %v10397_v41 = vld [vmem:[%s11004_s30 + $0x122c] sm:$0xf]  ;;  %v9174_v45 = vld [vmem:[%s11004_s30 + $0x1338] sm:$0xf0] }
 0x303   : > { %6310 = vmatpush.bf16.msra.mxu1 %v8985_v40  ;;  %v6052_v27 = vadd.f32 %v6051_v5, %v6038_v47  ;;  %v8790_v40 = vld [vmem:[%s11004_s30 + $0x1038] sm:$0xf0]  ;;  %v10429_v46 = vld [vmem:[%s11004_s30 + $0x132c] sm:$0xf] }
 0x304   : > { %6324 = vmatpush.bf16.msra.mxu2 %v9113_v17  ;;  %v10365_v17 = vld [vmem:[%s11004_s30 + $0x112c] sm:$0xf]  ;;  %v8793_v28 = vor.u32 %v10333_v33, %v8790_v40  ;;  %v8774_v30 = vld [vmem:[%s11004_s30 + $0x1018] sm:$0xf0] }
 0x305   : > { %6338 = vmatpush.bf16.msra.mxu3 %v9241_v26  ;;  %v6066_v32 = vadd.f32 %v6065_v39, %v6052_v27  ;;  %v9046_v26 = vld [vmem:[%s11004_s30 + $0x1238] sm:$0xf0]  ;;  %v10329_v16 = vld [vmem:[%s11004_s30 + $0x100c] sm:$0xf] }
 0x306   : > { %6297 = vmatpush.bf16.msra.mxu0 %v8841_v34  ;;  %v10361_v21 = vld [vmem:[%s11004_s30 + $0x110c] sm:$0xf]  ;;  %v6040_v34 = vadd.f32 %v6039_v38, %v6026_v10  ;;  %v9049_v54 = vor.u32 %v10397_v41, %v9046_v26  ;;  %v8902_v63 = vld [vmem:[%s11004_s30 + $0x1118] sm:$0xf0]  ;;  %v8777_v24 = vor.u32 %v10329_v16, %v8774_v30 }
 0x307   : > { %6311 = vmatpush.bf16.msra.mxu1 %v8969_v25  ;;  %v6445_v0 = vadd.f32 %v6437_v22, %v6066_v32  ;;  %v8921_v25 = vor.u32 %v10365_v17, %v8918_v3  ;;  %v10393_v44 = vld [vmem:[%s11004_s30 + $0x120c] sm:$0xf]  ;;  %v9030_v20 = vld [vmem:[%s11004_s30 + $0x1218] sm:$0xf0] }
 0x308   : > { %6325 = vmatpush.bf16.msra.mxu2 %v9097_v12  ;;  %v9177_v12 = vor.u32 %v10429_v46, %v9174_v45  ;;  %v10425_v31 = vld [vmem:[%s11004_s30 + $0x130c] sm:$0xf]  ;;  %v9398_v8 = vld [vmem:[%s11004_s30 + $0x14f8] sm:$0xf0]  ;;  %v9033_v52 = vor.u32 %v10393_v44, %v9030_v20 }
 0x309   : > { %6339 = vmatpush.bf16.msra.mxu3 %v9225_v49  ;;  %6453 = vst [vmem:[%s11906_s19 + $0x10] sm:$0xff] %v6445_v0  ;;  %v9158_v49 = vld [vmem:[%s11004_s30 + $0x1318] sm:$0xf0]  ;;  %v6067_v50 = vpop.f32.mrf.mxu3  ;;  %v10485_v53 = vld [vmem:[%s11004_s30 + $0x14ec] sm:$0xf] }
 0x30a   : > { %6298 = vmatpush.bf16.msra.mxu0 %v8825_v36  ;;  %v6053_v57 = vpop.f32.mrf.mxu2  ;;  %v10517_v35 = vld [vmem:[%s11004_s30 + $0x15ec] sm:$0xf]  ;;  %v9526_v36 = vld [vmem:[%s11004_s30 + $0x15f8] sm:$0xf0]  ;;  %v9401_v5 = vor.u32 %v10485_v53, %v9398_v8 }
 0x30b   : > { %6312 = vmatpush.bf16.msra.mxu1 %v8953_v43  ;;  %v6054_v11 = vadd.f32 %v6053_v57, %v6040_v34  ;;  %v10549_v42 = vld [vmem:[%s11004_s30 + $0x16ec] sm:$0xf]  ;;  %v9654_v47 = vld [vmem:[%s11004_s30 + $0x16f8] sm:$0xf0]  ;;  %v9529_v4 = vor.u32 %v10517_v35, %v9526_v36 }
 0x30c   : > { %6326 = vmatpush.bf16.msra.mxu2 %v9081_v37  ;;  %v8905_v37 = vor.u32 %v10361_v21, %v8902_v63  ;;  %v10581_v2 = vld [vmem:[%s11004_s30 + $0x17ec] sm:$0xf]  ;;  %v9782_v7 = vld [vmem:[%s11004_s30 + $0x17f8] sm:$0xf0]  ;;  %v9657_v18 = vor.u32 %v10549_v42, %v9654_v47 }
 0x30d   : > { %6340 = vmatpush.bf16.msra.mxu3 %v9209_v23  ;;  %v6068_v43 = vadd.f32 %v6067_v50, %v6054_v11  ;;  %v9161_v23 = vor.u32 %v10425_v31, %v9158_v49  ;;  %v10481_v27 = vld [vmem:[%s11004_s30 + $0x14cc] sm:$0xf]  ;;  %v9382_v1 = vld [vmem:[%s11004_s30 + $0x14d8] sm:$0xf0]  ;;  %v9785_v6 = vor.u32 %v10581_v2, %v9782_v7 }
 0x30e   : > { %6299 = vmatpush.bf16.msra.mxu0 %v8809_v61  ;;  %v10513_v39 = vld [vmem:[%s11004_s30 + $0x15cc] sm:$0xf]  ;;  %v9510_v59 = vld [vmem:[%s11004_s30 + $0x15d8] sm:$0xf0]  ;;  %v9385_v32 = vor.u32 %v10481_v27, %v9382_v1 }
 0x30f   : > { %6313 = vmatpush.bf16.msra.mxu1 %v8937_v62  ;;  %v6449_v58 = vadd.f32 %v6437_v22, %v6068_v43  ;;  %v10545_v61 = vld [vmem:[%s11004_s30 + $0x16cc] sm:$0xf]  ;;  %v9638_v62 = vld [vmem:[%s11004_s30 + $0x16d8] sm:$0xf0] }
 0x310   : > { %6327 = vmatpush.bf16.msra.mxu2 %v9065_v13  ;;  %v10577_v10 = vld [vmem:[%s11004_s30 + $0x17cc] sm:$0xf]  ;;  %v9766_v22 = vld [vmem:[%s11004_s30 + $0x17d8] sm:$0xf0]  ;;  %v9513_v13 = vor.u32 %v10513_v39, %v9510_v59  ;;  %v9641_v33 = vor.u32 %v10545_v61, %v9638_v62 }
 0x311   : > { %6341 = vmatpush.bf16.msra.mxu3 %v9193_v29  ;;  %6457 = vst [vmem:[%s11906_s19 + $0x30] sm:$0xff] %v6449_v58  ;;  %v10477_v40 = vld [vmem:[%s11004_s30 + $0x14ac] sm:$0xf]  ;;  %v9366_v17 = vld [vmem:[%s11004_s30 + $0x14b8] sm:$0xf0]  ;;  %v9769_v38 = vor.u32 %v10577_v10, %v9766_v22 }
 0x312   : > { %6300 = vmatpush.bf16.msra.mxu0 %v8793_v28  ;;  %v10509_v29 = vld [vmem:[%s11004_s30 + $0x15ac] sm:$0xf]  ;;  %v9494_v3 = vld [vmem:[%s11004_s30 + $0x15b8] sm:$0xf0] }
 0x313   : > { %6314 = vmatpush.bf16.msra.mxu1 %v8921_v25  ;;  %v10541_v41 = vld [vmem:[%s11004_s30 + $0x16ac] sm:$0xf]  ;;  %v9622_v26 = vld [vmem:[%s11004_s30 + $0x16b8] sm:$0xf0]  ;;  %v9497_v45 = vor.u32 %v10509_v29, %v9494_v3 }
 0x314   : > { %6328 = vmatpush.bf16.msra.mxu2 %v9049_v54  ;;  %v10573_v0 = vld [vmem:[%s11004_s30 + $0x17ac] sm:$0xf]  ;;  %v9750_v46 = vld [vmem:[%s11004_s30 + $0x17b8] sm:$0xf0]  ;;  %v9625_v28 = vor.u32 %v10541_v41, %v9622_v26 }
 0x315   : > { %6342 = vmatpush.bf16.msra.mxu3 %v9177_v12  ;;  %v10473_v16 = vld [vmem:[%s11004_s30 + $0x148c] sm:$0xf]  ;;  %v9478_v21 = vld [vmem:[%s11004_s30 + $0x1598] sm:$0xf0] }
 0x316   : > { %6301 = vmatpush.bf16.msra.mxu0 %v8777_v24  ;;  %v10505_v30 = vld [vmem:[%s11004_s30 + $0x158c] sm:$0xf]  ;;  %v9734_v54 = vld [vmem:[%s11004_s30 + $0x1798] sm:$0xf0] }
 0x317   : > { %6315 = vmatpush.bf16.msra.mxu1 %v8905_v37  ;;  %v10537_v34 = vld [vmem:[%s11004_s30 + $0x168c] sm:$0xf]  ;;  %v9481_v44 = vor.u32 %v10505_v30, %v9478_v21  ;;  %v9334_v20 = vld [vmem:[%s11004_s30 + $0x1478] sm:$0xf0]  ;;  %v6079_v30 = vpop.f32.mrf.mxu0 }
 0x318   : > { %6329 = vmatpush.bf16.msra.mxu2 %v9033_v52  ;;  %v10569_v25 = vld [vmem:[%s11004_s30 + $0x178c] sm:$0xf]  ;;  %v9462_v11 = vld [vmem:[%s11004_s30 + $0x1578] sm:$0xf0] }
 0x319   : > { %6343 = vmatpush.bf16.msra.mxu3 %v9161_v23  ;;  %6302 = vmatmul.bf16.vlgmr.msra.gmra.mxu0 %v11389_v51  ;;  %v9369_v51 = vor.u32 %v10477_v40, %v9366_v17  ;;  %v10469_v57 = vld [vmem:[%s11004_s30 + $0x146c] sm:$0xf]  ;;  %v9737_v49 = vor.u32 %v10569_v25, %v9734_v54  ;;  %v9590_v53 = vld [vmem:[%s11004_s30 + $0x1678] sm:$0xf0] }
 0x31a   : > { %6350 = vmatpush.bf16.msrb.mxu0 %v9401_v5  ;;  %6316 = vmatmul.bf16.vlgmr.msra.gmra.mxu1 %v11396_v56  ;;  %v9753_v56 = vor.u32 %v10573_v0, %v9750_v46  ;;  %v10501_v31 = vld [vmem:[%s11004_s30 + $0x156c] sm:$0xf]  ;;  %v9718_v35 = vld [vmem:[%s11004_s30 + $0x1778] sm:$0xf0]  ;;  %v9337_v24 = vor.u32 %v10469_v57, %v9334_v20 }
 0x31b   : > { %6364 = vmatpush.bf16.msrb.mxu1 %v9529_v4  ;;  %6330 = vmatmul.bf16.vlgmr.msra.gmra.mxu2 %v11394_v55  ;;  %v9350_v55 = vld [vmem:[%s11004_s30 + $0x1498] sm:$0xf0]  ;;  %v10533_v50 = vld [vmem:[%s11004_s30 + $0x166c] sm:$0xf]  ;;  %v9465_v36 = vor.u32 %v10501_v31, %v9462_v11 }
 0x31c   : > { %6378 = vmatpush.bf16.msrb.mxu2 %v9657_v18  ;;  %6344 = vmatmul.bf16.vlgmr.msra.gmra.mxu3 %v11400_v60  ;;  %v9606_v60 = vld [vmem:[%s11004_s30 + $0x1698] sm:$0xf0]  ;;  %v9353_v63 = vor.u32 %v10473_v16, %v9350_v55  ;;  %v10565_v8 = vld [vmem:[%s11004_s30 + $0x176c] sm:$0xf]  ;;  %v9593_v42 = vor.u32 %v10533_v50, %v9590_v53 }
 0x31d   : > { %6392 = vmatpush.bf16.msrb.mxu3 %v9785_v6  ;;  %v9609_v12 = vor.u32 %v10537_v34, %v9606_v60  ;;  %v10465_v47 = vld [vmem:[%s11004_s30 + $0x144c] sm:$0xf]  ;;  %v9318_v43 = vld [vmem:[%s11004_s30 + $0x1458] sm:$0xf0]  ;;  %v9721_v52 = vor.u32 %v10565_v8, %v9718_v35 }
 0x31e   : > { %6351 = vmatpush.bf16.msrb.mxu0 %v9385_v32  ;;  %v10497_v37 = vld [vmem:[%s11004_s30 + $0x154c] sm:$0xf]  ;;  %v9446_v2 = vld [vmem:[%s11004_s30 + $0x1558] sm:$0xf0]  ;;  %v9321_v4 = vor.u32 %v10465_v47, %v9318_v43  ;;  %v6107_v21 = vpop.f32.mrf.mxu2 }
 0x31f   : > { %6365 = vmatpush.bf16.msrb.mxu1 %v9513_v13  ;;  %v10529_v7 = vld [vmem:[%s11004_s30 + $0x164c] sm:$0xf]  ;;  %v9574_v23 = vld [vmem:[%s11004_s30 + $0x1658] sm:$0xf0]  ;;  %v9449_v18 = vor.u32 %v10497_v37, %v9446_v2  ;;  %v6121_v34 = vpop.f32.mrf.mxu3  ;;  %v6081_v60 = vpop.f32.mrf.mxu0 }
 0x320   : > { %6379 = vmatpush.bf16.msrb.mxu2 %v9641_v33  ;;  %v10561_v5 = vld [vmem:[%s11004_s30 + $0x174c] sm:$0xf]  ;;  %v9702_v58 = vld [vmem:[%s11004_s30 + $0x1758] sm:$0xf0]  ;;  %v9577_v27 = vor.u32 %v10529_v7, %v9574_v23 }
 0x321   : > { %6393 = vmatpush.bf16.msrb.mxu3 %v9769_v38  ;;  %v10461_v1 = vld [vmem:[%s11004_s30 + $0x142c] sm:$0xf]  ;;  %v9302_v39 = vld [vmem:[%s11004_s30 + $0x1438] sm:$0xf0]  ;;  %v9705_v59 = vor.u32 %v10561_v5, %v9702_v58 }
 0x322   : > { %6352 = vmatpush.bf16.msrb.mxu0 %v9369_v51  ;;  %v10493_v6 = vld [vmem:[%s11004_s30 + $0x152c] sm:$0xf]  ;;  %v9430_v61 = vld [vmem:[%s11004_s30 + $0x1538] sm:$0xf0]  ;;  %v9305_v13 = vor.u32 %v10461_v1, %v9302_v39 }
 0x323   : > { %6366 = vmatpush.bf16.msrb.mxu1 %v9497_v45  ;;  %v10525_v62 = vld [vmem:[%s11004_s30 + $0x162c] sm:$0xf]  ;;  %v9558_v10 = vld [vmem:[%s11004_s30 + $0x1638] sm:$0xf0]  ;;  %v9433_v33 = vor.u32 %v10493_v6, %v9430_v61 }
 0x324   : > { %6380 = vmatpush.bf16.msrb.mxu2 %v9625_v28  ;;  %v10557_v22 = vld [vmem:[%s11004_s30 + $0x172c] sm:$0xf]  ;;  %v9686_v32 = vld [vmem:[%s11004_s30 + $0x1738] sm:$0xf0]  ;;  %v9561_v40 = vor.u32 %v10525_v62, %v9558_v10 }
 0x325   : > { %6394 = vmatpush.bf16.msrb.mxu3 %v9753_v56  ;;  %v10457_v17 = vld [vmem:[%s11004_s30 + $0x140c] sm:$0xf]  ;;  %v9286_v29 = vld [vmem:[%s11004_s30 + $0x1418] sm:$0xf0]  ;;  %v9689_v3 = vor.u32 %v10557_v22, %v9686_v32  ;;  %v6093_v56 = vpop.f32.mrf.mxu1 }
 0x326   : > { %6353 = vmatpush.bf16.msrb.mxu0 %v9353_v63  ;;  %v10489_v38 = vld [vmem:[%s11004_s30 + $0x150c] sm:$0xf]  ;;  %v9414_v41 = vld [vmem:[%s11004_s30 + $0x1518] sm:$0xf0]  ;;  %v9289_v45 = vor.u32 %v10457_v17, %v9286_v29  ;;  %v6109_v54 = vpop.f32.mrf.mxu2 }
 0x327   : > { %6367 = vmatpush.bf16.msrb.mxu1 %v9481_v44  ;;  %v10521_v26 = vld [vmem:[%s11004_s30 + $0x160c] sm:$0xf]  ;;  %v9542_v0 = vld [vmem:[%s11004_s30 + $0x1618] sm:$0xf0]  ;;  %v9417_v28 = vor.u32 %v10489_v38, %v9414_v41  ;;  %v6123_v63 = vpop.f32.mrf.mxu3 }
 0x328   : > { %6381 = vmatpush.bf16.msrb.mxu2 %v9609_v12  ;;  %v10553_v46 = vld [vmem:[%s11004_s30 + $0x170c] sm:$0xf]  ;;  %v9670_v51 = vld [vmem:[%s11004_s30 + $0x1718] sm:$0xf0]  ;;  %v9545_v16 = vor.u32 %v10521_v26, %v9542_v0 }
 0x329   : > { %6395 = vmatpush.bf16.msrb.mxu3 %v9737_v49  ;;  %v9673_v55 = vor.u32 %v10553_v46, %v9670_v51 }
 0x32a   : > { %6354 = vmatpush.bf16.msrb.mxu0 %v9337_v24 }
 0x32b   : > { %6368 = vmatpush.bf16.msrb.mxu1 %v9465_v36 }
 0x32c   : > { %6382 = vmatpush.bf16.msrb.mxu2 %v9593_v42 }
 0x32d   : > { %6396 = vmatpush.bf16.msrb.mxu3 %v9721_v52  ;;  %v6095_v25 = vpop.f32.mrf.mxu1 }
 0x32e   : > { %6355 = vmatpush.bf16.msrb.mxu0 %v9321_v4  ;;  %v6096_v8 = vadd.f32 %v6095_v25, %v6081_v60 }
 0x32f   : > { %6369 = vmatpush.bf16.msrb.mxu1 %v9449_v18 }
 0x330   : > { %6383 = vmatpush.bf16.msrb.mxu2 %v9577_v27  ;;  %v6110_v42 = vadd.f32 %v6109_v54, %v6096_v8 }
 0x331   : > { %6397 = vmatpush.bf16.msrb.mxu3 %v9705_v59 }
 0x332   : > { %6356 = vmatpush.bf16.msrb.mxu0 %v9305_v13  ;;  %v6124_v52 = vadd.f32 %v6123_v63, %v6110_v42 }
 0x333   : > { %6370 = vmatpush.bf16.msrb.mxu1 %v9433_v33 }
 0x334   : > { %6384 = vmatpush.bf16.msrb.mxu2 %v9561_v40 }
 0x335   : > { %6398 = vmatpush.bf16.msrb.mxu3 %v9689_v3 }
 0x336   : > { %6357 = vmatpush.bf16.msrb.mxu0 %v9289_v45  ;;  %v6135_v44 = vpop.f32.mrf.mxu0 }
 0x337   : > { %6371 = vmatpush.bf16.msrb.mxu1 %v9417_v28  ;;  %v6149_v12 = vpop.f32.mrf.mxu1 }
 0x338   : > { %6385 = vmatpush.bf16.msrb.mxu2 %v9545_v16 }
 0x339   : > { %6399 = vmatpush.bf16.msrb.mxu3 %v9673_v55  ;;  %6358 = vmatmul.bf16.vlgmr.msrb.gmra.mxu0 %v11465_v9  ;;  %v6094_v9 = vadd.f32 %v6093_v56, %v6079_v30 }
 0x33a   : > { %6372 = vmatmul.bf16.vlgmr.msrb.gmra.mxu1 %v11472_v15 }
 0x33b   : > { %6386 = vmatmul.bf16.vlgmr.msrb.gmra.mxu2 %v11470_v14  ;;  %v6108_v15 = vadd.f32 %v6107_v21, %v6094_v9 }
 0x33c   : > { %6400 = vmatmul.bf16.vlgmr.msrb.gmra.mxu3 %v11476_v19 }
 0x33d   : > { %v6122_v19 = vadd.f32 %v6121_v34, %v6108_v15 }
 0x33e   : > { %v6163_v57 = vpop.f32.mrf.mxu2  ;;  %v6137_v31 = vpop.f32.mrf.mxu0 }
 0x33f   : > { %v6177_v20 = vpop.f32.mrf.mxu3  ;;  %v6151_v49 = vpop.f32.mrf.mxu1  ;;  %v6136_v35 = vadd.f32 %v6135_v44, %v6122_v19  ;;  %v6138_v7 = vadd.f32 %v6137_v31, %v6124_v52 }
 0x341   : > { %v6150_v47 = vadd.f32 %v6149_v12, %v6136_v35  ;;  %v6152_v18 = vadd.f32 %v6151_v49, %v6138_v7  ;;  %v6438_v35 = vperm.slane %v12915_v48, 3 }
 0x343   : > { %v6164_v2 = vadd.f32 %v6163_v57, %v6150_v47 }
 0x345   : > { %v6178_v5 = vadd.f32 %v6177_v20, %v6164_v2 }
 0x346   : > { %v6165_v11 = vpop.f32.mrf.mxu2 }
 0x347   : > { %v6179_v14 = vpop.f32.mrf.mxu3  ;;  %v6166_v39 = vadd.f32 %v6165_v11, %v6152_v18 }
 0x349   : > { %v6180_v61 = vadd.f32 %v6179_v14, %v6166_v39 }
 0x356   : > { %v6191_v50 = vpop.f32.mrf.mxu0 }
 0x357   : > { %v6205_v53 = vpop.f32.mrf.mxu1  ;;  %v6192_v27 = vadd.f32 %v6191_v50, %v6178_v5 }
 0x359   : > { %v6206_v6 = vadd.f32 %v6205_v53, %v6192_v27 }
 0x35e   : > { %v6219_v24 = vpop.f32.mrf.mxu2  ;;  %v6193_v43 = vpop.f32.mrf.mxu0 }
 0x35f   : > { %v6233_v36 = vpop.f32.mrf.mxu3  ;;  %v6207_v37 = vpop.f32.mrf.mxu1  ;;  %v6220_v62 = vadd.f32 %v6219_v24, %v6206_v6  ;;  %v6194_v22 = vadd.f32 %v6193_v43, %v6180_v61 }
 0x361   : > { %v6234_v13 = vadd.f32 %v6233_v36, %v6220_v62  ;;  %v6208_v40 = vadd.f32 %v6207_v37, %v6194_v22 }
 0x366   : > { %v6221_v23 = vpop.f32.mrf.mxu2 }
 0x367   : > { %v6235_v58 = vpop.f32.mrf.mxu3  ;;  %v6222_v29 = vadd.f32 %v6221_v23, %v6208_v40 }
 0x369   : > { %v6236_v0 = vadd.f32 %v6235_v58, %v6222_v29 }
 0x376   : > { %v6247_v4 = vpop.f32.mrf.mxu0 }
 0x377   : > { %v6261_v1 = vpop.f32.mrf.mxu1  ;;  %v6248_v17 = vadd.f32 %v6247_v4, %v6234_v13 }
 0x379   : > { %v6262_v3 = vadd.f32 %v6261_v1, %v6248_v17 }
 0x37e   : > { %v6275_v59 = vpop.f32.mrf.mxu2  ;;  %v6249_v32 = vpop.f32.mrf.mxu0 }
 0x37f   : > { %v6289_v10 = vpop.f32.mrf.mxu3  ;;  %v6263_v33 = vpop.f32.mrf.mxu1  ;;  %v6276_v46 = vadd.f32 %v6275_v59, %v6262_v3  ;;  %v6250_v45 = vadd.f32 %v6249_v32, %v6236_v0 }
 0x381   : > { %v6290_v28 = vadd.f32 %v6289_v10, %v6276_v46  ;;  %v6264_v55 = vadd.f32 %v6263_v33, %v6250_v45 }
 0x386   : > { %v6277_v38 = vpop.f32.mrf.mxu2 }
 0x387   : > { %v6291_v41 = vpop.f32.mrf.mxu3  ;;  %v6278_v21 = vadd.f32 %v6277_v38, %v6264_v55 }
 0x389   : > { %v6292_v54 = vadd.f32 %v6291_v41, %v6278_v21 }
 0x396   : > { %v6303_v26 = vpop.f32.mrf.mxu0 }
 0x397   : > { %v6317_v51 = vpop.f32.mrf.mxu1  ;;  %v6304_v30 = vadd.f32 %v6303_v26, %v6290_v28 }
 0x399   : > { %v6318_v60 = vadd.f32 %v6317_v51, %v6304_v30 }
 0x39e   : > { %v6331_v16 = vpop.f32.mrf.mxu2  ;;  %v6305_v34 = vpop.f32.mrf.mxu0 }
 0x39f   : > { %v6345_v56 = vpop.f32.mrf.mxu3  ;;  %v6319_v25 = vpop.f32.mrf.mxu1  ;;  %v6332_v63 = vadd.f32 %v6331_v16, %v6318_v60  ;;  %v6306_v44 = vadd.f32 %v6305_v34, %v6292_v54 }
 0x3a1   : > { %v6346_v57 = vadd.f32 %v6345_v56, %v6332_v63  ;;  %v6320_v9 = vadd.f32 %v6319_v25, %v6306_v44 }
 0x3a6   : > { %v6333_v12 = vpop.f32.mrf.mxu2 }
 0x3a7   : > { %v6347_v20 = vpop.f32.mrf.mxu3  ;;  %v6334_v11 = vadd.f32 %v6333_v12, %v6320_v9 }
 0x3a9   : > { %v6348_v19 = vadd.f32 %v6347_v20, %v6334_v11 }
 0x3b6   : > { %v6359_v31 = vpop.f32.mrf.mxu0 }
 0x3b7   : > { %v6360_v49 = vadd.f32 %v6359_v31, %v6346_v57  ;;  %v6373_v15 = vpop.f32.mrf.mxu1 }
 0x3b9   : > { %v6374_v14 = vadd.f32 %v6373_v15, %v6360_v49 }
 0x3be   : > { %v6387_v50 = vpop.f32.mrf.mxu2  ;;  %v6361_v24 = vpop.f32.mrf.mxu0 }
 0x3bf   : > { %v6388_v53 = vadd.f32 %v6387_v50, %v6374_v14  ;;  %v6401_v8 = vpop.f32.mrf.mxu3  ;;  %v6362_v42 = vadd.f32 %v6361_v24, %v6348_v19  ;;  %v6375_v43 = vpop.f32.mrf.mxu1 }
 0x3c1   : > { %v6402_v36 = vadd.f32 %v6401_v8, %v6388_v53  ;;  %v6376_v37 = vadd.f32 %v6375_v43, %v6362_v42 }
 0x3c3   : > { %v6446_v47 = vadd.f32 %v6438_v35, %v6402_v36 }
 0x3c5   : > { %6454 = vst [vmem:[%s11906_s19 + $0x18] sm:$0xff] %v6446_v47 }
 0x3c6   : > { %v6389_v52 = vpop.f32.mrf.mxu2 }
 0x3c7   : > { %v6390_v2 = vadd.f32 %v6389_v52, %v6376_v37  ;;  %v6403_v48 = vpop.f32.mrf.mxu3 }
 0x3c9   : > { %v6404_v7 = vadd.f32 %v6403_v48, %v6390_v2 }
 0x3cb   : > { %v6450_v23 = vadd.f32 %v6438_v35, %v6404_v7 }
 0x3cd   : > { %6458 = vst [vmem:[%s11906_s19 + $0x38] sm:$0xff] %v6450_v23 }
 0x3ce   : > { %10792 = shalt.err (!%p10789_p13)
}
 0x3cf   : > { %s10859_s28 = smov 512   ;;  %s10860_s30 = smov 1024  }
 0x3d0   : > { %s10861_s1 = smov 32  }
 0x3d1   : > { %10595 = dma.vmem_to_hbm [thread:$0]  (%p10964_p0), %s6476_s7, 1024, %s6478_s8, %s6460_s15, %s10859_s28, %s10860_s30, %s10861_s1  }
 0x3d2 PF: > { %s6492_s6 = sand.u32 1, %s10831_s12   ;;  %p10609_p4 = pnand %p6609_p3, %p10968_p2 }
 0x3d3   : > { %s6493_s10 = scalar_lea.sflag [#allocation5], %s6492_s6 }
 0x3d4   : > { %p10610_p5 = pneg %p10609_p4 }
 0x3d6   : > { %10826 = dma.done.wait (%p10610_p5), %s6493_s10, 1024  }
 0x3d7   : > { %10828 = vsyncadd (%p10610_p5), %s6493_s10, 4294966272  ;;  %s20_s17 = sadd.s32 1, %s10851_s17   ;;  %s13080_s12 = smov %s10835_s13 }
 0x3d8   : > { %p17_p1 = scmp.ge.s32.totalorder %s20_s17, 4   ;;  %s13081_s13 = smov %s10839_s14 }
 0x3d9   : > { %s13082_s14 = smov %s10930_s24  ;;  %s13083_s15 = smov %s10847_s16 }
 0x3da   : > { %s13084_s16 = smov %s13086_s18  ;;  %19 = sbr.rel (!%p17_p1) target bundleno = 10 (0xa), region = 102 }
 0x3df   :  { %6499 = vsyncpa [#allocation4], 1 }
 0x3e0   :  { %6501 = vsyncpa [#allocation4 + $0x1], 1 }
 0x3e1   :  { %6502 = vsyncpa [#allocation7], 1 }
 0x3e2   :  { %6504 = vsyncpa [#allocation7 + $0x1], 1 }
 0x3e3   :  { %6505 = vsyncpa [#allocation5], 1 }
 0x3e4   :  { %6507 = vsyncpa [#allocation5 + $0x1], 1 }

</bundles_post_ra>
